<compile_context>
chip_gen: v7x
topology: tpu7x:2x2x1
jax: 0.10.0
libtpu: 0.0.40
codegen_flags: <defaults>
</compile_context>

<pallas_src>
import functools

import jax
import jax.numpy as jnp
from jax.experimental import pallas as pl
from jax.experimental.pallas import tpu as pltpu

_MXU_DTYPE = jnp.bfloat16      # MXU operand dtype (accumulation stays f32)
_LN_EPS = 1e-6
_CLAMP = 1.0
_TAPS = tuple((dy, dx) for dy in (-1, 0, 1) for dx in (-1, 0, 1))   # tap 4 = center


# ---------------------------------------------------------------------------
# Packed-parameter layout (shared by init and kernel)
# ---------------------------------------------------------------------------

def _vec_layout(hidden, c):
    """Row layout of the per-branch packed (rows, 1) vector parameter."""
    return (('sb1', hidden), ('sb2', c),
            ('ln1_w', c), ('ln1_b', c),
            ('b1', 2 * c), ('bdw', 2 * c), ('bsca', c), ('b3', c),
            ('ln2_w', c), ('ln2_b', c), ('b4', 2 * c), ('b5', c),
            ('beta', c), ('gamma', c))


_VEC_INIT = {'sb1': 'rand', 'sb2': 'rand',
             'ln1_w': 'ones', 'ln1_b': 'zeros',
             'b1': 'rand', 'bdw': 'rand', 'bsca': 'rand', 'b3': 'rand',
             'ln2_w': 'ones', 'ln2_b': 'zeros', 'b4': 'rand', 'b5': 'rand',
             'beta': 'zeros', 'gamma': 'zeros'}      # beta/gamma zero-init (as in PyTorch)


# ---------------------------------------------------------------------------
# Fused InvBlock kernel: F, H, G branches + affine coupling, one grid step = one
# batch element.  Activations are lane-dense (C, H*W): pixels in lanes.
# ---------------------------------------------------------------------------

def _invblock_kernel(*refs, H, W, clamp, num_image, dims):
    (masks_ref, x1_ref, x2_ref,
     fw1, fw2, fdw, fpk, fvec,
     hw1, hw2, hdw, hpk, hvec,
     gw1, gw2, gdw, gpk, gvec,
     y1_ref, y2_ref) = refs

    HW = H * W
    m32 = masks_ref[...]                               # (9, HW) f32 in {0, 1}
    tap_off = [dy * W + dx for dy, dx in _TAPS]

    def shift(x, t):
        # z[:, h*W + w] = x[:, (h+dy)*W + (w+dx)]   (wrap, fixed by mask)
        off = tap_off[t]
        return x if off == 0 else pltpu.roll(x, shift=(-off) % HW, axis=1)

    def conv3x3(x, w_ref, b):
        # x: (Cin, HW) f32, w: (Cout, 9*Cin) bf16 -> one im2col MXU matmul.
        taps = []
        for t in range(9):
            z = shift(x, t)
            if t != 4:
                z = z * m32[t:t + 1]                   # zero out-of-image taps
            taps.append(z.astype(_MXU_DTYPE))          # bf16 patches buffer
        patches = jnp.concatenate(taps, axis=0)        # (9*Cin, HW) bf16
        return jnp.dot(w_ref[...], patches,
                       preferred_element_type=jnp.float32) + b

    def mm(w, x):
        # w: (Cout, Cin) bf16 value, x: (Cin, HW) f32 -> lane-dense matmul.
        return jnp.dot(w, x.astype(_MXU_DTYPE),
                       preferred_element_type=jnp.float32)

    def dwconv3x3(x, w_ref, b):
        # depthwise 3x3: x (C, HW) f32, w (C, 9) f32, b (C, 1) -- pure VPU.
        w = w_ref[...]
        acc = w[:, 4:5] * x                            # center tap
        for t in range(9):
            if t == 4:
                continue
            acc = acc + w[:, t:t + 1] * (shift(x, t) * m32[t:t + 1])
        return acc + b

    def layernorm(x, g, b):
        # LayerNorm2d: normalize over channels (sublane axis), f32 statistics.
        mu = jnp.mean(x, axis=0, keepdims=True)
        var = jnp.mean((x - mu) ** 2, axis=0, keepdims=True)
        return (x - mu) * jax.lax.rsqrt(var + _LN_EPS) * g + b

    def branch(x_in, w1_ref, w2_ref, dw_ref, pk_ref, vec_ref, hidden, c):
        # packed (rows, 1) vectors
        vec = vec_ref[...]
        offs, o = {}, 0
        for name, n in _vec_layout(hidden, c):
            offs[name] = (o, n)
            o += n

        def v(name):
            a, n = offs[name]
            return vec[a:a + n]                        # (n, 1)

        # packed 1x1 weights: rows [w1(2c); wsca(c); w3(c); w4(2c); w5(c)]
        wp = pk_ref[...]                               # (7c, c) bf16
        w1, wsca, w3 = wp[:2 * c], wp[2 * c:3 * c], wp[3 * c:4 * c]
        w4, w5 = wp[4 * c:6 * c], wp[6 * c:]

        # ---- synthetic subnet: conv3x3 -> LeakyReLU(0.2) -> conv3x3 --------
        t = conv3x3(x_in, w1_ref, v('sb1'))
        t = jnp.where(t >= 0, t, 0.2 * t)
        t = conv3x3(t, w2_ref, v('sb2'))

        # ---- NAFBlock -------------------------------------------------------
        x = layernorm(t, v('ln1_w'), v('ln1_b'))
        x = mm(w1, x) + v('b1')                        # c -> 2c
        x = dwconv3x3(x, dw_ref, v('bdw'))             # depthwise 3x3
        x = x[:c] * x[c:]                              # SimpleGate -> c
        # SCA: pool-then-conv (matches nn.Sequential(AvgPool, 1x1 conv))
        pooled = jnp.mean(x, axis=1, keepdims=True)    # (c, 1) global avg pool
        att = jnp.dot(wsca.astype(jnp.float32), pooled,
                      preferred_element_type=jnp.float32) + v('bsca')
        x = x * att
        x = mm(w3, x) + v('b3')                        # c -> c
        y = t + x * v('beta')
        x = layernorm(y, v('ln2_w'), v('ln2_b'))
        x = mm(w4, x) + v('b4')                        # c -> 2c
        x = x[:c] * x[c:]                              # SimpleGate -> c
        x = mm(w5, x) + v('b5')                        # c -> c
        return y + x * v('gamma')

    # ---- InvBlock body (everything below stays in VMEM / registers) --------
    x1 = x1_ref[0].astype(jnp.float32)                 # (c_ho, HW)
    x2 = x2_ref[0].astype(jnp.float32)                 # (c_hi*num_image, HW)

    y1 = x1 + branch(x2, fw1, fw2, fdw, fpk, fvec, *dims['F'])   # y1 = x1 + NF(F(x2))
    h = branch(y1, hw1, hw2, hdw, hpk, hvec, *dims['H'])         # NH(H(y1))
    g = branch(y1, gw1, gw2, gdw, gpk, gvec, *dims['G'])         # NG(G(y1))

    s = clamp * (jax.nn.sigmoid(h) * 2.0 - 1.0)
    es = jnp.exp(s)
    c_hi = dims['G'][1]
    parts = [x2[i * c_hi:(i + 1) * c_hi] * es + g for i in range(num_image)]
    y2 = parts[0] if num_image == 1 else jnp.concatenate(parts, axis=0)

    y1_ref[...] = y1[None].astype(y1_ref.dtype)
    y2_ref[...] = y2[None].astype(y2_ref.dtype)


def _branch_flops(cin, hidden, cout, HW):
    c = cout
    fl = 2 * hidden * 9 * cin * HW + 2 * cout * 9 * hidden * HW   # subnet 3x3s
    fl += 2 * (2 * c) * c * HW                                    # conv1 (1x1)
    fl += 18 * (2 * c) * HW                                       # depthwise 3x3
    fl += 2 * c * c                                               # SCA on pooled vec
    fl += 2 * c * c * HW + 2 * (2 * c) * c * HW + 2 * c * c * HW  # conv3/4/5
    return fl


def inv_block_forward(x1, x2_list, blk, H, W, masks, clamp=_CLAMP):
    """One fused pallas_call per InvBlock (F + H + G + coupling)."""
    num_image = len(x2_list)
    x2cat = x2_list[0] if num_image == 1 else jnp.concatenate(x2_list, axis=1)
    B = x1.shape[0]
    HW = H * W
    c_ho = x1.shape[1]
    c_hi = x2_list[0].shape[1]

    # (hidden, naf_channels) per branch, derived from weight shapes (static).
    dims = {k: (blk[k]['sw1'].shape[0], blk[k]['sw2'].shape[0])
            for k in ('F', 'H', 'G')}

    params = []
    for k in ('F', 'H', 'G'):
        p = blk[k]
        params += [p['sw1'], p['sw2'], p['wdw'], p['wpack'], p['vec']]

    data = [masks, x1, x2cat]
    in_specs = [pl.BlockSpec(masks.shape, lambda b: (0, 0)),
                pl.BlockSpec((1, c_ho, HW), lambda b: (b, 0, 0)),
                pl.BlockSpec((1, x2cat.shape[1], HW), lambda b: (b, 0, 0))]
    in_specs += [pl.BlockSpec(p.shape, lambda b: (0, 0)) for p in params]

    out_shape = (jax.ShapeDtypeStruct((B, c_ho, HW), jnp.float32),
                 jax.ShapeDtypeStruct((B, c_hi * num_image, HW), jnp.float32))
    out_specs = (pl.BlockSpec((1, c_ho, HW), lambda b: (b, 0, 0)),
                 pl.BlockSpec((1, c_hi * num_image, HW), lambda b: (b, 0, 0)))

    # Advisory cost estimate for XLA's scheduler.
    flops = 0
    for k in ('F', 'H', 'G'):
        hidden, cout = dims[k]
        cin = blk[k]['sw1'].shape[1] // 9
        flops += _branch_flops(cin, hidden, cout, HW)
    flops *= B
    transc = B * HW * (2 * c_hi + 12)
    bytes_acc = 4 * B * HW * (2 * c_ho + 2 * x2cat.shape[1]) + 4 * masks.size
    bytes_acc += sum(int(p.size) * jnp.dtype(p.dtype).itemsize for p in params)

    kern = functools.partial(_invblock_kernel, H=H, W=W, clamp=clamp,
                             num_image=num_image, dims=dims)
    y1, y2cat = pl.pallas_call(
        kern,
        out_shape=out_shape,
        grid=(B,),
        in_specs=in_specs,
        out_specs=out_specs,
        compiler_params=pltpu.CompilerParams(
            dimension_semantics=("parallel",),          # v7x: 2 TCs share the batch
            vmem_limit_bytes=32 * 1024 * 1024),
        cost_estimate=pl.CostEstimate(flops=int(flops),
                                      transcendentals=int(transc),
                                      bytes_accessed=int(bytes_acc)),
    )(*data, *params)

    if num_image == 1:
        y2 = [y2cat]
    else:
        y2 = [y2cat[:, i * c_hi:(i + 1) * c_hi] for i in range(num_image)]
    return y1, y2


# ---------------------------------------------------------------------------
# InvNN composition (plain-JAX glue; activations stay (B, C, H*W))
# ---------------------------------------------------------------------------

def _make_masks(H, W):
    """(9, H*W) {0,1} validity masks for the 3x3 stencil taps (built once)."""
    HW = H * W
    lane = jnp.arange(HW, dtype=jnp.int32)
    h_i = lane // W
    w_i = lane % W
    rows = []
    for dy, dx in _TAPS:
        valid = ((h_i + dy >= 0) & (h_i + dy < H) &
                 (w_i + dx >= 0) & (w_i + dx < W))
        rows.append(valid.astype(jnp.float32))
    return jnp.stack(rows, axis=0)


def invnn_forward(params, x, x_h):
    """InvNN.forward with rev=False, cal_jacobian=False.  x: NCHW, x_h: list of NCHW."""
    B, C, H, W = x.shape
    masks = _make_masks(H, W)
    y = x.reshape(B, C, H * W)                         # free reshape, no transpose
    yh = [t.reshape(B, t.shape[1], H * W) for t in x_h]
    for blk in params['operations']:
        y, yh = inv_block_forward(y, yh, blk, H, W, masks, clamp=_CLAMP)
    y = y.reshape(B, C, H, W)
    yh = [t.reshape(B, t.shape[1], H, W) for t in yh]
    return y, yh


# ---------------------------------------------------------------------------
# Deterministic parameter initialization (packed layout)
# ---------------------------------------------------------------------------

def _rand(state, shape, scale=0.1):
    state['i'] += 1
    return scale * jax.random.normal(jax.random.fold_in(state['key'], state['i']),
                                     shape, jnp.float32)


def init_branch_params(state, cin, cout, hidden):
    """subnet(conv3x3->LReLU->conv3x3) + NAFBlock params, packed for the kernel."""
    c = cout
    sw1 = _rand(state, (hidden, 9 * cin)).astype(_MXU_DTYPE)       # im2col layout
    sw2 = _rand(state, (cout, 9 * hidden)).astype(_MXU_DTYPE)
    wdw = _rand(state, (2 * c, 9))                                  # depthwise (f32, VPU)
    # packed 1x1 weights: rows [w1(2c); wsca(c); w3(c); w4(2c); w5(c)]
    wpack = jnp.concatenate([_rand(state, (2 * c, c)), _rand(state, (c, c)),
                             _rand(state, (c, c)), _rand(state, (2 * c, c)),
                             _rand(state, (c, c))], axis=0).astype(_MXU_DTYPE)
    # packed (rows, 1) vectors (biases, LN affine, beta/gamma)
    pieces = []
    for name, n in _vec_layout(hidden, c):
        kind = _VEC_INIT[name]
        if kind == 'ones':
            pieces.append(jnp.ones((n, 1), jnp.float32))
        elif kind == 'zeros':
            pieces.append(jnp.zeros((n, 1), jnp.float32))
        else:
            pieces.append(_rand(state, (n, 1), scale=0.02))
    vec = jnp.concatenate(pieces, axis=0)
    return {'sw1': sw1, 'sw2': sw2, 'wdw': wdw, 'wpack': wpack, 'vec': vec}


def init_invblock_params(state, c_ho, c_hi, num_image):
    hidden = 2 * max(c_ho, c_hi)
    return {
        'F': init_branch_params(state, c_hi * num_image, c_ho, hidden),
        'H': init_branch_params(state, c_ho, c_hi, hidden),
        'G': init_branch_params(state, c_ho, c_hi, hidden),
    }


# ---------------------------------------------------------------------------

if __name__ == "__main__":
    # Small config consistent with the module: channel_in_ho = channel_in_hi = 4,
    # block_num=[1,1], down_num=2 -> 2 InvBlocks; batch=2, 16x16 spatial.
    B, C, H, W = 2, 4, 16, 16
    num_image = 1
    block_num = [1, 1]

    kstate = {'key': jax.random.PRNGKey(0), 'i': 0}
    operations = [init_invblock_params(kstate, C, C, num_image)
                  for n in block_num for _ in range(n)]
    params = {'operations': operations}

    kx, kh = jax.random.split(jax.random.PRNGKey(0))
    x = jax.random.normal(kx, (B, C, H, W), jnp.float32)
    x_h = [jax.random.normal(jax.random.fold_in(kh, i), (B, C, H, W), jnp.float32)
           for i in range(num_image)]

    fwd = jax.jit(invnn_forward)
    y, y_h = fwd(params, x, x_h)
    jax.block_until_ready((y, y_h))

    assert y.shape == (B, C, H, W)
    assert all(t.shape == (B, C, H, W) for t in y_h)
    assert bool(jnp.all(jnp.isfinite(y)))
    assert all(bool(jnp.all(jnp.isfinite(t))) for t in y_h)
    print("KERNEL_OK")
</pallas_src>

<mosaic_0001>
module attributes {stable_mosaic.version = 11 : i64} {
  func.func @_invblock_kernel(%arg0: i32, %arg1: memref<9x256xf32, #tpu.memory_space<vmem>>, %arg2: memref<1x4x256xf32, #tpu.memory_space<vmem>>, %arg3: memref<1x4x256xf32, #tpu.memory_space<vmem>>, %arg4: memref<8x36xbf16, #tpu.memory_space<vmem>>, %arg5: memref<4x72xbf16, #tpu.memory_space<vmem>>, %arg6: memref<8x9xf32, #tpu.memory_space<vmem>>, %arg7: memref<28x4xbf16, #tpu.memory_space<vmem>>, %arg8: memref<72x1xf32, #tpu.memory_space<vmem>>, %arg9: memref<8x36xbf16, #tpu.memory_space<vmem>>, %arg10: memref<4x72xbf16, #tpu.memory_space<vmem>>, %arg11: memref<8x9xf32, #tpu.memory_space<vmem>>, %arg12: memref<28x4xbf16, #tpu.memory_space<vmem>>, %arg13: memref<72x1xf32, #tpu.memory_space<vmem>>, %arg14: memref<8x36xbf16, #tpu.memory_space<vmem>>, %arg15: memref<4x72xbf16, #tpu.memory_space<vmem>>, %arg16: memref<8x9xf32, #tpu.memory_space<vmem>>, %arg17: memref<28x4xbf16, #tpu.memory_space<vmem>>, %arg18: memref<72x1xf32, #tpu.memory_space<vmem>>, %arg19: memref<1x4x256xf32, #tpu.memory_space<vmem>>, %arg20: memref<1x4x256xf32, #tpu.memory_space<vmem>>) attributes {dimension_semantics = [#tpu.dimension_semantics<parallel>], iteration_bounds = array<i64: 2>, scalar_prefetch = 0 : i64, scratch_operands = 0 : i64, tpu.core_type = #tpu.core_type<tc>, window_params = [{pipeline_mode = #tpu.pipeline_mode<synchronous>, transform_indices = @transform_0, window_bounds = array<i64: 9, 256>}, {transform_indices = @transform_1, window_bounds = array<i64: 1, 4, 256>}, {transform_indices = @transform_2, window_bounds = array<i64: 1, 4, 256>}, {pipeline_mode = #tpu.pipeline_mode<synchronous>, transform_indices = @transform_3, window_bounds = array<i64: 8, 36>}, {pipeline_mode = #tpu.pipeline_mode<synchronous>, transform_indices = @transform_4, window_bounds = array<i64: 4, 72>}, {pipeline_mode = #tpu.pipeline_mode<synchronous>, transform_indices = @transform_5, window_bounds = array<i64: 8, 9>}, {pipeline_mode = #tpu.pipeline_mode<synchronous>, transform_indices = @transform_6, window_bounds = array<i64: 28, 4>}, {pipeline_mode = #tpu.pipeline_mode<synchronous>, transform_indices = @transform_7, window_bounds = array<i64: 72, 1>}, {pipeline_mode = #tpu.pipeline_mode<synchronous>, transform_indices = @transform_8, window_bounds = array<i64: 8, 36>}, {pipeline_mode = #tpu.pipeline_mode<synchronous>, transform_indices = @transform_9, window_bounds = array<i64: 4, 72>}, {pipeline_mode = #tpu.pipeline_mode<synchronous>, transform_indices = @transform_10, window_bounds = array<i64: 8, 9>}, {pipeline_mode = #tpu.pipeline_mode<synchronous>, transform_indices = @transform_11, window_bounds = array<i64: 28, 4>}, {pipeline_mode = #tpu.pipeline_mode<synchronous>, transform_indices = @transform_12, window_bounds = array<i64: 72, 1>}, {pipeline_mode = #tpu.pipeline_mode<synchronous>, transform_indices = @transform_13, window_bounds = array<i64: 8, 36>}, {pipeline_mode = #tpu.pipeline_mode<synchronous>, transform_indices = @transform_14, window_bounds = array<i64: 4, 72>}, {pipeline_mode = #tpu.pipeline_mode<synchronous>, transform_indices = @transform_15, window_bounds = array<i64: 8, 9>}, {pipeline_mode = #tpu.pipeline_mode<synchronous>, transform_indices = @transform_16, window_bounds = array<i64: 28, 4>}, {pipeline_mode = #tpu.pipeline_mode<synchronous>, transform_indices = @transform_17, window_bounds = array<i64: 72, 1>}, {transform_indices = @transform_18, window_bounds = array<i64: 1, 4, 256>}, {transform_indices = @transform_19, window_bounds = array<i64: 1, 4, 256>}]} {
    %c0 = arith.constant 0 : index
    %c0_0 = arith.constant 0 : index
    %0 = vector.load %arg1[%c0, %c0_0] : memref<9x256xf32, #tpu.memory_space<vmem>>, vector<9x256xf32>
    %c0_1 = arith.constant 0 : index
    %c0_2 = arith.constant 0 : index
    %c0_3 = arith.constant 0 : index
    %1 = vector.load %arg2[%c0_1, %c0_2, %c0_3] : memref<1x4x256xf32, #tpu.memory_space<vmem>>, vector<1x4x256xf32>
    %2 = vector.shape_cast %1 : vector<1x4x256xf32> to vector<4x256xf32>
    %c0_4 = arith.constant 0 : index
    %c0_5 = arith.constant 0 : index
    %c0_6 = arith.constant 0 : index
    %3 = vector.load %arg3[%c0_4, %c0_5, %c0_6] : memref<1x4x256xf32, #tpu.memory_space<vmem>>, vector<1x4x256xf32>
    %4 = vector.shape_cast %3 : vector<1x4x256xf32> to vector<4x256xf32>
    %c0_7 = arith.constant 0 : index
    %c0_8 = arith.constant 0 : index
    %5 = vector.load %arg8[%c0_7, %c0_8] : memref<72x1xf32, #tpu.memory_space<vmem>>, vector<72x1xf32>
    %c0_9 = arith.constant 0 : index
    %c0_10 = arith.constant 0 : index
    %6 = vector.load %arg7[%c0_9, %c0_10] : memref<28x4xbf16, #tpu.memory_space<vmem>>, vector<28x4xbf16>
    %7 = vector.extract_strided_slice %6 {offsets = [0, 0], sizes = [8, 4], strides = [1, 1]} : vector<28x4xbf16> to vector<8x4xbf16>
    %8 = vector.extract_strided_slice %6 {offsets = [8, 0], sizes = [4, 4], strides = [1, 1]} : vector<28x4xbf16> to vector<4x4xbf16>
    %9 = vector.extract_strided_slice %6 {offsets = [12, 0], sizes = [4, 4], strides = [1, 1]} : vector<28x4xbf16> to vector<4x4xbf16>
    %10 = vector.extract_strided_slice %6 {offsets = [16, 0], sizes = [8, 4], strides = [1, 1]} : vector<28x4xbf16> to vector<8x4xbf16>
    %11 = vector.extract_strided_slice %6 {offsets = [24, 0], sizes = [4, 4], strides = [1, 1]} : vector<28x4xbf16> to vector<4x4xbf16>
    %12 = vector.extract_strided_slice %5 {offsets = [0, 0], sizes = [8, 1], strides = [1, 1]} : vector<72x1xf32> to vector<8x1xf32>
    %c17_i32 = arith.constant 17 : i32
    %13 = tpu.dynamic_rotate %4 by %c17_i32 dim 1 : vector<4x256xf32>, i32 -> vector<4x256xf32>
    %14 = vector.extract_strided_slice %0 {offsets = [0, 0], sizes = [1, 256], strides = [1, 1]} : vector<9x256xf32> to vector<1x256xf32>
    %15 = vector.broadcast %14 : vector<1x256xf32> to vector<4x256xf32>
    %16 = arith.mulf %13, %15 : vector<4x256xf32>
    %17 = arith.truncf %16 : vector<4x256xf32> to vector<4x256xbf16>
    %c16_i32 = arith.constant 16 : i32
    %18 = tpu.dynamic_rotate %4 by %c16_i32 dim 1 : vector<4x256xf32>, i32 -> vector<4x256xf32>
    %19 = vector.extract_strided_slice %0 {offsets = [1, 0], sizes = [1, 256], strides = [1, 1]} : vector<9x256xf32> to vector<1x256xf32>
    %20 = vector.broadcast %19 : vector<1x256xf32> to vector<4x256xf32>
    %21 = arith.mulf %18, %20 : vector<4x256xf32>
    %22 = arith.truncf %21 : vector<4x256xf32> to vector<4x256xbf16>
    %c15_i32 = arith.constant 15 : i32
    %23 = tpu.dynamic_rotate %4 by %c15_i32 dim 1 : vector<4x256xf32>, i32 -> vector<4x256xf32>
    %24 = vector.extract_strided_slice %0 {offsets = [2, 0], sizes = [1, 256], strides = [1, 1]} : vector<9x256xf32> to vector<1x256xf32>
    %25 = vector.broadcast %24 : vector<1x256xf32> to vector<4x256xf32>
    %26 = arith.mulf %23, %25 : vector<4x256xf32>
    %27 = arith.truncf %26 : vector<4x256xf32> to vector<4x256xbf16>
    %c1_i32 = arith.constant 1 : i32
    %28 = tpu.dynamic_rotate %4 by %c1_i32 dim 1 : vector<4x256xf32>, i32 -> vector<4x256xf32>
    %29 = vector.extract_strided_slice %0 {offsets = [3, 0], sizes = [1, 256], strides = [1, 1]} : vector<9x256xf32> to vector<1x256xf32>
    %30 = vector.broadcast %29 : vector<1x256xf32> to vector<4x256xf32>
    %31 = arith.mulf %28, %30 : vector<4x256xf32>
    %32 = arith.truncf %31 : vector<4x256xf32> to vector<4x256xbf16>
    %33 = arith.truncf %4 : vector<4x256xf32> to vector<4x256xbf16>
    %c255_i32 = arith.constant 255 : i32
    %34 = tpu.dynamic_rotate %4 by %c255_i32 dim 1 : vector<4x256xf32>, i32 -> vector<4x256xf32>
    %35 = vector.extract_strided_slice %0 {offsets = [5, 0], sizes = [1, 256], strides = [1, 1]} : vector<9x256xf32> to vector<1x256xf32>
    %36 = vector.broadcast %35 : vector<1x256xf32> to vector<4x256xf32>
    %37 = arith.mulf %34, %36 : vector<4x256xf32>
    %38 = arith.truncf %37 : vector<4x256xf32> to vector<4x256xbf16>
    %c241_i32 = arith.constant 241 : i32
    %39 = tpu.dynamic_rotate %4 by %c241_i32 dim 1 : vector<4x256xf32>, i32 -> vector<4x256xf32>
    %40 = vector.extract_strided_slice %0 {offsets = [6, 0], sizes = [1, 256], strides = [1, 1]} : vector<9x256xf32> to vector<1x256xf32>
    %41 = vector.broadcast %40 : vector<1x256xf32> to vector<4x256xf32>
    %42 = arith.mulf %39, %41 : vector<4x256xf32>
    %43 = arith.truncf %42 : vector<4x256xf32> to vector<4x256xbf16>
    %c240_i32 = arith.constant 240 : i32
    %44 = tpu.dynamic_rotate %4 by %c240_i32 dim 1 : vector<4x256xf32>, i32 -> vector<4x256xf32>
    %45 = vector.extract_strided_slice %0 {offsets = [7, 0], sizes = [1, 256], strides = [1, 1]} : vector<9x256xf32> to vector<1x256xf32>
    %46 = vector.broadcast %45 : vector<1x256xf32> to vector<4x256xf32>
    %47 = arith.mulf %44, %46 : vector<4x256xf32>
    %48 = arith.truncf %47 : vector<4x256xf32> to vector<4x256xbf16>
    %c239_i32 = arith.constant 239 : i32
    %49 = tpu.dynamic_rotate %4 by %c239_i32 dim 1 : vector<4x256xf32>, i32 -> vector<4x256xf32>
    %50 = vector.extract_strided_slice %0 {offsets = [8, 0], sizes = [1, 256], strides = [1, 1]} : vector<9x256xf32> to vector<1x256xf32>
    %51 = vector.broadcast %50 : vector<1x256xf32> to vector<4x256xf32>
    %52 = arith.mulf %49, %51 : vector<4x256xf32>
    %53 = arith.truncf %52 : vector<4x256xf32> to vector<4x256xbf16>
    %54 = tpu.concatenate %17, %22, %27, %32, %33, %38, %43, %48, %53 in 0 : vector<4x256xbf16>, vector<4x256xbf16>, vector<4x256xbf16>, vector<4x256xbf16>, vector<4x256xbf16>, vector<4x256xbf16>, vector<4x256xbf16>, vector<4x256xbf16>, vector<4x256xbf16> -> vector<36x256xbf16>
    %c0_11 = arith.constant 0 : index
    %c0_12 = arith.constant 0 : index
    %55 = vector.load %arg4[%c0_11, %c0_12] : memref<8x36xbf16, #tpu.memory_space<vmem>>, vector<8x36xbf16>
    %cst = arith.constant dense<0.000000e+00> : vector<8x256xf32>
    %56 = tpu.matmul %55, %54, %cst {dimension_numbers = #tpu.dot_dimension_numbers<[1], [0], [0], [1], [0, 0, 1, 1], [], []>} : vector<8x36xbf16>, vector<36x256xbf16>, vector<8x256xf32> -> vector<8x256xf32>
    %57 = vector.broadcast %12 : vector<8x1xf32> to vector<8x256xf32>
    %58 = arith.addf %56, %57 : vector<8x256xf32>
    %cst_13 = arith.constant 0.000000e+00 : f32
    %59 = vector.broadcast %cst_13 : f32 to vector<8x256xf32>
    %60 = arith.cmpf oge, %58, %59 : vector<8x256xf32>
    %cst_14 = arith.constant 2.000000e-01 : f32
    %61 = vector.broadcast %cst_14 : f32 to vector<8x256xf32>
    %62 = arith.mulf %61, %58 : vector<8x256xf32>
    %63 = arith.select %60, %58, %62 : vector<8x256xi1>, vector<8x256xf32>
    %64 = vector.extract_strided_slice %5 {offsets = [8, 0], sizes = [4, 1], strides = [1, 1]} : vector<72x1xf32> to vector<4x1xf32>
    %c17_i32_15 = arith.constant 17 : i32
    %65 = tpu.dynamic_rotate %63 by %c17_i32_15 dim 1 : vector<8x256xf32>, i32 -> vector<8x256xf32>
    %66 = vector.extract_strided_slice %0 {offsets = [0, 0], sizes = [1, 256], strides = [1, 1]} : vector<9x256xf32> to vector<1x256xf32>
    %67 = vector.broadcast %66 : vector<1x256xf32> to vector<8x256xf32>
    %68 = arith.mulf %65, %67 : vector<8x256xf32>
    %69 = arith.truncf %68 : vector<8x256xf32> to vector<8x256xbf16>
    %c16_i32_16 = arith.constant 16 : i32
    %70 = tpu.dynamic_rotate %63 by %c16_i32_16 dim 1 : vector<8x256xf32>, i32 -> vector<8x256xf32>
    %71 = vector.extract_strided_slice %0 {offsets = [1, 0], sizes = [1, 256], strides = [1, 1]} : vector<9x256xf32> to vector<1x256xf32>
    %72 = vector.broadcast %71 : vector<1x256xf32> to vector<8x256xf32>
    %73 = arith.mulf %70, %72 : vector<8x256xf32>
    %74 = arith.truncf %73 : vector<8x256xf32> to vector<8x256xbf16>
    %c15_i32_17 = arith.constant 15 : i32
    %75 = tpu.dynamic_rotate %63 by %c15_i32_17 dim 1 : vector<8x256xf32>, i32 -> vector<8x256xf32>
    %76 = vector.extract_strided_slice %0 {offsets = [2, 0], sizes = [1, 256], strides = [1, 1]} : vector<9x256xf32> to vector<1x256xf32>
    %77 = vector.broadcast %76 : vector<1x256xf32> to vector<8x256xf32>
    %78 = arith.mulf %75, %77 : vector<8x256xf32>
    %79 = arith.truncf %78 : vector<8x256xf32> to vector<8x256xbf16>
    %c1_i32_18 = arith.constant 1 : i32
    %80 = tpu.dynamic_rotate %63 by %c1_i32_18 dim 1 : vector<8x256xf32>, i32 -> vector<8x256xf32>
    %81 = vector.extract_strided_slice %0 {offsets = [3, 0], sizes = [1, 256], strides = [1, 1]} : vector<9x256xf32> to vector<1x256xf32>
    %82 = vector.broadcast %81 : vector<1x256xf32> to vector<8x256xf32>
    %83 = arith.mulf %80, %82 : vector<8x256xf32>
    %84 = arith.truncf %83 : vector<8x256xf32> to vector<8x256xbf16>
    %85 = arith.truncf %63 : vector<8x256xf32> to vector<8x256xbf16>
    %c255_i32_19 = arith.constant 255 : i32
    %86 = tpu.dynamic_rotate %63 by %c255_i32_19 dim 1 : vector<8x256xf32>, i32 -> vector<8x256xf32>
    %87 = vector.extract_strided_slice %0 {offsets = [5, 0], sizes = [1, 256], strides = [1, 1]} : vector<9x256xf32> to vector<1x256xf32>
    %88 = vector.broadcast %87 : vector<1x256xf32> to vector<8x256xf32>
    %89 = arith.mulf %86, %88 : vector<8x256xf32>
    %90 = arith.truncf %89 : vector<8x256xf32> to vector<8x256xbf16>
    %c241_i32_20 = arith.constant 241 : i32
    %91 = tpu.dynamic_rotate %63 by %c241_i32_20 dim 1 : vector<8x256xf32>, i32 -> vector<8x256xf32>
    %92 = vector.extract_strided_slice %0 {offsets = [6, 0], sizes = [1, 256], strides = [1, 1]} : vector<9x256xf32> to vector<1x256xf32>
    %93 = vector.broadcast %92 : vector<1x256xf32> to vector<8x256xf32>
    %94 = arith.mulf %91, %93 : vector<8x256xf32>
    %95 = arith.truncf %94 : vector<8x256xf32> to vector<8x256xbf16>
    %c240_i32_21 = arith.constant 240 : i32
    %96 = tpu.dynamic_rotate %63 by %c240_i32_21 dim 1 : vector<8x256xf32>, i32 -> vector<8x256xf32>
    %97 = vector.extract_strided_slice %0 {offsets = [7, 0], sizes = [1, 256], strides = [1, 1]} : vector<9x256xf32> to vector<1x256xf32>
    %98 = vector.broadcast %97 : vector<1x256xf32> to vector<8x256xf32>
    %99 = arith.mulf %96, %98 : vector<8x256xf32>
    %100 = arith.truncf %99 : vector<8x256xf32> to vector<8x256xbf16>
    %c239_i32_22 = arith.constant 239 : i32
    %101 = tpu.dynamic_rotate %63 by %c239_i32_22 dim 1 : vector<8x256xf32>, i32 -> vector<8x256xf32>
    %102 = vector.extract_strided_slice %0 {offsets = [8, 0], sizes = [1, 256], strides = [1, 1]} : vector<9x256xf32> to vector<1x256xf32>
    %103 = vector.broadcast %102 : vector<1x256xf32> to vector<8x256xf32>
    %104 = arith.mulf %101, %103 : vector<8x256xf32>
    %105 = arith.truncf %104 : vector<8x256xf32> to vector<8x256xbf16>
    %106 = tpu.concatenate %69, %74, %79, %84, %85, %90, %95, %100, %105 in 0 : vector<8x256xbf16>, vector<8x256xbf16>, vector<8x256xbf16>, vector<8x256xbf16>, vector<8x256xbf16>, vector<8x256xbf16>, vector<8x256xbf16>, vector<8x256xbf16>, vector<8x256xbf16> -> vector<72x256xbf16>
    %c0_23 = arith.constant 0 : index
    %c0_24 = arith.constant 0 : index
    %107 = vector.load %arg5[%c0_23, %c0_24] : memref<4x72xbf16, #tpu.memory_space<vmem>>, vector<4x72xbf16>
    %cst_25 = arith.constant dense<0.000000e+00> : vector<4x256xf32>
    %108 = tpu.matmul %107, %106, %cst_25 {dimension_numbers = #tpu.dot_dimension_numbers<[1], [0], [0], [1], [0, 0, 1, 1], [], []>} : vector<4x72xbf16>, vector<72x256xbf16>, vector<4x256xf32> -> vector<4x256xf32>
    %109 = vector.broadcast %64 : vector<4x1xf32> to vector<4x256xf32>
    %110 = arith.addf %108, %109 : vector<4x256xf32>
    %111 = vector.extract_strided_slice %5 {offsets = [12, 0], sizes = [4, 1], strides = [1, 1]} : vector<72x1xf32> to vector<4x1xf32>
    %112 = vector.extract_strided_slice %5 {offsets = [16, 0], sizes = [4, 1], strides = [1, 1]} : vector<72x1xf32> to vector<4x1xf32>
    %cst_26 = arith.constant dense<0.000000e+00> : vector<256xf32>
    %113 = vector.multi_reduction <add>, %110, %cst_26 [0] : vector<4x256xf32> to vector<256xf32>
    %114 = vector.shape_cast %113 : vector<256xf32> to vector<1x256xf32>
    %cst_27 = arith.constant 4.000000e+00 : f32
    %115 = vector.broadcast %cst_27 : f32 to vector<1x256xf32>
    %116 = arith.divf %114, %115 : vector<1x256xf32>
    %117 = vector.broadcast %116 : vector<1x256xf32> to vector<4x256xf32>
    %118 = arith.subf %110, %117 : vector<4x256xf32>
    %119 = arith.mulf %118, %118 : vector<4x256xf32>
    %cst_28 = arith.constant dense<0.000000e+00> : vector<256xf32>
    %120 = vector.multi_reduction <add>, %119, %cst_28 [0] : vector<4x256xf32> to vector<256xf32>
    %121 = vector.shape_cast %120 : vector<256xf32> to vector<1x256xf32>
    %cst_29 = arith.constant 4.000000e+00 : f32
    %122 = vector.broadcast %cst_29 : f32 to vector<1x256xf32>
    %123 = arith.divf %121, %122 : vector<1x256xf32>
    %124 = vector.broadcast %116 : vector<1x256xf32> to vector<4x256xf32>
    %125 = arith.subf %110, %124 : vector<4x256xf32>
    %cst_30 = arith.constant 9.99999997E-7 : f32
    %126 = vector.broadcast %cst_30 : f32 to vector<1x256xf32>
    %127 = arith.addf %123, %126 : vector<1x256xf32>
    %128 = math.rsqrt %127 : vector<1x256xf32>
    %129 = vector.broadcast %128 : vector<1x256xf32> to vector<4x256xf32>
    %130 = arith.mulf %125, %129 : vector<4x256xf32>
    %131 = vector.broadcast %111 : vector<4x1xf32> to vector<4x256xf32>
    %132 = arith.mulf %130, %131 : vector<4x256xf32>
    %133 = vector.broadcast %112 : vector<4x1xf32> to vector<4x256xf32>
    %134 = arith.addf %132, %133 : vector<4x256xf32>
    %135 = arith.truncf %134 : vector<4x256xf32> to vector<4x256xbf16>
    %cst_31 = arith.constant dense<0.000000e+00> : vector<8x256xf32>
    %136 = tpu.matmul %7, %135, %cst_31 {dimension_numbers = #tpu.dot_dimension_numbers<[1], [0], [0], [1], [0, 0, 1, 1], [], []>} : vector<8x4xbf16>, vector<4x256xbf16>, vector<8x256xf32> -> vector<8x256xf32>
    %137 = vector.extract_strided_slice %5 {offsets = [20, 0], sizes = [8, 1], strides = [1, 1]} : vector<72x1xf32> to vector<8x1xf32>
    %138 = vector.broadcast %137 : vector<8x1xf32> to vector<8x256xf32>
    %139 = arith.addf %136, %138 : vector<8x256xf32>
    %140 = vector.extract_strided_slice %5 {offsets = [28, 0], sizes = [8, 1], strides = [1, 1]} : vector<72x1xf32> to vector<8x1xf32>
    %c0_32 = arith.constant 0 : index
    %c0_33 = arith.constant 0 : index
    %141 = vector.load %arg6[%c0_32, %c0_33] : memref<8x9xf32, #tpu.memory_space<vmem>>, vector<8x9xf32>
    %142 = vector.extract_strided_slice %141 {offsets = [0, 4], sizes = [8, 1], strides = [1, 1]} : vector<8x9xf32> to vector<8x1xf32>
    %143 = vector.broadcast %142 : vector<8x1xf32> to vector<8x256xf32>
    %144 = arith.mulf %143, %139 : vector<8x256xf32>
    %145 = vector.extract_strided_slice %141 {offsets = [0, 0], sizes = [8, 1], strides = [1, 1]} : vector<8x9xf32> to vector<8x1xf32>
    %c17_i32_34 = arith.constant 17 : i32
    %146 = tpu.dynamic_rotate %139 by %c17_i32_34 dim 1 : vector<8x256xf32>, i32 -> vector<8x256xf32>
    %147 = vector.extract_strided_slice %0 {offsets = [0, 0], sizes = [1, 256], strides = [1, 1]} : vector<9x256xf32> to vector<1x256xf32>
    %148 = vector.broadcast %147 : vector<1x256xf32> to vector<8x256xf32>
    %149 = arith.mulf %146, %148 : vector<8x256xf32>
    %150 = vector.broadcast %145 : vector<8x1xf32> to vector<8x256xf32>
    %151 = arith.mulf %150, %149 : vector<8x256xf32>
    %152 = arith.addf %144, %151 : vector<8x256xf32>
    %153 = vector.extract_strided_slice %141 {offsets = [0, 1], sizes = [8, 1], strides = [1, 1]} : vector<8x9xf32> to vector<8x1xf32>
    %c16_i32_35 = arith.constant 16 : i32
    %154 = tpu.dynamic_rotate %139 by %c16_i32_35 dim 1 : vector<8x256xf32>, i32 -> vector<8x256xf32>
    %155 = vector.extract_strided_slice %0 {offsets = [1, 0], sizes = [1, 256], strides = [1, 1]} : vector<9x256xf32> to vector<1x256xf32>
    %156 = vector.broadcast %155 : vector<1x256xf32> to vector<8x256xf32>
    %157 = arith.mulf %154, %156 : vector<8x256xf32>
    %158 = vector.broadcast %153 : vector<8x1xf32> to vector<8x256xf32>
    %159 = arith.mulf %158, %157 : vector<8x256xf32>
    %160 = arith.addf %152, %159 : vector<8x256xf32>
    %161 = vector.extract_strided_slice %141 {offsets = [0, 2], sizes = [8, 1], strides = [1, 1]} : vector<8x9xf32> to vector<8x1xf32>
    %c15_i32_36 = arith.constant 15 : i32
    %162 = tpu.dynamic_rotate %139 by %c15_i32_36 dim 1 : vector<8x256xf32>, i32 -> vector<8x256xf32>
    %163 = vector.extract_strided_slice %0 {offsets = [2, 0], sizes = [1, 256], strides = [1, 1]} : vector<9x256xf32> to vector<1x256xf32>
    %164 = vector.broadcast %163 : vector<1x256xf32> to vector<8x256xf32>
    %165 = arith.mulf %162, %164 : vector<8x256xf32>
    %166 = vector.broadcast %161 : vector<8x1xf32> to vector<8x256xf32>
    %167 = arith.mulf %166, %165 : vector<8x256xf32>
    %168 = arith.addf %160, %167 : vector<8x256xf32>
    %169 = vector.extract_strided_slice %141 {offsets = [0, 3], sizes = [8, 1], strides = [1, 1]} : vector<8x9xf32> to vector<8x1xf32>
    %c1_i32_37 = arith.constant 1 : i32
    %170 = tpu.dynamic_rotate %139 by %c1_i32_37 dim 1 : vector<8x256xf32>, i32 -> vector<8x256xf32>
    %171 = vector.extract_strided_slice %0 {offsets = [3, 0], sizes = [1, 256], strides = [1, 1]} : vector<9x256xf32> to vector<1x256xf32>
    %172 = vector.broadcast %171 : vector<1x256xf32> to vector<8x256xf32>
    %173 = arith.mulf %170, %172 : vector<8x256xf32>
    %174 = vector.broadcast %169 : vector<8x1xf32> to vector<8x256xf32>
    %175 = arith.mulf %174, %173 : vector<8x256xf32>
    %176 = arith.addf %168, %175 : vector<8x256xf32>
    %177 = vector.extract_strided_slice %141 {offsets = [0, 5], sizes = [8, 1], strides = [1, 1]} : vector<8x9xf32> to vector<8x1xf32>
    %c255_i32_38 = arith.constant 255 : i32
    %178 = tpu.dynamic_rotate %139 by %c255_i32_38 dim 1 : vector<8x256xf32>, i32 -> vector<8x256xf32>
    %179 = vector.extract_strided_slice %0 {offsets = [5, 0], sizes = [1, 256], strides = [1, 1]} : vector<9x256xf32> to vector<1x256xf32>
    %180 = vector.broadcast %179 : vector<1x256xf32> to vector<8x256xf32>
    %181 = arith.mulf %178, %180 : vector<8x256xf32>
    %182 = vector.broadcast %177 : vector<8x1xf32> to vector<8x256xf32>
    %183 = arith.mulf %182, %181 : vector<8x256xf32>
    %184 = arith.addf %176, %183 : vector<8x256xf32>
    %185 = vector.extract_strided_slice %141 {offsets = [0, 6], sizes = [8, 1], strides = [1, 1]} : vector<8x9xf32> to vector<8x1xf32>
    %c241_i32_39 = arith.constant 241 : i32
    %186 = tpu.dynamic_rotate %139 by %c241_i32_39 dim 1 : vector<8x256xf32>, i32 -> vector<8x256xf32>
    %187 = vector.extract_strided_slice %0 {offsets = [6, 0], sizes = [1, 256], strides = [1, 1]} : vector<9x256xf32> to vector<1x256xf32>
    %188 = vector.broadcast %187 : vector<1x256xf32> to vector<8x256xf32>
    %189 = arith.mulf %186, %188 : vector<8x256xf32>
    %190 = vector.broadcast %185 : vector<8x1xf32> to vector<8x256xf32>
    %191 = arith.mulf %190, %189 : vector<8x256xf32>
    %192 = arith.addf %184, %191 : vector<8x256xf32>
    %193 = vector.extract_strided_slice %141 {offsets = [0, 7], sizes = [8, 1], strides = [1, 1]} : vector<8x9xf32> to vector<8x1xf32>
    %c240_i32_40 = arith.constant 240 : i32
    %194 = tpu.dynamic_rotate %139 by %c240_i32_40 dim 1 : vector<8x256xf32>, i32 -> vector<8x256xf32>
    %195 = vector.extract_strided_slice %0 {offsets = [7, 0], sizes = [1, 256], strides = [1, 1]} : vector<9x256xf32> to vector<1x256xf32>
    %196 = vector.broadcast %195 : vector<1x256xf32> to vector<8x256xf32>
    %197 = arith.mulf %194, %196 : vector<8x256xf32>
    %198 = vector.broadcast %193 : vector<8x1xf32> to vector<8x256xf32>
    %199 = arith.mulf %198, %197 : vector<8x256xf32>
    %200 = arith.addf %192, %199 : vector<8x256xf32>
    %201 = vector.extract_strided_slice %141 {offsets = [0, 8], sizes = [8, 1], strides = [1, 1]} : vector<8x9xf32> to vector<8x1xf32>
    %c239_i32_41 = arith.constant 239 : i32
    %202 = tpu.dynamic_rotate %139 by %c239_i32_41 dim 1 : vector<8x256xf32>, i32 -> vector<8x256xf32>
    %203 = vector.extract_strided_slice %0 {offsets = [8, 0], sizes = [1, 256], strides = [1, 1]} : vector<9x256xf32> to vector<1x256xf32>
    %204 = vector.broadcast %203 : vector<1x256xf32> to vector<8x256xf32>
    %205 = arith.mulf %202, %204 : vector<8x256xf32>
    %206 = vector.broadcast %201 : vector<8x1xf32> to vector<8x256xf32>
    %207 = arith.mulf %206, %205 : vector<8x256xf32>
    %208 = arith.addf %200, %207 : vector<8x256xf32>
    %209 = vector.broadcast %140 : vector<8x1xf32> to vector<8x256xf32>
    %210 = arith.addf %208, %209 : vector<8x256xf32>
    %211 = vector.extract_strided_slice %210 {offsets = [0, 0], sizes = [4, 256], strides = [1, 1]} : vector<8x256xf32> to vector<4x256xf32>
    %212 = vector.extract_strided_slice %210 {offsets = [4, 0], sizes = [4, 256], strides = [1, 1]} : vector<8x256xf32> to vector<4x256xf32>
    %213 = arith.mulf %211, %212 : vector<4x256xf32>
    %cst_42 = arith.constant dense<0.000000e+00> : vector<4xf32>
    %214 = vector.multi_reduction <add>, %213, %cst_42 [1] : vector<4x256xf32> to vector<4xf32>
    %215 = vector.shape_cast %214 : vector<4xf32> to vector<4x1xf32>
    %cst_43 = arith.constant 2.560000e+02 : f32
    %216 = vector.broadcast %cst_43 : f32 to vector<4x1xf32>
    %217 = arith.divf %215, %216 : vector<4x1xf32>
    %218 = arith.extf %8 : vector<4x4xbf16> to vector<4x4xf32>
    %cst_44 = arith.constant dense<0.000000e+00> : vector<4x1xf32>
    %219 = tpu.matmul %218, %217, %cst_44 {dimension_numbers = #tpu.dot_dimension_numbers<[1], [0], [0], [1], [0, 0, 1, 1], [], []>} : vector<4x4xf32>, vector<4x1xf32>, vector<4x1xf32> -> vector<4x1xf32>
    %220 = vector.extract_strided_slice %5 {offsets = [36, 0], sizes = [4, 1], strides = [1, 1]} : vector<72x1xf32> to vector<4x1xf32>
    %221 = arith.addf %219, %220 : vector<4x1xf32>
    %222 = vector.broadcast %221 : vector<4x1xf32> to vector<4x256xf32>
    %223 = arith.mulf %213, %222 : vector<4x256xf32>
    %224 = arith.truncf %223 : vector<4x256xf32> to vector<4x256xbf16>
    %cst_45 = arith.constant dense<0.000000e+00> : vector<4x256xf32>
    %225 = tpu.matmul %9, %224, %cst_45 {dimension_numbers = #tpu.dot_dimension_numbers<[1], [0], [0], [1], [0, 0, 1, 1], [], []>} : vector<4x4xbf16>, vector<4x256xbf16>, vector<4x256xf32> -> vector<4x256xf32>
    %226 = vector.extract_strided_slice %5 {offsets = [40, 0], sizes = [4, 1], strides = [1, 1]} : vector<72x1xf32> to vector<4x1xf32>
    %227 = vector.broadcast %226 : vector<4x1xf32> to vector<4x256xf32>
    %228 = arith.addf %225, %227 : vector<4x256xf32>
    %229 = vector.extract_strided_slice %5 {offsets = [64, 0], sizes = [4, 1], strides = [1, 1]} : vector<72x1xf32> to vector<4x1xf32>
    %230 = vector.broadcast %229 : vector<4x1xf32> to vector<4x256xf32>
    %231 = arith.mulf %228, %230 : vector<4x256xf32>
    %232 = arith.addf %110, %231 : vector<4x256xf32>
    %233 = vector.extract_strided_slice %5 {offsets = [44, 0], sizes = [4, 1], strides = [1, 1]} : vector<72x1xf32> to vector<4x1xf32>
    %234 = vector.extract_strided_slice %5 {offsets = [48, 0], sizes = [4, 1], strides = [1, 1]} : vector<72x1xf32> to vector<4x1xf32>
    %cst_46 = arith.constant dense<0.000000e+00> : vector<256xf32>
    %235 = vector.multi_reduction <add>, %232, %cst_46 [0] : vector<4x256xf32> to vector<256xf32>
    %236 = vector.shape_cast %235 : vector<256xf32> to vector<1x256xf32>
    %cst_47 = arith.constant 4.000000e+00 : f32
    %237 = vector.broadcast %cst_47 : f32 to vector<1x256xf32>
    %238 = arith.divf %236, %237 : vector<1x256xf32>
    %239 = vector.broadcast %238 : vector<1x256xf32> to vector<4x256xf32>
    %240 = arith.subf %232, %239 : vector<4x256xf32>
    %241 = arith.mulf %240, %240 : vector<4x256xf32>
    %cst_48 = arith.constant dense<0.000000e+00> : vector<256xf32>
    %242 = vector.multi_reduction <add>, %241, %cst_48 [0] : vector<4x256xf32> to vector<256xf32>
    %243 = vector.shape_cast %242 : vector<256xf32> to vector<1x256xf32>
    %cst_49 = arith.constant 4.000000e+00 : f32
    %244 = vector.broadcast %cst_49 : f32 to vector<1x256xf32>
    %245 = arith.divf %243, %244 : vector<1x256xf32>
    %246 = vector.broadcast %238 : vector<1x256xf32> to vector<4x256xf32>
    %247 = arith.subf %232, %246 : vector<4x256xf32>
    %cst_50 = arith.constant 9.99999997E-7 : f32
    %248 = vector.broadcast %cst_50 : f32 to vector<1x256xf32>
    %249 = arith.addf %245, %248 : vector<1x256xf32>
    %250 = math.rsqrt %249 : vector<1x256xf32>
    %251 = vector.broadcast %250 : vector<1x256xf32> to vector<4x256xf32>
    %252 = arith.mulf %247, %251 : vector<4x256xf32>
    %253 = vector.broadcast %233 : vector<4x1xf32> to vector<4x256xf32>
    %254 = arith.mulf %252, %253 : vector<4x256xf32>
    %255 = vector.broadcast %234 : vector<4x1xf32> to vector<4x256xf32>
    %256 = arith.addf %254, %255 : vector<4x256xf32>
    %257 = arith.truncf %256 : vector<4x256xf32> to vector<4x256xbf16>
    %cst_51 = arith.constant dense<0.000000e+00> : vector<8x256xf32>
    %258 = tpu.matmul %10, %257, %cst_51 {dimension_numbers = #tpu.dot_dimension_numbers<[1], [0], [0], [1], [0, 0, 1, 1], [], []>} : vector<8x4xbf16>, vector<4x256xbf16>, vector<8x256xf32> -> vector<8x256xf32>
    %259 = vector.extract_strided_slice %5 {offsets = [52, 0], sizes = [8, 1], strides = [1, 1]} : vector<72x1xf32> to vector<8x1xf32>
    %260 = vector.broadcast %259 : vector<8x1xf32> to vector<8x256xf32>
    %261 = arith.addf %258, %260 : vector<8x256xf32>
    %262 = vector.extract_strided_slice %261 {offsets = [0, 0], sizes = [4, 256], strides = [1, 1]} : vector<8x256xf32> to vector<4x256xf32>
    %263 = vector.extract_strided_slice %261 {offsets = [4, 0], sizes = [4, 256], strides = [1, 1]} : vector<8x256xf32> to vector<4x256xf32>
    %264 = arith.mulf %262, %263 : vector<4x256xf32>
    %265 = arith.truncf %264 : vector<4x256xf32> to vector<4x256xbf16>
    %cst_52 = arith.constant dense<0.000000e+00> : vector<4x256xf32>
    %266 = tpu.matmul %11, %265, %cst_52 {dimension_numbers = #tpu.dot_dimension_numbers<[1], [0], [0], [1], [0, 0, 1, 1], [], []>} : vector<4x4xbf16>, vector<4x256xbf16>, vector<4x256xf32> -> vector<4x256xf32>
    %267 = vector.extract_strided_slice %5 {offsets = [60, 0], sizes = [4, 1], strides = [1, 1]} : vector<72x1xf32> to vector<4x1xf32>
    %268 = vector.broadcast %267 : vector<4x1xf32> to vector<4x256xf32>
    %269 = arith.addf %266, %268 : vector<4x256xf32>
    %270 = vector.extract_strided_slice %5 {offsets = [68, 0], sizes = [4, 1], strides = [1, 1]} : vector<72x1xf32> to vector<4x1xf32>
    %271 = vector.broadcast %270 : vector<4x1xf32> to vector<4x256xf32>
    %272 = arith.mulf %269, %271 : vector<4x256xf32>
    %273 = arith.addf %232, %272 : vector<4x256xf32>
    %274 = arith.addf %2, %273 : vector<4x256xf32>
    %c0_53 = arith.constant 0 : index
    %c0_54 = arith.constant 0 : index
    %275 = vector.load %arg13[%c0_53, %c0_54] : memref<72x1xf32, #tpu.memory_space<vmem>>, vector<72x1xf32>
    %c0_55 = arith.constant 0 : index
    %c0_56 = arith.constant 0 : index
    %276 = vector.load %arg12[%c0_55, %c0_56] : memref<28x4xbf16, #tpu.memory_space<vmem>>, vector<28x4xbf16>
    %277 = vector.extract_strided_slice %276 {offsets = [0, 0], sizes = [8, 4], strides = [1, 1]} : vector<28x4xbf16> to vector<8x4xbf16>
    %278 = vector.extract_strided_slice %276 {offsets = [8, 0], sizes = [4, 4], strides = [1, 1]} : vector<28x4xbf16> to vector<4x4xbf16>
    %279 = vector.extract_strided_slice %276 {offsets = [12, 0], sizes = [4, 4], strides = [1, 1]} : vector<28x4xbf16> to vector<4x4xbf16>
    %280 = vector.extract_strided_slice %276 {offsets = [16, 0], sizes = [8, 4], strides = [1, 1]} : vector<28x4xbf16> to vector<8x4xbf16>
    %281 = vector.extract_strided_slice %276 {offsets = [24, 0], sizes = [4, 4], strides = [1, 1]} : vector<28x4xbf16> to vector<4x4xbf16>
    %282 = vector.extract_strided_slice %275 {offsets = [0, 0], sizes = [8, 1], strides = [1, 1]} : vector<72x1xf32> to vector<8x1xf32>
    %c17_i32_57 = arith.constant 17 : i32
    %283 = tpu.dynamic_rotate %274 by %c17_i32_57 dim 1 : vector<4x256xf32>, i32 -> vector<4x256xf32>
    %284 = vector.extract_strided_slice %0 {offsets = [0, 0], sizes = [1, 256], strides = [1, 1]} : vector<9x256xf32> to vector<1x256xf32>
    %285 = vector.broadcast %284 : vector<1x256xf32> to vector<4x256xf32>
    %286 = arith.mulf %283, %285 : vector<4x256xf32>
    %287 = arith.truncf %286 : vector<4x256xf32> to vector<4x256xbf16>
    %c16_i32_58 = arith.constant 16 : i32
    %288 = tpu.dynamic_rotate %274 by %c16_i32_58 dim 1 : vector<4x256xf32>, i32 -> vector<4x256xf32>
    %289 = vector.extract_strided_slice %0 {offsets = [1, 0], sizes = [1, 256], strides = [1, 1]} : vector<9x256xf32> to vector<1x256xf32>
    %290 = vector.broadcast %289 : vector<1x256xf32> to vector<4x256xf32>
    %291 = arith.mulf %288, %290 : vector<4x256xf32>
    %292 = arith.truncf %291 : vector<4x256xf32> to vector<4x256xbf16>
    %c15_i32_59 = arith.constant 15 : i32
    %293 = tpu.dynamic_rotate %274 by %c15_i32_59 dim 1 : vector<4x256xf32>, i32 -> vector<4x256xf32>
    %294 = vector.extract_strided_slice %0 {offsets = [2, 0], sizes = [1, 256], strides = [1, 1]} : vector<9x256xf32> to vector<1x256xf32>
    %295 = vector.broadcast %294 : vector<1x256xf32> to vector<4x256xf32>
    %296 = arith.mulf %293, %295 : vector<4x256xf32>
    %297 = arith.truncf %296 : vector<4x256xf32> to vector<4x256xbf16>
    %c1_i32_60 = arith.constant 1 : i32
    %298 = tpu.dynamic_rotate %274 by %c1_i32_60 dim 1 : vector<4x256xf32>, i32 -> vector<4x256xf32>
    %299 = vector.extract_strided_slice %0 {offsets = [3, 0], sizes = [1, 256], strides = [1, 1]} : vector<9x256xf32> to vector<1x256xf32>
    %300 = vector.broadcast %299 : vector<1x256xf32> to vector<4x256xf32>
    %301 = arith.mulf %298, %300 : vector<4x256xf32>
    %302 = arith.truncf %301 : vector<4x256xf32> to vector<4x256xbf16>
    %303 = arith.truncf %274 : vector<4x256xf32> to vector<4x256xbf16>
    %c255_i32_61 = arith.constant 255 : i32
    %304 = tpu.dynamic_rotate %274 by %c255_i32_61 dim 1 : vector<4x256xf32>, i32 -> vector<4x256xf32>
    %305 = vector.extract_strided_slice %0 {offsets = [5, 0], sizes = [1, 256], strides = [1, 1]} : vector<9x256xf32> to vector<1x256xf32>
    %306 = vector.broadcast %305 : vector<1x256xf32> to vector<4x256xf32>
    %307 = arith.mulf %304, %306 : vector<4x256xf32>
    %308 = arith.truncf %307 : vector<4x256xf32> to vector<4x256xbf16>
    %c241_i32_62 = arith.constant 241 : i32
    %309 = tpu.dynamic_rotate %274 by %c241_i32_62 dim 1 : vector<4x256xf32>, i32 -> vector<4x256xf32>
    %310 = vector.extract_strided_slice %0 {offsets = [6, 0], sizes = [1, 256], strides = [1, 1]} : vector<9x256xf32> to vector<1x256xf32>
    %311 = vector.broadcast %310 : vector<1x256xf32> to vector<4x256xf32>
    %312 = arith.mulf %309, %311 : vector<4x256xf32>
    %313 = arith.truncf %312 : vector<4x256xf32> to vector<4x256xbf16>
    %c240_i32_63 = arith.constant 240 : i32
    %314 = tpu.dynamic_rotate %274 by %c240_i32_63 dim 1 : vector<4x256xf32>, i32 -> vector<4x256xf32>
    %315 = vector.extract_strided_slice %0 {offsets = [7, 0], sizes = [1, 256], strides = [1, 1]} : vector<9x256xf32> to vector<1x256xf32>
    %316 = vector.broadcast %315 : vector<1x256xf32> to vector<4x256xf32>
    %317 = arith.mulf %314, %316 : vector<4x256xf32>
    %318 = arith.truncf %317 : vector<4x256xf32> to vector<4x256xbf16>
    %c239_i32_64 = arith.constant 239 : i32
    %319 = tpu.dynamic_rotate %274 by %c239_i32_64 dim 1 : vector<4x256xf32>, i32 -> vector<4x256xf32>
    %320 = vector.extract_strided_slice %0 {offsets = [8, 0], sizes = [1, 256], strides = [1, 1]} : vector<9x256xf32> to vector<1x256xf32>
    %321 = vector.broadcast %320 : vector<1x256xf32> to vector<4x256xf32>
    %322 = arith.mulf %319, %321 : vector<4x256xf32>
    %323 = arith.truncf %322 : vector<4x256xf32> to vector<4x256xbf16>
    %324 = tpu.concatenate %287, %292, %297, %302, %303, %308, %313, %318, %323 in 0 : vector<4x256xbf16>, vector<4x256xbf16>, vector<4x256xbf16>, vector<4x256xbf16>, vector<4x256xbf16>, vector<4x256xbf16>, vector<4x256xbf16>, vector<4x256xbf16>, vector<4x256xbf16> -> vector<36x256xbf16>
    %c0_65 = arith.constant 0 : index
    %c0_66 = arith.constant 0 : index
    %325 = vector.load %arg9[%c0_65, %c0_66] : memref<8x36xbf16, #tpu.memory_space<vmem>>, vector<8x36xbf16>
    %cst_67 = arith.constant dense<0.000000e+00> : vector<8x256xf32>
    %326 = tpu.matmul %325, %324, %cst_67 {dimension_numbers = #tpu.dot_dimension_numbers<[1], [0], [0], [1], [0, 0, 1, 1], [], []>} : vector<8x36xbf16>, vector<36x256xbf16>, vector<8x256xf32> -> vector<8x256xf32>
    %327 = vector.broadcast %282 : vector<8x1xf32> to vector<8x256xf32>
    %328 = arith.addf %326, %327 : vector<8x256xf32>
    %cst_68 = arith.constant 0.000000e+00 : f32
    %329 = vector.broadcast %cst_68 : f32 to vector<8x256xf32>
    %330 = arith.cmpf oge, %328, %329 : vector<8x256xf32>
    %cst_69 = arith.constant 2.000000e-01 : f32
    %331 = vector.broadcast %cst_69 : f32 to vector<8x256xf32>
    %332 = arith.mulf %331, %328 : vector<8x256xf32>
    %333 = arith.select %330, %328, %332 : vector<8x256xi1>, vector<8x256xf32>
    %334 = vector.extract_strided_slice %275 {offsets = [8, 0], sizes = [4, 1], strides = [1, 1]} : vector<72x1xf32> to vector<4x1xf32>
    %c17_i32_70 = arith.constant 17 : i32
    %335 = tpu.dynamic_rotate %333 by %c17_i32_70 dim 1 : vector<8x256xf32>, i32 -> vector<8x256xf32>
    %336 = vector.extract_strided_slice %0 {offsets = [0, 0], sizes = [1, 256], strides = [1, 1]} : vector<9x256xf32> to vector<1x256xf32>
    %337 = vector.broadcast %336 : vector<1x256xf32> to vector<8x256xf32>
    %338 = arith.mulf %335, %337 : vector<8x256xf32>
    %339 = arith.truncf %338 : vector<8x256xf32> to vector<8x256xbf16>
    %c16_i32_71 = arith.constant 16 : i32
    %340 = tpu.dynamic_rotate %333 by %c16_i32_71 dim 1 : vector<8x256xf32>, i32 -> vector<8x256xf32>
    %341 = vector.extract_strided_slice %0 {offsets = [1, 0], sizes = [1, 256], strides = [1, 1]} : vector<9x256xf32> to vector<1x256xf32>
    %342 = vector.broadcast %341 : vector<1x256xf32> to vector<8x256xf32>
    %343 = arith.mulf %340, %342 : vector<8x256xf32>
    %344 = arith.truncf %343 : vector<8x256xf32> to vector<8x256xbf16>
    %c15_i32_72 = arith.constant 15 : i32
    %345 = tpu.dynamic_rotate %333 by %c15_i32_72 dim 1 : vector<8x256xf32>, i32 -> vector<8x256xf32>
    %346 = vector.extract_strided_slice %0 {offsets = [2, 0], sizes = [1, 256], strides = [1, 1]} : vector<9x256xf32> to vector<1x256xf32>
    %347 = vector.broadcast %346 : vector<1x256xf32> to vector<8x256xf32>
    %348 = arith.mulf %345, %347 : vector<8x256xf32>
    %349 = arith.truncf %348 : vector<8x256xf32> to vector<8x256xbf16>
    %c1_i32_73 = arith.constant 1 : i32
    %350 = tpu.dynamic_rotate %333 by %c1_i32_73 dim 1 : vector<8x256xf32>, i32 -> vector<8x256xf32>
    %351 = vector.extract_strided_slice %0 {offsets = [3, 0], sizes = [1, 256], strides = [1, 1]} : vector<9x256xf32> to vector<1x256xf32>
    %352 = vector.broadcast %351 : vector<1x256xf32> to vector<8x256xf32>
    %353 = arith.mulf %350, %352 : vector<8x256xf32>
    %354 = arith.truncf %353 : vector<8x256xf32> to vector<8x256xbf16>
    %355 = arith.truncf %333 : vector<8x256xf32> to vector<8x256xbf16>
    %c255_i32_74 = arith.constant 255 : i32
    %356 = tpu.dynamic_rotate %333 by %c255_i32_74 dim 1 : vector<8x256xf32>, i32 -> vector<8x256xf32>
    %357 = vector.extract_strided_slice %0 {offsets = [5, 0], sizes = [1, 256], strides = [1, 1]} : vector<9x256xf32> to vector<1x256xf32>
    %358 = vector.broadcast %357 : vector<1x256xf32> to vector<8x256xf32>
    %359 = arith.mulf %356, %358 : vector<8x256xf32>
    %360 = arith.truncf %359 : vector<8x256xf32> to vector<8x256xbf16>
    %c241_i32_75 = arith.constant 241 : i32
    %361 = tpu.dynamic_rotate %333 by %c241_i32_75 dim 1 : vector<8x256xf32>, i32 -> vector<8x256xf32>
    %362 = vector.extract_strided_slice %0 {offsets = [6, 0], sizes = [1, 256], strides = [1, 1]} : vector<9x256xf32> to vector<1x256xf32>
    %363 = vector.broadcast %362 : vector<1x256xf32> to vector<8x256xf32>
    %364 = arith.mulf %361, %363 : vector<8x256xf32>
    %365 = arith.truncf %364 : vector<8x256xf32> to vector<8x256xbf16>
    %c240_i32_76 = arith.constant 240 : i32
    %366 = tpu.dynamic_rotate %333 by %c240_i32_76 dim 1 : vector<8x256xf32>, i32 -> vector<8x256xf32>
    %367 = vector.extract_strided_slice %0 {offsets = [7, 0], sizes = [1, 256], strides = [1, 1]} : vector<9x256xf32> to vector<1x256xf32>
    %368 = vector.broadcast %367 : vector<1x256xf32> to vector<8x256xf32>
    %369 = arith.mulf %366, %368 : vector<8x256xf32>
    %370 = arith.truncf %369 : vector<8x256xf32> to vector<8x256xbf16>
    %c239_i32_77 = arith.constant 239 : i32
    %371 = tpu.dynamic_rotate %333 by %c239_i32_77 dim 1 : vector<8x256xf32>, i32 -> vector<8x256xf32>
    %372 = vector.extract_strided_slice %0 {offsets = [8, 0], sizes = [1, 256], strides = [1, 1]} : vector<9x256xf32> to vector<1x256xf32>
    %373 = vector.broadcast %372 : vector<1x256xf32> to vector<8x256xf32>
    %374 = arith.mulf %371, %373 : vector<8x256xf32>
    %375 = arith.truncf %374 : vector<8x256xf32> to vector<8x256xbf16>
    %376 = tpu.concatenate %339, %344, %349, %354, %355, %360, %365, %370, %375 in 0 : vector<8x256xbf16>, vector<8x256xbf16>, vector<8x256xbf16>, vector<8x256xbf16>, vector<8x256xbf16>, vector<8x256xbf16>, vector<8x256xbf16>, vector<8x256xbf16>, vector<8x256xbf16> -> vector<72x256xbf16>
    %c0_78 = arith.constant 0 : index
    %c0_79 = arith.constant 0 : index
    %377 = vector.load %arg10[%c0_78, %c0_79] : memref<4x72xbf16, #tpu.memory_space<vmem>>, vector<4x72xbf16>
    %cst_80 = arith.constant dense<0.000000e+00> : vector<4x256xf32>
    %378 = tpu.matmul %377, %376, %cst_80 {dimension_numbers = #tpu.dot_dimension_numbers<[1], [0], [0], [1], [0, 0, 1, 1], [], []>} : vector<4x72xbf16>, vector<72x256xbf16>, vector<4x256xf32> -> vector<4x256xf32>
    %379 = vector.broadcast %334 : vector<4x1xf32> to vector<4x256xf32>
    %380 = arith.addf %378, %379 : vector<4x256xf32>
    %381 = vector.extract_strided_slice %275 {offsets = [12, 0], sizes = [4, 1], strides = [1, 1]} : vector<72x1xf32> to vector<4x1xf32>
    %382 = vector.extract_strided_slice %275 {offsets = [16, 0], sizes = [4, 1], strides = [1, 1]} : vector<72x1xf32> to vector<4x1xf32>
    %cst_81 = arith.constant dense<0.000000e+00> : vector<256xf32>
    %383 = vector.multi_reduction <add>, %380, %cst_81 [0] : vector<4x256xf32> to vector<256xf32>
    %384 = vector.shape_cast %383 : vector<256xf32> to vector<1x256xf32>
    %cst_82 = arith.constant 4.000000e+00 : f32
    %385 = vector.broadcast %cst_82 : f32 to vector<1x256xf32>
    %386 = arith.divf %384, %385 : vector<1x256xf32>
    %387 = vector.broadcast %386 : vector<1x256xf32> to vector<4x256xf32>
    %388 = arith.subf %380, %387 : vector<4x256xf32>
    %389 = arith.mulf %388, %388 : vector<4x256xf32>
    %cst_83 = arith.constant dense<0.000000e+00> : vector<256xf32>
    %390 = vector.multi_reduction <add>, %389, %cst_83 [0] : vector<4x256xf32> to vector<256xf32>
    %391 = vector.shape_cast %390 : vector<256xf32> to vector<1x256xf32>
    %cst_84 = arith.constant 4.000000e+00 : f32
    %392 = vector.broadcast %cst_84 : f32 to vector<1x256xf32>
    %393 = arith.divf %391, %392 : vector<1x256xf32>
    %394 = vector.broadcast %386 : vector<1x256xf32> to vector<4x256xf32>
    %395 = arith.subf %380, %394 : vector<4x256xf32>
    %cst_85 = arith.constant 9.99999997E-7 : f32
    %396 = vector.broadcast %cst_85 : f32 to vector<1x256xf32>
    %397 = arith.addf %393, %396 : vector<1x256xf32>
    %398 = math.rsqrt %397 : vector<1x256xf32>
    %399 = vector.broadcast %398 : vector<1x256xf32> to vector<4x256xf32>
    %400 = arith.mulf %395, %399 : vector<4x256xf32>
    %401 = vector.broadcast %381 : vector<4x1xf32> to vector<4x256xf32>
    %402 = arith.mulf %400, %401 : vector<4x256xf32>
    %403 = vector.broadcast %382 : vector<4x1xf32> to vector<4x256xf32>
    %404 = arith.addf %402, %403 : vector<4x256xf32>
    %405 = arith.truncf %404 : vector<4x256xf32> to vector<4x256xbf16>
    %cst_86 = arith.constant dense<0.000000e+00> : vector<8x256xf32>
    %406 = tpu.matmul %277, %405, %cst_86 {dimension_numbers = #tpu.dot_dimension_numbers<[1], [0], [0], [1], [0, 0, 1, 1], [], []>} : vector<8x4xbf16>, vector<4x256xbf16>, vector<8x256xf32> -> vector<8x256xf32>
    %407 = vector.extract_strided_slice %275 {offsets = [20, 0], sizes = [8, 1], strides = [1, 1]} : vector<72x1xf32> to vector<8x1xf32>
    %408 = vector.broadcast %407 : vector<8x1xf32> to vector<8x256xf32>
    %409 = arith.addf %406, %408 : vector<8x256xf32>
    %410 = vector.extract_strided_slice %275 {offsets = [28, 0], sizes = [8, 1], strides = [1, 1]} : vector<72x1xf32> to vector<8x1xf32>
    %c0_87 = arith.constant 0 : index
    %c0_88 = arith.constant 0 : index
    %411 = vector.load %arg11[%c0_87, %c0_88] : memref<8x9xf32, #tpu.memory_space<vmem>>, vector<8x9xf32>
    %412 = vector.extract_strided_slice %411 {offsets = [0, 4], sizes = [8, 1], strides = [1, 1]} : vector<8x9xf32> to vector<8x1xf32>
    %413 = vector.broadcast %412 : vector<8x1xf32> to vector<8x256xf32>
    %414 = arith.mulf %413, %409 : vector<8x256xf32>
    %415 = vector.extract_strided_slice %411 {offsets = [0, 0], sizes = [8, 1], strides = [1, 1]} : vector<8x9xf32> to vector<8x1xf32>
    %c17_i32_89 = arith.constant 17 : i32
    %416 = tpu.dynamic_rotate %409 by %c17_i32_89 dim 1 : vector<8x256xf32>, i32 -> vector<8x256xf32>
    %417 = vector.extract_strided_slice %0 {offsets = [0, 0], sizes = [1, 256], strides = [1, 1]} : vector<9x256xf32> to vector<1x256xf32>
    %418 = vector.broadcast %417 : vector<1x256xf32> to vector<8x256xf32>
    %419 = arith.mulf %416, %418 : vector<8x256xf32>
    %420 = vector.broadcast %415 : vector<8x1xf32> to vector<8x256xf32>
    %421 = arith.mulf %420, %419 : vector<8x256xf32>
    %422 = arith.addf %414, %421 : vector<8x256xf32>
    %423 = vector.extract_strided_slice %411 {offsets = [0, 1], sizes = [8, 1], strides = [1, 1]} : vector<8x9xf32> to vector<8x1xf32>
    %c16_i32_90 = arith.constant 16 : i32
    %424 = tpu.dynamic_rotate %409 by %c16_i32_90 dim 1 : vector<8x256xf32>, i32 -> vector<8x256xf32>
    %425 = vector.extract_strided_slice %0 {offsets = [1, 0], sizes = [1, 256], strides = [1, 1]} : vector<9x256xf32> to vector<1x256xf32>
    %426 = vector.broadcast %425 : vector<1x256xf32> to vector<8x256xf32>
    %427 = arith.mulf %424, %426 : vector<8x256xf32>
    %428 = vector.broadcast %423 : vector<8x1xf32> to vector<8x256xf32>
    %429 = arith.mulf %428, %427 : vector<8x256xf32>
    %430 = arith.addf %422, %429 : vector<8x256xf32>
    %431 = vector.extract_strided_slice %411 {offsets = [0, 2], sizes = [8, 1], strides = [1, 1]} : vector<8x9xf32> to vector<8x1xf32>
    %c15_i32_91 = arith.constant 15 : i32
    %432 = tpu.dynamic_rotate %409 by %c15_i32_91 dim 1 : vector<8x256xf32>, i32 -> vector<8x256xf32>
    %433 = vector.extract_strided_slice %0 {offsets = [2, 0], sizes = [1, 256], strides = [1, 1]} : vector<9x256xf32> to vector<1x256xf32>
    %434 = vector.broadcast %433 : vector<1x256xf32> to vector<8x256xf32>
    %435 = arith.mulf %432, %434 : vector<8x256xf32>
    %436 = vector.broadcast %431 : vector<8x1xf32> to vector<8x256xf32>
    %437 = arith.mulf %436, %435 : vector<8x256xf32>
    %438 = arith.addf %430, %437 : vector<8x256xf32>
    %439 = vector.extract_strided_slice %411 {offsets = [0, 3], sizes = [8, 1], strides = [1, 1]} : vector<8x9xf32> to vector<8x1xf32>
    %c1_i32_92 = arith.constant 1 : i32
    %440 = tpu.dynamic_rotate %409 by %c1_i32_92 dim 1 : vector<8x256xf32>, i32 -> vector<8x256xf32>
    %441 = vector.extract_strided_slice %0 {offsets = [3, 0], sizes = [1, 256], strides = [1, 1]} : vector<9x256xf32> to vector<1x256xf32>
    %442 = vector.broadcast %441 : vector<1x256xf32> to vector<8x256xf32>
    %443 = arith.mulf %440, %442 : vector<8x256xf32>
    %444 = vector.broadcast %439 : vector<8x1xf32> to vector<8x256xf32>
    %445 = arith.mulf %444, %443 : vector<8x256xf32>
    %446 = arith.addf %438, %445 : vector<8x256xf32>
    %447 = vector.extract_strided_slice %411 {offsets = [0, 5], sizes = [8, 1], strides = [1, 1]} : vector<8x9xf32> to vector<8x1xf32>
    %c255_i32_93 = arith.constant 255 : i32
    %448 = tpu.dynamic_rotate %409 by %c255_i32_93 dim 1 : vector<8x256xf32>, i32 -> vector<8x256xf32>
    %449 = vector.extract_strided_slice %0 {offsets = [5, 0], sizes = [1, 256], strides = [1, 1]} : vector<9x256xf32> to vector<1x256xf32>
    %450 = vector.broadcast %449 : vector<1x256xf32> to vector<8x256xf32>
    %451 = arith.mulf %448, %450 : vector<8x256xf32>
    %452 = vector.broadcast %447 : vector<8x1xf32> to vector<8x256xf32>
    %453 = arith.mulf %452, %451 : vector<8x256xf32>
    %454 = arith.addf %446, %453 : vector<8x256xf32>
    %455 = vector.extract_strided_slice %411 {offsets = [0, 6], sizes = [8, 1], strides = [1, 1]} : vector<8x9xf32> to vector<8x1xf32>
    %c241_i32_94 = arith.constant 241 : i32
    %456 = tpu.dynamic_rotate %409 by %c241_i32_94 dim 1 : vector<8x256xf32>, i32 -> vector<8x256xf32>
    %457 = vector.extract_strided_slice %0 {offsets = [6, 0], sizes = [1, 256], strides = [1, 1]} : vector<9x256xf32> to vector<1x256xf32>
    %458 = vector.broadcast %457 : vector<1x256xf32> to vector<8x256xf32>
    %459 = arith.mulf %456, %458 : vector<8x256xf32>
    %460 = vector.broadcast %455 : vector<8x1xf32> to vector<8x256xf32>
    %461 = arith.mulf %460, %459 : vector<8x256xf32>
    %462 = arith.addf %454, %461 : vector<8x256xf32>
    %463 = vector.extract_strided_slice %411 {offsets = [0, 7], sizes = [8, 1], strides = [1, 1]} : vector<8x9xf32> to vector<8x1xf32>
    %c240_i32_95 = arith.constant 240 : i32
    %464 = tpu.dynamic_rotate %409 by %c240_i32_95 dim 1 : vector<8x256xf32>, i32 -> vector<8x256xf32>
    %465 = vector.extract_strided_slice %0 {offsets = [7, 0], sizes = [1, 256], strides = [1, 1]} : vector<9x256xf32> to vector<1x256xf32>
    %466 = vector.broadcast %465 : vector<1x256xf32> to vector<8x256xf32>
    %467 = arith.mulf %464, %466 : vector<8x256xf32>
    %468 = vector.broadcast %463 : vector<8x1xf32> to vector<8x256xf32>
    %469 = arith.mulf %468, %467 : vector<8x256xf32>
    %470 = arith.addf %462, %469 : vector<8x256xf32>
    %471 = vector.extract_strided_slice %411 {offsets = [0, 8], sizes = [8, 1], strides = [1, 1]} : vector<8x9xf32> to vector<8x1xf32>
    %c239_i32_96 = arith.constant 239 : i32
    %472 = tpu.dynamic_rotate %409 by %c239_i32_96 dim 1 : vector<8x256xf32>, i32 -> vector<8x256xf32>
    %473 = vector.extract_strided_slice %0 {offsets = [8, 0], sizes = [1, 256], strides = [1, 1]} : vector<9x256xf32> to vector<1x256xf32>
    %474 = vector.broadcast %473 : vector<1x256xf32> to vector<8x256xf32>
    %475 = arith.mulf %472, %474 : vector<8x256xf32>
    %476 = vector.broadcast %471 : vector<8x1xf32> to vector<8x256xf32>
    %477 = arith.mulf %476, %475 : vector<8x256xf32>
    %478 = arith.addf %470, %477 : vector<8x256xf32>
    %479 = vector.broadcast %410 : vector<8x1xf32> to vector<8x256xf32>
    %480 = arith.addf %478, %479 : vector<8x256xf32>
    %481 = vector.extract_strided_slice %480 {offsets = [0, 0], sizes = [4, 256], strides = [1, 1]} : vector<8x256xf32> to vector<4x256xf32>
    %482 = vector.extract_strided_slice %480 {offsets = [4, 0], sizes = [4, 256], strides = [1, 1]} : vector<8x256xf32> to vector<4x256xf32>
    %483 = arith.mulf %481, %482 : vector<4x256xf32>
    %cst_97 = arith.constant dense<0.000000e+00> : vector<4xf32>
    %484 = vector.multi_reduction <add>, %483, %cst_97 [1] : vector<4x256xf32> to vector<4xf32>
    %485 = vector.shape_cast %484 : vector<4xf32> to vector<4x1xf32>
    %cst_98 = arith.constant 2.560000e+02 : f32
    %486 = vector.broadcast %cst_98 : f32 to vector<4x1xf32>
    %487 = arith.divf %485, %486 : vector<4x1xf32>
    %488 = arith.extf %278 : vector<4x4xbf16> to vector<4x4xf32>
    %cst_99 = arith.constant dense<0.000000e+00> : vector<4x1xf32>
    %489 = tpu.matmul %488, %487, %cst_99 {dimension_numbers = #tpu.dot_dimension_numbers<[1], [0], [0], [1], [0, 0, 1, 1], [], []>} : vector<4x4xf32>, vector<4x1xf32>, vector<4x1xf32> -> vector<4x1xf32>
    %490 = vector.extract_strided_slice %275 {offsets = [36, 0], sizes = [4, 1], strides = [1, 1]} : vector<72x1xf32> to vector<4x1xf32>
    %491 = arith.addf %489, %490 : vector<4x1xf32>
    %492 = vector.broadcast %491 : vector<4x1xf32> to vector<4x256xf32>
    %493 = arith.mulf %483, %492 : vector<4x256xf32>
    %494 = arith.truncf %493 : vector<4x256xf32> to vector<4x256xbf16>
    %cst_100 = arith.constant dense<0.000000e+00> : vector<4x256xf32>
    %495 = tpu.matmul %279, %494, %cst_100 {dimension_numbers = #tpu.dot_dimension_numbers<[1], [0], [0], [1], [0, 0, 1, 1], [], []>} : vector<4x4xbf16>, vector<4x256xbf16>, vector<4x256xf32> -> vector<4x256xf32>
    %496 = vector.extract_strided_slice %275 {offsets = [40, 0], sizes = [4, 1], strides = [1, 1]} : vector<72x1xf32> to vector<4x1xf32>
    %497 = vector.broadcast %496 : vector<4x1xf32> to vector<4x256xf32>
    %498 = arith.addf %495, %497 : vector<4x256xf32>
    %499 = vector.extract_strided_slice %275 {offsets = [64, 0], sizes = [4, 1], strides = [1, 1]} : vector<72x1xf32> to vector<4x1xf32>
    %500 = vector.broadcast %499 : vector<4x1xf32> to vector<4x256xf32>
    %501 = arith.mulf %498, %500 : vector<4x256xf32>
    %502 = arith.addf %380, %501 : vector<4x256xf32>
    %503 = vector.extract_strided_slice %275 {offsets = [44, 0], sizes = [4, 1], strides = [1, 1]} : vector<72x1xf32> to vector<4x1xf32>
    %504 = vector.extract_strided_slice %275 {offsets = [48, 0], sizes = [4, 1], strides = [1, 1]} : vector<72x1xf32> to vector<4x1xf32>
    %cst_101 = arith.constant dense<0.000000e+00> : vector<256xf32>
    %505 = vector.multi_reduction <add>, %502, %cst_101 [0] : vector<4x256xf32> to vector<256xf32>
    %506 = vector.shape_cast %505 : vector<256xf32> to vector<1x256xf32>
    %cst_102 = arith.constant 4.000000e+00 : f32
    %507 = vector.broadcast %cst_102 : f32 to vector<1x256xf32>
    %508 = arith.divf %506, %507 : vector<1x256xf32>
    %509 = vector.broadcast %508 : vector<1x256xf32> to vector<4x256xf32>
    %510 = arith.subf %502, %509 : vector<4x256xf32>
    %511 = arith.mulf %510, %510 : vector<4x256xf32>
    %cst_103 = arith.constant dense<0.000000e+00> : vector<256xf32>
    %512 = vector.multi_reduction <add>, %511, %cst_103 [0] : vector<4x256xf32> to vector<256xf32>
    %513 = vector.shape_cast %512 : vector<256xf32> to vector<1x256xf32>
    %cst_104 = arith.constant 4.000000e+00 : f32
    %514 = vector.broadcast %cst_104 : f32 to vector<1x256xf32>
    %515 = arith.divf %513, %514 : vector<1x256xf32>
    %516 = vector.broadcast %508 : vector<1x256xf32> to vector<4x256xf32>
    %517 = arith.subf %502, %516 : vector<4x256xf32>
    %cst_105 = arith.constant 9.99999997E-7 : f32
    %518 = vector.broadcast %cst_105 : f32 to vector<1x256xf32>
    %519 = arith.addf %515, %518 : vector<1x256xf32>
    %520 = math.rsqrt %519 : vector<1x256xf32>
    %521 = vector.broadcast %520 : vector<1x256xf32> to vector<4x256xf32>
    %522 = arith.mulf %517, %521 : vector<4x256xf32>
    %523 = vector.broadcast %503 : vector<4x1xf32> to vector<4x256xf32>
    %524 = arith.mulf %522, %523 : vector<4x256xf32>
    %525 = vector.broadcast %504 : vector<4x1xf32> to vector<4x256xf32>
    %526 = arith.addf %524, %525 : vector<4x256xf32>
    %527 = arith.truncf %526 : vector<4x256xf32> to vector<4x256xbf16>
    %cst_106 = arith.constant dense<0.000000e+00> : vector<8x256xf32>
    %528 = tpu.matmul %280, %527, %cst_106 {dimension_numbers = #tpu.dot_dimension_numbers<[1], [0], [0], [1], [0, 0, 1, 1], [], []>} : vector<8x4xbf16>, vector<4x256xbf16>, vector<8x256xf32> -> vector<8x256xf32>
    %529 = vector.extract_strided_slice %275 {offsets = [52, 0], sizes = [8, 1], strides = [1, 1]} : vector<72x1xf32> to vector<8x1xf32>
    %530 = vector.broadcast %529 : vector<8x1xf32> to vector<8x256xf32>
    %531 = arith.addf %528, %530 : vector<8x256xf32>
    %532 = vector.extract_strided_slice %531 {offsets = [0, 0], sizes = [4, 256], strides = [1, 1]} : vector<8x256xf32> to vector<4x256xf32>
    %533 = vector.extract_strided_slice %531 {offsets = [4, 0], sizes = [4, 256], strides = [1, 1]} : vector<8x256xf32> to vector<4x256xf32>
    %534 = arith.mulf %532, %533 : vector<4x256xf32>
    %535 = arith.truncf %534 : vector<4x256xf32> to vector<4x256xbf16>
    %cst_107 = arith.constant dense<0.000000e+00> : vector<4x256xf32>
    %536 = tpu.matmul %281, %535, %cst_107 {dimension_numbers = #tpu.dot_dimension_numbers<[1], [0], [0], [1], [0, 0, 1, 1], [], []>} : vector<4x4xbf16>, vector<4x256xbf16>, vector<4x256xf32> -> vector<4x256xf32>
    %537 = vector.extract_strided_slice %275 {offsets = [60, 0], sizes = [4, 1], strides = [1, 1]} : vector<72x1xf32> to vector<4x1xf32>
    %538 = vector.broadcast %537 : vector<4x1xf32> to vector<4x256xf32>
    %539 = arith.addf %536, %538 : vector<4x256xf32>
    %540 = vector.extract_strided_slice %275 {offsets = [68, 0], sizes = [4, 1], strides = [1, 1]} : vector<72x1xf32> to vector<4x1xf32>
    %541 = vector.broadcast %540 : vector<4x1xf32> to vector<4x256xf32>
    %542 = arith.mulf %539, %541 : vector<4x256xf32>
    %543 = arith.addf %502, %542 : vector<4x256xf32>
    %c0_108 = arith.constant 0 : index
    %c0_109 = arith.constant 0 : index
    %544 = vector.load %arg18[%c0_108, %c0_109] : memref<72x1xf32, #tpu.memory_space<vmem>>, vector<72x1xf32>
    %c0_110 = arith.constant 0 : index
    %c0_111 = arith.constant 0 : index
    %545 = vector.load %arg17[%c0_110, %c0_111] : memref<28x4xbf16, #tpu.memory_space<vmem>>, vector<28x4xbf16>
    %546 = vector.extract_strided_slice %545 {offsets = [0, 0], sizes = [8, 4], strides = [1, 1]} : vector<28x4xbf16> to vector<8x4xbf16>
    %547 = vector.extract_strided_slice %545 {offsets = [8, 0], sizes = [4, 4], strides = [1, 1]} : vector<28x4xbf16> to vector<4x4xbf16>
    %548 = vector.extract_strided_slice %545 {offsets = [12, 0], sizes = [4, 4], strides = [1, 1]} : vector<28x4xbf16> to vector<4x4xbf16>
    %549 = vector.extract_strided_slice %545 {offsets = [16, 0], sizes = [8, 4], strides = [1, 1]} : vector<28x4xbf16> to vector<8x4xbf16>
    %550 = vector.extract_strided_slice %545 {offsets = [24, 0], sizes = [4, 4], strides = [1, 1]} : vector<28x4xbf16> to vector<4x4xbf16>
    %551 = vector.extract_strided_slice %544 {offsets = [0, 0], sizes = [8, 1], strides = [1, 1]} : vector<72x1xf32> to vector<8x1xf32>
    %c17_i32_112 = arith.constant 17 : i32
    %552 = tpu.dynamic_rotate %274 by %c17_i32_112 dim 1 : vector<4x256xf32>, i32 -> vector<4x256xf32>
    %553 = vector.extract_strided_slice %0 {offsets = [0, 0], sizes = [1, 256], strides = [1, 1]} : vector<9x256xf32> to vector<1x256xf32>
    %554 = vector.broadcast %553 : vector<1x256xf32> to vector<4x256xf32>
    %555 = arith.mulf %552, %554 : vector<4x256xf32>
    %556 = arith.truncf %555 : vector<4x256xf32> to vector<4x256xbf16>
    %c16_i32_113 = arith.constant 16 : i32
    %557 = tpu.dynamic_rotate %274 by %c16_i32_113 dim 1 : vector<4x256xf32>, i32 -> vector<4x256xf32>
    %558 = vector.extract_strided_slice %0 {offsets = [1, 0], sizes = [1, 256], strides = [1, 1]} : vector<9x256xf32> to vector<1x256xf32>
    %559 = vector.broadcast %558 : vector<1x256xf32> to vector<4x256xf32>
    %560 = arith.mulf %557, %559 : vector<4x256xf32>
    %561 = arith.truncf %560 : vector<4x256xf32> to vector<4x256xbf16>
    %c15_i32_114 = arith.constant 15 : i32
    %562 = tpu.dynamic_rotate %274 by %c15_i32_114 dim 1 : vector<4x256xf32>, i32 -> vector<4x256xf32>
    %563 = vector.extract_strided_slice %0 {offsets = [2, 0], sizes = [1, 256], strides = [1, 1]} : vector<9x256xf32> to vector<1x256xf32>
    %564 = vector.broadcast %563 : vector<1x256xf32> to vector<4x256xf32>
    %565 = arith.mulf %562, %564 : vector<4x256xf32>
    %566 = arith.truncf %565 : vector<4x256xf32> to vector<4x256xbf16>
    %c1_i32_115 = arith.constant 1 : i32
    %567 = tpu.dynamic_rotate %274 by %c1_i32_115 dim 1 : vector<4x256xf32>, i32 -> vector<4x256xf32>
    %568 = vector.extract_strided_slice %0 {offsets = [3, 0], sizes = [1, 256], strides = [1, 1]} : vector<9x256xf32> to vector<1x256xf32>
    %569 = vector.broadcast %568 : vector<1x256xf32> to vector<4x256xf32>
    %570 = arith.mulf %567, %569 : vector<4x256xf32>
    %571 = arith.truncf %570 : vector<4x256xf32> to vector<4x256xbf16>
    %572 = arith.truncf %274 : vector<4x256xf32> to vector<4x256xbf16>
    %c255_i32_116 = arith.constant 255 : i32
    %573 = tpu.dynamic_rotate %274 by %c255_i32_116 dim 1 : vector<4x256xf32>, i32 -> vector<4x256xf32>
    %574 = vector.extract_strided_slice %0 {offsets = [5, 0], sizes = [1, 256], strides = [1, 1]} : vector<9x256xf32> to vector<1x256xf32>
    %575 = vector.broadcast %574 : vector<1x256xf32> to vector<4x256xf32>
    %576 = arith.mulf %573, %575 : vector<4x256xf32>
    %577 = arith.truncf %576 : vector<4x256xf32> to vector<4x256xbf16>
    %c241_i32_117 = arith.constant 241 : i32
    %578 = tpu.dynamic_rotate %274 by %c241_i32_117 dim 1 : vector<4x256xf32>, i32 -> vector<4x256xf32>
    %579 = vector.extract_strided_slice %0 {offsets = [6, 0], sizes = [1, 256], strides = [1, 1]} : vector<9x256xf32> to vector<1x256xf32>
    %580 = vector.broadcast %579 : vector<1x256xf32> to vector<4x256xf32>
    %581 = arith.mulf %578, %580 : vector<4x256xf32>
    %582 = arith.truncf %581 : vector<4x256xf32> to vector<4x256xbf16>
    %c240_i32_118 = arith.constant 240 : i32
    %583 = tpu.dynamic_rotate %274 by %c240_i32_118 dim 1 : vector<4x256xf32>, i32 -> vector<4x256xf32>
    %584 = vector.extract_strided_slice %0 {offsets = [7, 0], sizes = [1, 256], strides = [1, 1]} : vector<9x256xf32> to vector<1x256xf32>
    %585 = vector.broadcast %584 : vector<1x256xf32> to vector<4x256xf32>
    %586 = arith.mulf %583, %585 : vector<4x256xf32>
    %587 = arith.truncf %586 : vector<4x256xf32> to vector<4x256xbf16>
    %c239_i32_119 = arith.constant 239 : i32
    %588 = tpu.dynamic_rotate %274 by %c239_i32_119 dim 1 : vector<4x256xf32>, i32 -> vector<4x256xf32>
    %589 = vector.extract_strided_slice %0 {offsets = [8, 0], sizes = [1, 256], strides = [1, 1]} : vector<9x256xf32> to vector<1x256xf32>
    %590 = vector.broadcast %589 : vector<1x256xf32> to vector<4x256xf32>
    %591 = arith.mulf %588, %590 : vector<4x256xf32>
    %592 = arith.truncf %591 : vector<4x256xf32> to vector<4x256xbf16>
    %593 = tpu.concatenate %556, %561, %566, %571, %572, %577, %582, %587, %592 in 0 : vector<4x256xbf16>, vector<4x256xbf16>, vector<4x256xbf16>, vector<4x256xbf16>, vector<4x256xbf16>, vector<4x256xbf16>, vector<4x256xbf16>, vector<4x256xbf16>, vector<4x256xbf16> -> vector<36x256xbf16>
    %c0_120 = arith.constant 0 : index
    %c0_121 = arith.constant 0 : index
    %594 = vector.load %arg14[%c0_120, %c0_121] : memref<8x36xbf16, #tpu.memory_space<vmem>>, vector<8x36xbf16>
    %cst_122 = arith.constant dense<0.000000e+00> : vector<8x256xf32>
    %595 = tpu.matmul %594, %593, %cst_122 {dimension_numbers = #tpu.dot_dimension_numbers<[1], [0], [0], [1], [0, 0, 1, 1], [], []>} : vector<8x36xbf16>, vector<36x256xbf16>, vector<8x256xf32> -> vector<8x256xf32>
    %596 = vector.broadcast %551 : vector<8x1xf32> to vector<8x256xf32>
    %597 = arith.addf %595, %596 : vector<8x256xf32>
    %cst_123 = arith.constant 0.000000e+00 : f32
    %598 = vector.broadcast %cst_123 : f32 to vector<8x256xf32>
    %599 = arith.cmpf oge, %597, %598 : vector<8x256xf32>
    %cst_124 = arith.constant 2.000000e-01 : f32
    %600 = vector.broadcast %cst_124 : f32 to vector<8x256xf32>
    %601 = arith.mulf %600, %597 : vector<8x256xf32>
    %602 = arith.select %599, %597, %601 : vector<8x256xi1>, vector<8x256xf32>
    %603 = vector.extract_strided_slice %544 {offsets = [8, 0], sizes = [4, 1], strides = [1, 1]} : vector<72x1xf32> to vector<4x1xf32>
    %c17_i32_125 = arith.constant 17 : i32
    %604 = tpu.dynamic_rotate %602 by %c17_i32_125 dim 1 : vector<8x256xf32>, i32 -> vector<8x256xf32>
    %605 = vector.extract_strided_slice %0 {offsets = [0, 0], sizes = [1, 256], strides = [1, 1]} : vector<9x256xf32> to vector<1x256xf32>
    %606 = vector.broadcast %605 : vector<1x256xf32> to vector<8x256xf32>
    %607 = arith.mulf %604, %606 : vector<8x256xf32>
    %608 = arith.truncf %607 : vector<8x256xf32> to vector<8x256xbf16>
    %c16_i32_126 = arith.constant 16 : i32
    %609 = tpu.dynamic_rotate %602 by %c16_i32_126 dim 1 : vector<8x256xf32>, i32 -> vector<8x256xf32>
    %610 = vector.extract_strided_slice %0 {offsets = [1, 0], sizes = [1, 256], strides = [1, 1]} : vector<9x256xf32> to vector<1x256xf32>
    %611 = vector.broadcast %610 : vector<1x256xf32> to vector<8x256xf32>
    %612 = arith.mulf %609, %611 : vector<8x256xf32>
    %613 = arith.truncf %612 : vector<8x256xf32> to vector<8x256xbf16>
    %c15_i32_127 = arith.constant 15 : i32
    %614 = tpu.dynamic_rotate %602 by %c15_i32_127 dim 1 : vector<8x256xf32>, i32 -> vector<8x256xf32>
    %615 = vector.extract_strided_slice %0 {offsets = [2, 0], sizes = [1, 256], strides = [1, 1]} : vector<9x256xf32> to vector<1x256xf32>
    %616 = vector.broadcast %615 : vector<1x256xf32> to vector<8x256xf32>
    %617 = arith.mulf %614, %616 : vector<8x256xf32>
    %618 = arith.truncf %617 : vector<8x256xf32> to vector<8x256xbf16>
    %c1_i32_128 = arith.constant 1 : i32
    %619 = tpu.dynamic_rotate %602 by %c1_i32_128 dim 1 : vector<8x256xf32>, i32 -> vector<8x256xf32>
    %620 = vector.extract_strided_slice %0 {offsets = [3, 0], sizes = [1, 256], strides = [1, 1]} : vector<9x256xf32> to vector<1x256xf32>
    %621 = vector.broadcast %620 : vector<1x256xf32> to vector<8x256xf32>
    %622 = arith.mulf %619, %621 : vector<8x256xf32>
    %623 = arith.truncf %622 : vector<8x256xf32> to vector<8x256xbf16>
    %624 = arith.truncf %602 : vector<8x256xf32> to vector<8x256xbf16>
    %c255_i32_129 = arith.constant 255 : i32
    %625 = tpu.dynamic_rotate %602 by %c255_i32_129 dim 1 : vector<8x256xf32>, i32 -> vector<8x256xf32>
    %626 = vector.extract_strided_slice %0 {offsets = [5, 0], sizes = [1, 256], strides = [1, 1]} : vector<9x256xf32> to vector<1x256xf32>
    %627 = vector.broadcast %626 : vector<1x256xf32> to vector<8x256xf32>
    %628 = arith.mulf %625, %627 : vector<8x256xf32>
    %629 = arith.truncf %628 : vector<8x256xf32> to vector<8x256xbf16>
    %c241_i32_130 = arith.constant 241 : i32
    %630 = tpu.dynamic_rotate %602 by %c241_i32_130 dim 1 : vector<8x256xf32>, i32 -> vector<8x256xf32>
    %631 = vector.extract_strided_slice %0 {offsets = [6, 0], sizes = [1, 256], strides = [1, 1]} : vector<9x256xf32> to vector<1x256xf32>
    %632 = vector.broadcast %631 : vector<1x256xf32> to vector<8x256xf32>
    %633 = arith.mulf %630, %632 : vector<8x256xf32>
    %634 = arith.truncf %633 : vector<8x256xf32> to vector<8x256xbf16>
    %c240_i32_131 = arith.constant 240 : i32
    %635 = tpu.dynamic_rotate %602 by %c240_i32_131 dim 1 : vector<8x256xf32>, i32 -> vector<8x256xf32>
    %636 = vector.extract_strided_slice %0 {offsets = [7, 0], sizes = [1, 256], strides = [1, 1]} : vector<9x256xf32> to vector<1x256xf32>
    %637 = vector.broadcast %636 : vector<1x256xf32> to vector<8x256xf32>
    %638 = arith.mulf %635, %637 : vector<8x256xf32>
    %639 = arith.truncf %638 : vector<8x256xf32> to vector<8x256xbf16>
    %c239_i32_132 = arith.constant 239 : i32
    %640 = tpu.dynamic_rotate %602 by %c239_i32_132 dim 1 : vector<8x256xf32>, i32 -> vector<8x256xf32>
    %641 = vector.extract_strided_slice %0 {offsets = [8, 0], sizes = [1, 256], strides = [1, 1]} : vector<9x256xf32> to vector<1x256xf32>
    %642 = vector.broadcast %641 : vector<1x256xf32> to vector<8x256xf32>
    %643 = arith.mulf %640, %642 : vector<8x256xf32>
    %644 = arith.truncf %643 : vector<8x256xf32> to vector<8x256xbf16>
    %645 = tpu.concatenate %608, %613, %618, %623, %624, %629, %634, %639, %644 in 0 : vector<8x256xbf16>, vector<8x256xbf16>, vector<8x256xbf16>, vector<8x256xbf16>, vector<8x256xbf16>, vector<8x256xbf16>, vector<8x256xbf16>, vector<8x256xbf16>, vector<8x256xbf16> -> vector<72x256xbf16>
    %c0_133 = arith.constant 0 : index
    %c0_134 = arith.constant 0 : index
    %646 = vector.load %arg15[%c0_133, %c0_134] : memref<4x72xbf16, #tpu.memory_space<vmem>>, vector<4x72xbf16>
    %cst_135 = arith.constant dense<0.000000e+00> : vector<4x256xf32>
    %647 = tpu.matmul %646, %645, %cst_135 {dimension_numbers = #tpu.dot_dimension_numbers<[1], [0], [0], [1], [0, 0, 1, 1], [], []>} : vector<4x72xbf16>, vector<72x256xbf16>, vector<4x256xf32> -> vector<4x256xf32>
    %648 = vector.broadcast %603 : vector<4x1xf32> to vector<4x256xf32>
    %649 = arith.addf %647, %648 : vector<4x256xf32>
    %650 = vector.extract_strided_slice %544 {offsets = [12, 0], sizes = [4, 1], strides = [1, 1]} : vector<72x1xf32> to vector<4x1xf32>
    %651 = vector.extract_strided_slice %544 {offsets = [16, 0], sizes = [4, 1], strides = [1, 1]} : vector<72x1xf32> to vector<4x1xf32>
    %cst_136 = arith.constant dense<0.000000e+00> : vector<256xf32>
    %652 = vector.multi_reduction <add>, %649, %cst_136 [0] : vector<4x256xf32> to vector<256xf32>
    %653 = vector.shape_cast %652 : vector<256xf32> to vector<1x256xf32>
    %cst_137 = arith.constant 4.000000e+00 : f32
    %654 = vector.broadcast %cst_137 : f32 to vector<1x256xf32>
    %655 = arith.divf %653, %654 : vector<1x256xf32>
    %656 = vector.broadcast %655 : vector<1x256xf32> to vector<4x256xf32>
    %657 = arith.subf %649, %656 : vector<4x256xf32>
    %658 = arith.mulf %657, %657 : vector<4x256xf32>
    %cst_138 = arith.constant dense<0.000000e+00> : vector<256xf32>
    %659 = vector.multi_reduction <add>, %658, %cst_138 [0] : vector<4x256xf32> to vector<256xf32>
    %660 = vector.shape_cast %659 : vector<256xf32> to vector<1x256xf32>
    %cst_139 = arith.constant 4.000000e+00 : f32
    %661 = vector.broadcast %cst_139 : f32 to vector<1x256xf32>
    %662 = arith.divf %660, %661 : vector<1x256xf32>
    %663 = vector.broadcast %655 : vector<1x256xf32> to vector<4x256xf32>
    %664 = arith.subf %649, %663 : vector<4x256xf32>
    %cst_140 = arith.constant 9.99999997E-7 : f32
    %665 = vector.broadcast %cst_140 : f32 to vector<1x256xf32>
    %666 = arith.addf %662, %665 : vector<1x256xf32>
    %667 = math.rsqrt %666 : vector<1x256xf32>
    %668 = vector.broadcast %667 : vector<1x256xf32> to vector<4x256xf32>
    %669 = arith.mulf %664, %668 : vector<4x256xf32>
    %670 = vector.broadcast %650 : vector<4x1xf32> to vector<4x256xf32>
    %671 = arith.mulf %669, %670 : vector<4x256xf32>
    %672 = vector.broadcast %651 : vector<4x1xf32> to vector<4x256xf32>
    %673 = arith.addf %671, %672 : vector<4x256xf32>
    %674 = arith.truncf %673 : vector<4x256xf32> to vector<4x256xbf16>
    %cst_141 = arith.constant dense<0.000000e+00> : vector<8x256xf32>
    %675 = tpu.matmul %546, %674, %cst_141 {dimension_numbers = #tpu.dot_dimension_numbers<[1], [0], [0], [1], [0, 0, 1, 1], [], []>} : vector<8x4xbf16>, vector<4x256xbf16>, vector<8x256xf32> -> vector<8x256xf32>
    %676 = vector.extract_strided_slice %544 {offsets = [20, 0], sizes = [8, 1], strides = [1, 1]} : vector<72x1xf32> to vector<8x1xf32>
    %677 = vector.broadcast %676 : vector<8x1xf32> to vector<8x256xf32>
    %678 = arith.addf %675, %677 : vector<8x256xf32>
    %679 = vector.extract_strided_slice %544 {offsets = [28, 0], sizes = [8, 1], strides = [1, 1]} : vector<72x1xf32> to vector<8x1xf32>
    %c0_142 = arith.constant 0 : index
    %c0_143 = arith.constant 0 : index
    %680 = vector.load %arg16[%c0_142, %c0_143] : memref<8x9xf32, #tpu.memory_space<vmem>>, vector<8x9xf32>
    %681 = vector.extract_strided_slice %680 {offsets = [0, 4], sizes = [8, 1], strides = [1, 1]} : vector<8x9xf32> to vector<8x1xf32>
    %682 = vector.broadcast %681 : vector<8x1xf32> to vector<8x256xf32>
    %683 = arith.mulf %682, %678 : vector<8x256xf32>
    %684 = vector.extract_strided_slice %680 {offsets = [0, 0], sizes = [8, 1], strides = [1, 1]} : vector<8x9xf32> to vector<8x1xf32>
    %c17_i32_144 = arith.constant 17 : i32
    %685 = tpu.dynamic_rotate %678 by %c17_i32_144 dim 1 : vector<8x256xf32>, i32 -> vector<8x256xf32>
    %686 = vector.extract_strided_slice %0 {offsets = [0, 0], sizes = [1, 256], strides = [1, 1]} : vector<9x256xf32> to vector<1x256xf32>
    %687 = vector.broadcast %686 : vector<1x256xf32> to vector<8x256xf32>
    %688 = arith.mulf %685, %687 : vector<8x256xf32>
    %689 = vector.broadcast %684 : vector<8x1xf32> to vector<8x256xf32>
    %690 = arith.mulf %689, %688 : vector<8x256xf32>
    %691 = arith.addf %683, %690 : vector<8x256xf32>
    %692 = vector.extract_strided_slice %680 {offsets = [0, 1], sizes = [8, 1], strides = [1, 1]} : vector<8x9xf32> to vector<8x1xf32>
    %c16_i32_145 = arith.constant 16 : i32
    %693 = tpu.dynamic_rotate %678 by %c16_i32_145 dim 1 : vector<8x256xf32>, i32 -> vector<8x256xf32>
    %694 = vector.extract_strided_slice %0 {offsets = [1, 0], sizes = [1, 256], strides = [1, 1]} : vector<9x256xf32> to vector<1x256xf32>
    %695 = vector.broadcast %694 : vector<1x256xf32> to vector<8x256xf32>
    %696 = arith.mulf %693, %695 : vector<8x256xf32>
    %697 = vector.broadcast %692 : vector<8x1xf32> to vector<8x256xf32>
    %698 = arith.mulf %697, %696 : vector<8x256xf32>
    %699 = arith.addf %691, %698 : vector<8x256xf32>
    %700 = vector.extract_strided_slice %680 {offsets = [0, 2], sizes = [8, 1], strides = [1, 1]} : vector<8x9xf32> to vector<8x1xf32>
    %c15_i32_146 = arith.constant 15 : i32
    %701 = tpu.dynamic_rotate %678 by %c15_i32_146 dim 1 : vector<8x256xf32>, i32 -> vector<8x256xf32>
    %702 = vector.extract_strided_slice %0 {offsets = [2, 0], sizes = [1, 256], strides = [1, 1]} : vector<9x256xf32> to vector<1x256xf32>
    %703 = vector.broadcast %702 : vector<1x256xf32> to vector<8x256xf32>
    %704 = arith.mulf %701, %703 : vector<8x256xf32>
    %705 = vector.broadcast %700 : vector<8x1xf32> to vector<8x256xf32>
    %706 = arith.mulf %705, %704 : vector<8x256xf32>
    %707 = arith.addf %699, %706 : vector<8x256xf32>
    %708 = vector.extract_strided_slice %680 {offsets = [0, 3], sizes = [8, 1], strides = [1, 1]} : vector<8x9xf32> to vector<8x1xf32>
    %c1_i32_147 = arith.constant 1 : i32
    %709 = tpu.dynamic_rotate %678 by %c1_i32_147 dim 1 : vector<8x256xf32>, i32 -> vector<8x256xf32>
    %710 = vector.extract_strided_slice %0 {offsets = [3, 0], sizes = [1, 256], strides = [1, 1]} : vector<9x256xf32> to vector<1x256xf32>
    %711 = vector.broadcast %710 : vector<1x256xf32> to vector<8x256xf32>
    %712 = arith.mulf %709, %711 : vector<8x256xf32>
    %713 = vector.broadcast %708 : vector<8x1xf32> to vector<8x256xf32>
    %714 = arith.mulf %713, %712 : vector<8x256xf32>
    %715 = arith.addf %707, %714 : vector<8x256xf32>
    %716 = vector.extract_strided_slice %680 {offsets = [0, 5], sizes = [8, 1], strides = [1, 1]} : vector<8x9xf32> to vector<8x1xf32>
    %c255_i32_148 = arith.constant 255 : i32
    %717 = tpu.dynamic_rotate %678 by %c255_i32_148 dim 1 : vector<8x256xf32>, i32 -> vector<8x256xf32>
    %718 = vector.extract_strided_slice %0 {offsets = [5, 0], sizes = [1, 256], strides = [1, 1]} : vector<9x256xf32> to vector<1x256xf32>
    %719 = vector.broadcast %718 : vector<1x256xf32> to vector<8x256xf32>
    %720 = arith.mulf %717, %719 : vector<8x256xf32>
    %721 = vector.broadcast %716 : vector<8x1xf32> to vector<8x256xf32>
    %722 = arith.mulf %721, %720 : vector<8x256xf32>
    %723 = arith.addf %715, %722 : vector<8x256xf32>
    %724 = vector.extract_strided_slice %680 {offsets = [0, 6], sizes = [8, 1], strides = [1, 1]} : vector<8x9xf32> to vector<8x1xf32>
    %c241_i32_149 = arith.constant 241 : i32
    %725 = tpu.dynamic_rotate %678 by %c241_i32_149 dim 1 : vector<8x256xf32>, i32 -> vector<8x256xf32>
    %726 = vector.extract_strided_slice %0 {offsets = [6, 0], sizes = [1, 256], strides = [1, 1]} : vector<9x256xf32> to vector<1x256xf32>
    %727 = vector.broadcast %726 : vector<1x256xf32> to vector<8x256xf32>
    %728 = arith.mulf %725, %727 : vector<8x256xf32>
    %729 = vector.broadcast %724 : vector<8x1xf32> to vector<8x256xf32>
    %730 = arith.mulf %729, %728 : vector<8x256xf32>
    %731 = arith.addf %723, %730 : vector<8x256xf32>
    %732 = vector.extract_strided_slice %680 {offsets = [0, 7], sizes = [8, 1], strides = [1, 1]} : vector<8x9xf32> to vector<8x1xf32>
    %c240_i32_150 = arith.constant 240 : i32
    %733 = tpu.dynamic_rotate %678 by %c240_i32_150 dim 1 : vector<8x256xf32>, i32 -> vector<8x256xf32>
    %734 = vector.extract_strided_slice %0 {offsets = [7, 0], sizes = [1, 256], strides = [1, 1]} : vector<9x256xf32> to vector<1x256xf32>
    %735 = vector.broadcast %734 : vector<1x256xf32> to vector<8x256xf32>
    %736 = arith.mulf %733, %735 : vector<8x256xf32>
    %737 = vector.broadcast %732 : vector<8x1xf32> to vector<8x256xf32>
    %738 = arith.mulf %737, %736 : vector<8x256xf32>
    %739 = arith.addf %731, %738 : vector<8x256xf32>
    %740 = vector.extract_strided_slice %680 {offsets = [0, 8], sizes = [8, 1], strides = [1, 1]} : vector<8x9xf32> to vector<8x1xf32>
    %c239_i32_151 = arith.constant 239 : i32
    %741 = tpu.dynamic_rotate %678 by %c239_i32_151 dim 1 : vector<8x256xf32>, i32 -> vector<8x256xf32>
    %742 = vector.extract_strided_slice %0 {offsets = [8, 0], sizes = [1, 256], strides = [1, 1]} : vector<9x256xf32> to vector<1x256xf32>
    %743 = vector.broadcast %742 : vector<1x256xf32> to vector<8x256xf32>
    %744 = arith.mulf %741, %743 : vector<8x256xf32>
    %745 = vector.broadcast %740 : vector<8x1xf32> to vector<8x256xf32>
    %746 = arith.mulf %745, %744 : vector<8x256xf32>
    %747 = arith.addf %739, %746 : vector<8x256xf32>
    %748 = vector.broadcast %679 : vector<8x1xf32> to vector<8x256xf32>
    %749 = arith.addf %747, %748 : vector<8x256xf32>
    %750 = vector.extract_strided_slice %749 {offsets = [0, 0], sizes = [4, 256], strides = [1, 1]} : vector<8x256xf32> to vector<4x256xf32>
    %751 = vector.extract_strided_slice %749 {offsets = [4, 0], sizes = [4, 256], strides = [1, 1]} : vector<8x256xf32> to vector<4x256xf32>
    %752 = arith.mulf %750, %751 : vector<4x256xf32>
    %cst_152 = arith.constant dense<0.000000e+00> : vector<4xf32>
    %753 = vector.multi_reduction <add>, %752, %cst_152 [1] : vector<4x256xf32> to vector<4xf32>
    %754 = vector.shape_cast %753 : vector<4xf32> to vector<4x1xf32>
    %cst_153 = arith.constant 2.560000e+02 : f32
    %755 = vector.broadcast %cst_153 : f32 to vector<4x1xf32>
    %756 = arith.divf %754, %755 : vector<4x1xf32>
    %757 = arith.extf %547 : vector<4x4xbf16> to vector<4x4xf32>
    %cst_154 = arith.constant dense<0.000000e+00> : vector<4x1xf32>
    %758 = tpu.matmul %757, %756, %cst_154 {dimension_numbers = #tpu.dot_dimension_numbers<[1], [0], [0], [1], [0, 0, 1, 1], [], []>} : vector<4x4xf32>, vector<4x1xf32>, vector<4x1xf32> -> vector<4x1xf32>
    %759 = vector.extract_strided_slice %544 {offsets = [36, 0], sizes = [4, 1], strides = [1, 1]} : vector<72x1xf32> to vector<4x1xf32>
    %760 = arith.addf %758, %759 : vector<4x1xf32>
    %761 = vector.broadcast %760 : vector<4x1xf32> to vector<4x256xf32>
    %762 = arith.mulf %752, %761 : vector<4x256xf32>
    %763 = arith.truncf %762 : vector<4x256xf32> to vector<4x256xbf16>
    %cst_155 = arith.constant dense<0.000000e+00> : vector<4x256xf32>
    %764 = tpu.matmul %548, %763, %cst_155 {dimension_numbers = #tpu.dot_dimension_numbers<[1], [0], [0], [1], [0, 0, 1, 1], [], []>} : vector<4x4xbf16>, vector<4x256xbf16>, vector<4x256xf32> -> vector<4x256xf32>
    %765 = vector.extract_strided_slice %544 {offsets = [40, 0], sizes = [4, 1], strides = [1, 1]} : vector<72x1xf32> to vector<4x1xf32>
    %766 = vector.broadcast %765 : vector<4x1xf32> to vector<4x256xf32>
    %767 = arith.addf %764, %766 : vector<4x256xf32>
    %768 = vector.extract_strided_slice %544 {offsets = [64, 0], sizes = [4, 1], strides = [1, 1]} : vector<72x1xf32> to vector<4x1xf32>
    %769 = vector.broadcast %768 : vector<4x1xf32> to vector<4x256xf32>
    %770 = arith.mulf %767, %769 : vector<4x256xf32>
    %771 = arith.addf %649, %770 : vector<4x256xf32>
    %772 = vector.extract_strided_slice %544 {offsets = [44, 0], sizes = [4, 1], strides = [1, 1]} : vector<72x1xf32> to vector<4x1xf32>
    %773 = vector.extract_strided_slice %544 {offsets = [48, 0], sizes = [4, 1], strides = [1, 1]} : vector<72x1xf32> to vector<4x1xf32>
    %cst_156 = arith.constant dense<0.000000e+00> : vector<256xf32>
    %774 = vector.multi_reduction <add>, %771, %cst_156 [0] : vector<4x256xf32> to vector<256xf32>
    %775 = vector.shape_cast %774 : vector<256xf32> to vector<1x256xf32>
    %cst_157 = arith.constant 4.000000e+00 : f32
    %776 = vector.broadcast %cst_157 : f32 to vector<1x256xf32>
    %777 = arith.divf %775, %776 : vector<1x256xf32>
    %778 = vector.broadcast %777 : vector<1x256xf32> to vector<4x256xf32>
    %779 = arith.subf %771, %778 : vector<4x256xf32>
    %780 = arith.mulf %779, %779 : vector<4x256xf32>
    %cst_158 = arith.constant dense<0.000000e+00> : vector<256xf32>
    %781 = vector.multi_reduction <add>, %780, %cst_158 [0] : vector<4x256xf32> to vector<256xf32>
    %782 = vector.shape_cast %781 : vector<256xf32> to vector<1x256xf32>
    %cst_159 = arith.constant 4.000000e+00 : f32
    %783 = vector.broadcast %cst_159 : f32 to vector<1x256xf32>
    %784 = arith.divf %782, %783 : vector<1x256xf32>
    %785 = vector.broadcast %777 : vector<1x256xf32> to vector<4x256xf32>
    %786 = arith.subf %771, %785 : vector<4x256xf32>
    %cst_160 = arith.constant 9.99999997E-7 : f32
    %787 = vector.broadcast %cst_160 : f32 to vector<1x256xf32>
    %788 = arith.addf %784, %787 : vector<1x256xf32>
    %789 = math.rsqrt %788 : vector<1x256xf32>
    %790 = vector.broadcast %789 : vector<1x256xf32> to vector<4x256xf32>
    %791 = arith.mulf %786, %790 : vector<4x256xf32>
    %792 = vector.broadcast %772 : vector<4x1xf32> to vector<4x256xf32>
    %793 = arith.mulf %791, %792 : vector<4x256xf32>
    %794 = vector.broadcast %773 : vector<4x1xf32> to vector<4x256xf32>
    %795 = arith.addf %793, %794 : vector<4x256xf32>
    %796 = arith.truncf %795 : vector<4x256xf32> to vector<4x256xbf16>
    %cst_161 = arith.constant dense<0.000000e+00> : vector<8x256xf32>
    %797 = tpu.matmul %549, %796, %cst_161 {dimension_numbers = #tpu.dot_dimension_numbers<[1], [0], [0], [1], [0, 0, 1, 1], [], []>} : vector<8x4xbf16>, vector<4x256xbf16>, vector<8x256xf32> -> vector<8x256xf32>
    %798 = vector.extract_strided_slice %544 {offsets = [52, 0], sizes = [8, 1], strides = [1, 1]} : vector<72x1xf32> to vector<8x1xf32>
    %799 = vector.broadcast %798 : vector<8x1xf32> to vector<8x256xf32>
    %800 = arith.addf %797, %799 : vector<8x256xf32>
    %801 = vector.extract_strided_slice %800 {offsets = [0, 0], sizes = [4, 256], strides = [1, 1]} : vector<8x256xf32> to vector<4x256xf32>
    %802 = vector.extract_strided_slice %800 {offsets = [4, 0], sizes = [4, 256], strides = [1, 1]} : vector<8x256xf32> to vector<4x256xf32>
    %803 = arith.mulf %801, %802 : vector<4x256xf32>
    %804 = arith.truncf %803 : vector<4x256xf32> to vector<4x256xbf16>
    %cst_162 = arith.constant dense<0.000000e+00> : vector<4x256xf32>
    %805 = tpu.matmul %550, %804, %cst_162 {dimension_numbers = #tpu.dot_dimension_numbers<[1], [0], [0], [1], [0, 0, 1, 1], [], []>} : vector<4x4xbf16>, vector<4x256xbf16>, vector<4x256xf32> -> vector<4x256xf32>
    %806 = vector.extract_strided_slice %544 {offsets = [60, 0], sizes = [4, 1], strides = [1, 1]} : vector<72x1xf32> to vector<4x1xf32>
    %807 = vector.broadcast %806 : vector<4x1xf32> to vector<4x256xf32>
    %808 = arith.addf %805, %807 : vector<4x256xf32>
    %809 = vector.extract_strided_slice %544 {offsets = [68, 0], sizes = [4, 1], strides = [1, 1]} : vector<72x1xf32> to vector<4x1xf32>
    %810 = vector.broadcast %809 : vector<4x1xf32> to vector<4x256xf32>
    %811 = arith.mulf %808, %810 : vector<4x256xf32>
    %812 = arith.addf %771, %811 : vector<4x256xf32>
    %813 = arith.negf %543 : vector<4x256xf32>
    %814 = math.exp %813 : vector<4x256xf32>
    %cst_163 = arith.constant 1.000000e+00 : f32
    %815 = vector.broadcast %cst_163 : f32 to vector<4x256xf32>
    %816 = arith.addf %815, %814 : vector<4x256xf32>
    %817 = arith.divf %815, %816 : vector<4x256xf32>
    %cst_164 = arith.constant 2.000000e+00 : f32
    %818 = vector.broadcast %cst_164 : f32 to vector<4x256xf32>
    %819 = arith.mulf %817, %818 : vector<4x256xf32>
    %cst_165 = arith.constant 1.000000e+00 : f32
    %820 = vector.broadcast %cst_165 : f32 to vector<4x256xf32>
    %821 = arith.subf %819, %820 : vector<4x256xf32>
    %cst_166 = arith.constant 1.000000e+00 : f32
    %822 = vector.broadcast %cst_166 : f32 to vector<4x256xf32>
    %823 = arith.mulf %822, %821 : vector<4x256xf32>
    %824 = math.exp %823 : vector<4x256xf32>
    %825 = arith.mulf %4, %824 : vector<4x256xf32>
    %826 = arith.addf %825, %812 : vector<4x256xf32>
    %827 = vector.shape_cast %274 : vector<4x256xf32> to vector<1x4x256xf32>
    %c0_167 = arith.constant 0 : index
    %c0_168 = arith.constant 0 : index
    %c0_169 = arith.constant 0 : index
    %828 = vector.load %arg19[%c0_167, %c0_168, %c0_169] : memref<1x4x256xf32, #tpu.memory_space<vmem>>, vector<1x4x256xf32>
    tpu.vector_store %arg19[%c0_167, %c0_168, %c0_169], %827 {strides = array<i32>} : memref<1x4x256xf32, #tpu.memory_space<vmem>>, vector<1x4x256xf32>,
    %829 = vector.shape_cast %826 : vector<4x256xf32> to vector<1x4x256xf32>
    %c0_170 = arith.constant 0 : index
    %c0_171 = arith.constant 0 : index
    %c0_172 = arith.constant 0 : index
    %830 = vector.load %arg20[%c0_170, %c0_171, %c0_172] : memref<1x4x256xf32, #tpu.memory_space<vmem>>, vector<1x4x256xf32>
    tpu.vector_store %arg20[%c0_170, %c0_171, %c0_172], %829 {strides = array<i32>} : memref<1x4x256xf32, #tpu.memory_space<vmem>>, vector<1x4x256xf32>,
    return
  }
  func.func @transform_0(%arg0: i32) -> (i32, i32) {
    %c0_i32 = arith.constant 0 : i32
    %c0_i32_0 = arith.constant 0 : i32
    %c0_i32_1 = arith.constant 0 : i32
    return %c0_i32, %c0_i32_0 : i32, i32
  }
  func.func @transform_1(%arg0: i32) -> (i32, i32, i32) {
    %c0_i32 = arith.constant 0 : i32
    %c0_i32_0 = arith.constant 0 : i32
    %c0_i32_1 = arith.constant 0 : i32
    return %arg0, %c0_i32, %c0_i32_0 : i32, i32, i32
  }
  func.func @transform_2(%arg0: i32) -> (i32, i32, i32) {
    %c0_i32 = arith.constant 0 : i32
    %c0_i32_0 = arith.constant 0 : i32
    %c0_i32_1 = arith.constant 0 : i32
    return %arg0, %c0_i32, %c0_i32_0 : i32, i32, i32
  }
  func.func @transform_3(%arg0: i32) -> (i32, i32) {
    %c0_i32 = arith.constant 0 : i32
    %c0_i32_0 = arith.constant 0 : i32
    %c0_i32_1 = arith.constant 0 : i32
    return %c0_i32, %c0_i32_0 : i32, i32
  }
  func.func @transform_4(%arg0: i32) -> (i32, i32) {
    %c0_i32 = arith.constant 0 : i32
    %c0_i32_0 = arith.constant 0 : i32
    %c0_i32_1 = arith.constant 0 : i32
    return %c0_i32, %c0_i32_0 : i32, i32
  }
  func.func @transform_5(%arg0: i32) -> (i32, i32) {
    %c0_i32 = arith.constant 0 : i32
    %c0_i32_0 = arith.constant 0 : i32
    %c0_i32_1 = arith.constant 0 : i32
    return %c0_i32, %c0_i32_0 : i32, i32
  }
  func.func @transform_6(%arg0: i32) -> (i32, i32) {
    %c0_i32 = arith.constant 0 : i32
    %c0_i32_0 = arith.constant 0 : i32
    %c0_i32_1 = arith.constant 0 : i32
    return %c0_i32, %c0_i32_0 : i32, i32
  }
  func.func @transform_7(%arg0: i32) -> (i32, i32) {
    %c0_i32 = arith.constant 0 : i32
    %c0_i32_0 = arith.constant 0 : i32
    %c0_i32_1 = arith.constant 0 : i32
    return %c0_i32, %c0_i32_0 : i32, i32
  }
  func.func @transform_8(%arg0: i32) -> (i32, i32) {
    %c0_i32 = arith.constant 0 : i32
    %c0_i32_0 = arith.constant 0 : i32
    %c0_i32_1 = arith.constant 0 : i32
    return %c0_i32, %c0_i32_0 : i32, i32
  }
  func.func @transform_9(%arg0: i32) -> (i32, i32) {
    %c0_i32 = arith.constant 0 : i32
    %c0_i32_0 = arith.constant 0 : i32
    %c0_i32_1 = arith.constant 0 : i32
    return %c0_i32, %c0_i32_0 : i32, i32
  }
  func.func @transform_10(%arg0: i32) -> (i32, i32) {
    %c0_i32 = arith.constant 0 : i32
    %c0_i32_0 = arith.constant 0 : i32
    %c0_i32_1 = arith.constant 0 : i32
    return %c0_i32, %c0_i32_0 : i32, i32
  }
  func.func @transform_11(%arg0: i32) -> (i32, i32) {
    %c0_i32 = arith.constant 0 : i32
    %c0_i32_0 = arith.constant 0 : i32
    %c0_i32_1 = arith.constant 0 : i32
    return %c0_i32, %c0_i32_0 : i32, i32
  }
  func.func @transform_12(%arg0: i32) -> (i32, i32) {
    %c0_i32 = arith.constant 0 : i32
    %c0_i32_0 = arith.constant 0 : i32
    %c0_i32_1 = arith.constant 0 : i32
    return %c0_i32, %c0_i32_0 : i32, i32
  }
  func.func @transform_13(%arg0: i32) -> (i32, i32) {
    %c0_i32 = arith.constant 0 : i32
    %c0_i32_0 = arith.constant 0 : i32
    %c0_i32_1 = arith.constant 0 : i32
    return %c0_i32, %c0_i32_0 : i32, i32
  }
  func.func @transform_14(%arg0: i32) -> (i32, i32) {
    %c0_i32 = arith.constant 0 : i32
    %c0_i32_0 = arith.constant 0 : i32
    %c0_i32_1 = arith.constant 0 : i32
    return %c0_i32, %c0_i32_0 : i32, i32
  }
  func.func @transform_15(%arg0: i32) -> (i32, i32) {
    %c0_i32 = arith.constant 0 : i32
    %c0_i32_0 = arith.constant 0 : i32
    %c0_i32_1 = arith.constant 0 : i32
    return %c0_i32, %c0_i32_0 : i32, i32
  }
  func.func @transform_16(%arg0: i32) -> (i32, i32) {
    %c0_i32 = arith.constant 0 : i32
    %c0_i32_0 = arith.constant 0 : i32
    %c0_i32_1 = arith.constant 0 : i32
    return %c0_i32, %c0_i32_0 : i32, i32
  }
  func.func @transform_17(%arg0: i32) -> (i32, i32) {
    %c0_i32 = arith.constant 0 : i32
    %c0_i32_0 = arith.constant 0 : i32
    %c0_i32_1 = arith.constant 0 : i32
    return %c0_i32, %c0_i32_0 : i32, i32
  }
  func.func @transform_18(%arg0: i32) -> (i32, i32, i32) {
    %c0_i32 = arith.constant 0 : i32
    %c0_i32_0 = arith.constant 0 : i32
    %c0_i32_1 = arith.constant 0 : i32
    return %arg0, %c0_i32, %c0_i32_0 : i32, i32, i32
  }
  func.func @transform_19(%arg0: i32) -> (i32, i32, i32) {
    %c0_i32 = arith.constant 0 : i32
    %c0_i32_0 = arith.constant 0 : i32
    %c0_i32_1 = arith.constant 0 : i32
    return %arg0, %c0_i32, %c0_i32_0 : i32, i32, i32
  }
}

</mosaic_0001>

<bundles_post_ra>
// kernel: invnn_forward.2
= control target key start
LH: loop header
LB: loop body
LE: loop exit
PB: predicated region body
PF: predicated region fallthrough
CT: control target
= control target key end

     0   :  { %s5411_s0 = inlined_call_operand.vmem [shape: f32[9,256], index: 0, kind: input, shape index: {}]   ;;  %s5412_s1 = inlined_call_operand.vmem [shape: f32[2,4,256], index: 1, kind: input, shape index: {}]   ;;  %s5413_s2 = inlined_call_operand.vmem [shape: f32[2,4,256], index: 2, kind: input, shape index: {}]   ;;  %s5414_s3 = inlined_call_operand.vmem [shape: bf16[8,36], index: 3, kind: input, shape index: {}]   ;;  %s5415_s4 = inlined_call_operand.vmem [shape: bf16[4,72], index: 4, kind: input, shape index: {}]   ;;  %s5416_s5 = inlined_call_operand.vmem [shape: f32[8,9], index: 5, kind: input, shape index: {}]   ;;  %s5417_s6 = inlined_call_operand.vmem [shape: bf16[28,4], index: 6, kind: input, shape index: {}]   ;;  %s5418_s7 = inlined_call_operand.vmem [shape: f32[72,1], index: 7, kind: input, shape index: {}]   ;;  %s5419_s8 = inlined_call_operand.vmem [shape: bf16[8,36], index: 8, kind: input, shape index: {}]   ;;  %s5420_s9 = inlined_call_operand.vmem [shape: bf16[4,72], index: 9, kind: input, shape index: {}]   ;;  %s5421_s10 = inlined_call_operand.vmem [shape: f32[8,9], index: 10, kind: input, shape index: {}]   ;;  %s5422_s11 = inlined_call_operand.vmem [shape: bf16[28,4], index: 11, kind: input, shape index: {}]   ;;  %s5423_s12 = inlined_call_operand.vmem [shape: f32[72,1], index: 12, kind: input, shape index: {}]   ;;  %s5424_s13 = inlined_call_operand.vmem [shape: bf16[8,36], index: 13, kind: input, shape index: {}]   ;;  %s5425_s14 = inlined_call_operand.vmem [shape: bf16[4,72], index: 14, kind: input, shape index: {}]   ;;  %s5426_s15 = inlined_call_operand.vmem [shape: f32[8,9], index: 15, kind: input, shape index: {}]   ;;  %s5427_s16 = inlined_call_operand.vmem [shape: bf16[28,4], index: 16, kind: input, shape index: {}]   ;;  %s5428_s17 = inlined_call_operand.vmem [shape: f32[72,1], index: 17, kind: input, shape index: {}]   ;;  %s5429_s18 = inlined_call_operand.vmem [shape: f32[2,4,256], index: 18, kind: output, shape index: {0}]   ;;  %s5430_s19 = inlined_call_operand.vmem [shape: f32[2,4,256], index: 19, kind: output, shape index: {1}]  }
   0x1   :  { %5469 = sst [smem:[#allocation5_spill]] %s5411_s0  ;;  %s4067_s0 = smov 0  }
   0x2   :  { %5470 = sst [smem:[#allocation6_spill]] %s5412_s1 }
   0x3   :  { %5471 = sst [smem:[#allocation7_spill]] %s5413_s2 }
   0x4   :  { %5472 = sst [smem:[#allocation8_spill]] %s5414_s3 }
   0x5   :  { %5473 = sst [smem:[#allocation9_spill]] %s5415_s4 }
   0x6   :  { %5474 = sst [smem:[#allocation10_spill]] %s5416_s5 }
   0x7   :  { %5475 = sst [smem:[#allocation11_spill]] %s5417_s6 }
   0x8   :  { %5476 = sst [smem:[#allocation12_spill]] %s5418_s7 }
   0x9   :  { %5477 = sst [smem:[#allocation13_spill]] %s5419_s8 }
   0xa   :  { %5478 = sst [smem:[#allocation14_spill]] %s5420_s9 }
   0xb LB: > { %5479 = sst [smem:[#allocation2_spill]] %s3946_s0  ;;  %s3745_s30 = sadd.s32 4294967295, %s3946_s0   ;;  %s3946_s0 = sphi %s4067_s0, %s30_s0  }
   0xc   : > { %p3749_p0 = scmp.ge.s32.totalorder %s3946_s0, 1  ;;  %p550_p1 = scmp.lt.s32.totalorder %s3946_s0, 3 }
   0xe   : > { %p551_p2 = pnand %p3749_p0, %p550_p1 }
  0x10   : > { %554 = sbr.rel (%p551_p2) target bundleno = 6705 (0x1a31), region = 92 }
  0x17   : > { %p616_p3 = scmp.lt.s32.totalorder %s3745_s30, 1  ;;  %s5480_s22 = sld [smem:[#allocation7_spill]]  ;;  %v5462_v2 = vmov 0   ;;  %v663_v4 = vlaneseq  ;;  %vm839_vm5 = vcmask 1041408   ;;  %vm846_vm6 = vcmask 1043456  }
  0x18   : > { %s5440_s23 = smov 15   ;;  %s5452_s24 = smov 16   ;;  %922 = vmatprep.mubr.bf16.mxu0 %v5462_v2  ;;  %3863 = vset.pattern.permute.xlu0 %v5462_v2  ;;  %vm851_vm8 = vcmask 1045504   ;;  %vm880_vm11 = vcmask 293888   ;;  %vm1073_vm14 = vcmask 588800   ;;  %vm1188_vm15 = vcmask 31744  }
  0x19   : > { %s5515_s30 = smov (!%p616_p3, %s3745_s30), 1  ;;  %s5450_s25 = smov 17   ;;  %3864 = vset.pattern.permute.xlu1 %v5462_v2  ;;  %1115 = vmatprep.mubr.bf16.mxu1 %v5462_v2  ;;  %v4129_v5 = vshrl.u32 %v663_v4, 7  ;;  %v4131_v6 = vand.u32 127, %v663_v4 }
  0x1a   : > { %s4075_s20 = sshll.u32 %s5515_s30, 3  ;;  %s5436_s3 = smov 1  }
  0x1b   : > { %s5438_s26 = smov 127   ;;  %s5432_s27 = smov 113   ;;  %v708_v9 = vsub.s32 2, %v4129_v5  ;;  %v670_v11 = vsub.s32 0, %v4129_v5  ;;  %vm703_vm0 = vcmp.lt.s32.totalorder %v4131_v6, 15  ;;  %v689_v13 = vsub.s32 1, %v4129_v5 }
  0x1c   : > { %s5442_s28 = smov 112   ;;  %s5434_s29 = smov 111   ;;  %v727_v14 = vsub.s32 3, %v4129_v5  ;;  %vm665_vm1 = vcmp.lt.s32.totalorder %v4131_v6, 17  ;;  %vm684_vm2 = vcmp.lt.s32.totalorder %v4131_v6, 16  ;;  %v748_v24 = vsub.s32 5, %v4129_v5 }
  0x1d   : > { %s4081_s2 = scalar_lea.vmem %s5480_s22, %s4075_s20  ;;  %s5481_s7 = sld [smem:[#allocation12_spill]]  ;;  %vm722_vm3 = vcmp.lt.s32.totalorder %v4131_v6, 1  ;;  %vm743_vm4 = vcmp.lt.s32.totalorder %v4131_v6, 127  ;;  %v767_v31 = vsub.s32 6, %v4129_v5  ;;  %vm762_vm7 = vcmp.lt.s32.totalorder %v4131_v6, 113 }
  0x1e   : > { %v4084_v0 = vld [vmem:[%s4081_s2] sm:$0xff]  ;;  %vm781_vm9 = vcmp.lt.s32.totalorder %v4131_v6, 112  ;;  %vm800_vm10 = vcmp.lt.s32.totalorder %v4131_v6, 111  ;;  %s5485_s21 = sld [smem:[#allocation8_spill]]  ;;  %s5486_s1 = smov 113  }
  0x1f   : > { %699 = vrot.lane.b32.xlu1 %v4084_v0, %s5440_s23  ;;  %680 = vrot.lane.b32.xlu0 %v4084_v0, %s5452_s24  ;;  %v4092_v1 = vcombine.high %v4084_v0, %v4084_v0  ;;  %s5487_s22 = smov 111   ;;  %s5488_s5 = sld [smem:[#allocation10_spill]] }
  0x20   : > { %s5489_s4 = sld [smem:[#allocation9_spill]]  ;;  %s5490_s6 = sld [smem:[#allocation11_spill]] }
  0x21   : > { %s5491_s30 = smov 15   ;;  %s630_s0 = scalar_lea.vmem %s5429_s18, %s4075_s20 }
  0x22   : > { %s5498_s8 = sld [smem:[#allocation13_spill]]  ;;  %s5502_s9 = sld [smem:[#allocation14_spill]] }
  0x23   : > { %659 = vrot.lane.b32.xlu0 %v4084_v0, %s5450_s25  ;;  %701 = vrot.lane.b32.xlu1 %v4092_v1, %s5440_s23  ;;  %v643_v3 = vld [vmem:[%s5481_s7] sm:$0xff] }
  0x27   : > { %661 = vrot.lane.b32.xlu1 %v4092_v1, %s5450_s25  ;;  %682 = vrot.lane.b32.xlu0 %v4092_v1, %s5452_s24 }
  0x2b   : > { %720 = vrot.lane.b32.xlu1 %v4092_v1, %s5436_s3  ;;  %718 = vrot.lane.b32.xlu0 %v4084_v0, %s5436_s3 }
  0x2f   : > { %741 = vrot.lane.b32.xlu1 %v4092_v1, %s5438_s26  ;;  %739 = vrot.lane.b32.xlu0 %v4084_v0, %s5438_s26 }
  0x33   : > { %760 = vrot.lane.b32.xlu1 %v4092_v1, %s5432_s27  ;;  %758 = vrot.lane.b32.xlu0 %v4084_v0, %s5432_s27  ;;  %s5482_s27 = sld [smem:[#allocation5_spill]] }
  0x37   : > { %779 = vrot.lane.b32.xlu1 %v4092_v1, %s5442_s28  ;;  %777 = vrot.lane.b32.xlu0 %v4084_v0, %s5442_s28 }
  0x39   : > { %v4137_v10 = vld [vmem:[%s5482_s27 + $0x8] sm:$0xff]  ;;  %v4143_v12 = vld [vmem:[%s5482_s27] sm:$0xff] }
  0x3a   : > { %v4149_v16 = vrot.slane %v4137_v10, %v708_v9  ;;  %v4153_v18 = vrot.slane %v4143_v12, %v708_v9  ;;  %v4158_v20 = vrot.slane %v4143_v12, %v670_v11  ;;  %v4162_v21 = vrot.slane %v4137_v10, %v670_v11 }
  0x3b   : > { %798 = vrot.lane.b32.xlu1 %v4092_v1, %s5434_s29  ;;  %796 = vrot.lane.b32.xlu0 %v4084_v0, %s5434_s29  ;;  %v4165_v22 = vrot.slane %v4143_v12, %v689_v13  ;;  %v4168_v23 = vrot.slane %v4137_v10, %v689_v13  ;;  %v4175_v26 = vrot.slane %v4143_v12, %v727_v14 }
  0x3c   : > { %5483 = vst [vmem:[#allocation3_spill] sm:$0xff] %v4158_v20  ;;  %5484 = vst [vmem:[#allocation4_spill] sm:$0xff] %v4162_v21  ;;  %v4178_v27 = vrot.slane %v4137_v10, %v727_v14  ;;  %v4193_v37 = vrot.slane %v4143_v12, %v748_v24  ;;  %v4196_v38 = vrot.slane %v4137_v10, %v748_v24 }
  0x3d   : > { %v4204_v46 = vrot.slane %v4143_v12, %v767_v31  ;;  %v4213_v54 = vrot.slane %v4137_v10, %v767_v31 }
  0x3f   : > { %877 = vperm.xlu0 %3863, %v643_v3   ;;  %v786_v3 = vsub.s32 7, %v4129_v5 }
  0x91   : > { %v700_v7 = vpop.permute.xlu1 %699  ;;  %v681_v8 = vpop.permute.xlu0 %680 }
  0x95   : > { %v660_v15 = vpop.permute.xlu0 %659  ;;  %v702_v17 = vpop.permute.xlu1 %701 }
  0x96   : > { %v704_v19 = vsel %vm703_vm0, %v700_v7, %v702_v17  ;;  %v705_v25 = vsel %vm703_vm0, %v702_v17, %v700_v7 }
  0x97   : > { %v715_v28 = vmul.f32 %v4149_v16, %v704_v19  ;;  %v714_v36 = vmul.f32 %v4153_v18, %v705_v25 }
  0x99   : > { %v662_v29 = vpop.permute.xlu1 %661  ;;  %v683_v30 = vpop.permute.xlu0 %682  ;;  %v717_v43 = vpack.c.bf16 %v715_v28, %v715_v28  ;;  %v716_v51 = vpack.c.bf16 %v714_v36, %v714_v36  ;;  %v4236_v36 = vrot.slane %v4143_v12, %v786_v3 }
  0x9a   : > { %v666_v32 = vsel %vm665_vm1, %v660_v15, %v662_v29  ;;  %v667_v33 = vsel %vm665_vm1, %v662_v29, %v660_v15  ;;  %v685_v34 = vsel %vm684_vm2, %v681_v8, %v683_v30  ;;  %v686_v35 = vsel %vm684_vm2, %v683_v30, %v681_v8 }
  0x9b   : > { %v676_v39 = vmul.f32 %v4158_v20, %v667_v33  ;;  %v677_v40 = vmul.f32 %v4162_v21, %v666_v32  ;;  %v695_v41 = vmul.f32 %v4165_v22, %v686_v35  ;;  %v696_v42 = vmul.f32 %v4168_v23, %v685_v34 }
  0x9c   : > { %v822_v59 = vrot.slane %v717_v43, 4  ;;  %v821_v11 = vrot.slane %v716_v51, 4 }
  0x9d   : > { %v721_v44 = vpop.permute.xlu1 %720  ;;  %v719_v45 = vpop.permute.xlu0 %718  ;;  %v697_v47 = vpack.c.bf16 %v695_v41, %v695_v41  ;;  %v698_v48 = vpack.c.bf16 %v696_v42, %v696_v42  ;;  %v678_v55 = vpack.c.bf16 %v676_v39, %v676_v39  ;;  %v679_v56 = vpack.c.bf16 %v677_v40, %v677_v40 }
  0x9e   : > { %v723_v49 = vsel %vm722_vm3, %v719_v45, %v721_v44  ;;  %v724_v50 = vsel %vm722_vm3, %v721_v44, %v719_v45  ;;  %v4239_v39 = vrot.slane %v4137_v10, %v786_v3  ;;  %v738_v44 = vpack.c.bf16 %v4092_v1, %v4092_v1  ;;  %v4260_v1 = vld [vmem:[%s5482_s27 + $0x10] ss:$0 sm:$0xff] }
  0x9f   : > { %v733_v52 = vmul.f32 %v4175_v26, %v724_v50  ;;  %v734_v53 = vmul.f32 %v4178_v27, %v723_v49  ;;  %v817_v57 = vrot.slane %v697_v47, 6  ;;  %v818_v58 = vrot.slane %v698_v48, 6 }
  0xa0   : > { %v737_v45 = vpack.c.bf16 %v4084_v0, %v4084_v0  ;;  %v4255_v0 = vld [vmem:[%s5482_s27 + $0x18] ss:$0 sm:$0xff] }
  0xa1   : > { %v735_v60 = vpack.c.bf16 %v733_v52, %v733_v52  ;;  %v742_v61 = vpop.permute.xlu1 %741  ;;  %v740_v62 = vpop.permute.xlu0 %739  ;;  %v736_v63 = vpack.c.bf16 %v734_v53, %v734_v53  ;;  %v845_v8 = vsel %vm839_vm5, %v679_v56, %v818_v58  ;;  %v842_v9 = vsel %vm839_vm5, %v678_v55, %v817_v57 }
  0xa2   : > { %v744_v4 = vsel %vm743_vm4, %v740_v62, %v742_v61  ;;  %v745_v7 = vsel %vm743_vm4, %v742_v61, %v740_v62  ;;  %v850_v17 = vsel %vm846_vm6, %v845_v8, %v822_v59  ;;  %v848_v29 = vsel %vm846_vm6, %v842_v9, %v821_v11 }
  0xa3   : > { %v754_v13 = vmul.f32 %v4193_v37, %v744_v4  ;;  %v755_v14 = vmul.f32 %v4196_v38, %v745_v7  ;;  %v826_v15 = vrot.slane %v736_v63, 2  ;;  %v825_v19 = vrot.slane %v735_v60, 2 }
  0xa5   : > { %v756_v5 = vpack.c.bf16 %v754_v13, %v754_v13  ;;  %v761_v24 = vpop.permute.xlu1 %760  ;;  %v759_v25 = vpop.permute.xlu0 %758  ;;  %v856_v28 = vsel %vm851_vm8, %v850_v17, %v826_v15  ;;  %v757_v30 = vpack.c.bf16 %v755_v14, %v755_v14  ;;  %v853_v33 = vsel %vm851_vm8, %v848_v29, %v825_v19  ;;  %v874_v17 = vld [vmem:[%s5485_s21] sm:$0xf] }
  0xa6   : > { %v763_v31 = vsel %vm762_vm7, %v759_v25, %v761_v24  ;;  %v764_v32 = vsel %vm762_vm7, %v761_v24, %v759_v25  ;;  %890 = vmatprep.subr.bf16.mxu0 %v856_v28 }
  0xa7   : > { %v773_v34 = vmul.f32 %v4204_v46, %v763_v31  ;;  %v774_v35 = vmul.f32 %v4213_v54, %v764_v32  ;;  %891 = vmatpush1.bf16.msra.mxu0 %v853_v33  ;;  %v829_v47 = vrot.slane %v756_v5, 6  ;;  %v830_v48 = vrot.slane %v757_v30, 6 }
  0xa9   : > { %v775_v40 = vpack.c.bf16 %v773_v34, %v773_v34  ;;  %v776_v41 = vpack.c.bf16 %v774_v35, %v774_v35  ;;  %v780_v42 = vpop.permute.xlu1 %779  ;;  %v778_v43 = vpop.permute.xlu0 %777  ;;  %v863_v60 = vsel %vm839_vm5, %v738_v44, %v830_v48  ;;  %v860_v61 = vsel %vm839_vm5, %v737_v45, %v829_v47  ;;  %v644_v35 = vld [vmem:[%s5481_s7 + $0x8] sm:$0xff]  ;;  %v4339_v45 = vld [vmem:[%s5481_s7 + $0x20] sm:$0xff] }
  0xaa   : > { %v782_v49 = vsel %vm781_vm9, %v778_v43, %v780_v42  ;;  %v783_v12 = vsel %vm781_vm9, %v780_v42, %v778_v43  ;;  %v645_v42 = vld [vmem:[%s5481_s7 + $0x10] sm:$0xff]  ;;  %v5461_v43 = vmov 4   ;;  %v5460_v44 = vmov 1  }
  0xab   : > { %v792_v10 = vmul.f32 %v4236_v36, %v782_v49  ;;  %v793_v50 = vmul.f32 %v4239_v39, %v783_v12  ;;  %v833_v51 = vrot.slane %v775_v40, 4  ;;  %v834_v52 = vrot.slane %v776_v41, 4  ;;  %v646_v40 = vld [vmem:[%s5481_s7 + $0x18] sm:$0xff]  ;;  %v4326_v41 = vld [vmem:[%s5488_s5] sm:$0xff] }
  0xad   : > { %v794_v53 = vpack.c.bf16 %v792_v10, %v792_v10  ;;  %v795_v55 = vpack.c.bf16 %v793_v50, %v793_v50  ;;  %v799_v56 = vpop.permute.xlu1 %798  ;;  %v797_v57 = vpop.permute.xlu0 %796  ;;  %v867_v7 = vsel %vm846_vm6, %v863_v60, %v834_v52  ;;  %v865_v8 = vsel %vm846_vm6, %v860_v61, %v833_v51 }
  0xae   : > { %v801_v58 = vsel %vm800_vm10, %v797_v57, %v799_v56  ;;  %v802_v59 = vsel %vm800_vm10, %v799_v56, %v797_v57 }
  0xaf   : > { %v837_v62 = vrot.slane %v794_v53, 2  ;;  %v838_v63 = vrot.slane %v795_v55, 2  ;;  %v812_v3 = vmul.f32 %v4255_v0, %v802_v59  ;;  %v811_v4 = vmul.f32 %v4260_v1, %v801_v58 }
  0xb1   : > { %v814_v9 = vpack.c.bf16 %v812_v3, %v812_v3  ;;  %v872_v11 = vsel %vm851_vm8, %v867_v7, %v838_v63  ;;  %v869_v13 = vsel %vm851_vm8, %v865_v8, %v837_v62  ;;  %v813_v14 = vpack.c.bf16 %v811_v4, %v811_v4 }
  0xb2   : > { %892 = vmatprep.subr.bf16.mxu0 %v872_v11 }
  0xb3   : > { %893 = vmatpush1.bf16.msra.mxu0 %v869_v13  ;;  %v885_v15 = vsel %vm839_vm5, %v813_v14, 0 }
  0xb4   : > { %3760 = vmatprep.subr.msk.bf16.mxu0 %vm839_vm5, %v814_v9 }
  0xb7   : > { %895 = vmatpush1.bf16.msra.mxu0 %v885_v15 }
  0xba   : > { %3761 = vmatmul.mubr.msk.bf16.vlgmr.msra.gmra.mrb[0].mxu0 %vm880_vm11, %v874_v17 }
  0xbb   : > { %1230 = vmatprep.mubr.bf16.mxu0 %v5462_v2 }
  0xbe   : > { %v878_v19 = vpop.permute.xlu0 %877 }
 0x18d   : > { %v924_v5 = vpop.f32.mrb[0].mxu0 }
 0x18e   : > { %v925_v24 = vadd.f32 %v924_v5, %v878_v19  ;;  %v926_v25 = vpop.f32.mrb[1].mxu0 }
 0x18f   : > { %v927_v28 = vadd.f32 %v926_v25, %v878_v19  ;;  %v928_v29 = vpop.f32.mrb[2].mxu0 }
 0x190   : > { %vm931_vm12 = vcmp.ge.f32.partialorder %v925_v24, 0.0  ;;  %v933_v30 = vmul.f32 0.2, %v925_v24  ;;  %v929_v31 = vpop.f32.mrb[3].mxu0 }
 0x191   : > { %v934_v33 = vmul.f32 0.2, %v927_v28  ;;  %vm932_vm13 = vcmp.ge.f32.partialorder %v927_v28, 0.0 }
 0x192   : > { %v4281_v32 = vsel %vm931_vm12, %v925_v24, %v933_v30  ;;  %vm3966_vm12 = vmmov 0  }
 0x193   : > { %937 = vrot.lane.b32.xlu0 %v4281_v32, %s5450_s25  ;;  %947 = vrot.lane.b32.xlu1 %v4281_v32, %s5452_s24  ;;  %v4287_v34 = vsel %vm932_vm13, %v927_v28, %v934_v33 }
 0x197   : > { %967 = vrot.lane.b32.xlu0 %v4281_v32, %s5436_s3  ;;  %949 = vrot.lane.b32.xlu1 %v4287_v34, %s5452_s24 }
 0x19b   : > { %957 = vrot.lane.b32.xlu0 %v4281_v32, %s5440_s23  ;;  %939 = vrot.lane.b32.xlu1 %v4287_v34, %s5450_s25 }
 0x19f   : > { %979 = vrot.lane.b32.xlu0 %v4281_v32, %s5438_s26  ;;  %969 = vrot.lane.b32.xlu1 %v4287_v34, %s5436_s3  ;;  %s5493_s3 = smov 112  }
 0x1a3   : > { %999 = vrot.lane.b32.xlu0 %v4281_v32, %s5442_s28  ;;  %959 = vrot.lane.b32.xlu1 %v4287_v34, %s5440_s23  ;;  %s5492_s23 = smov 1  }
 0x1a7   : > { %989 = vrot.lane.b32.xlu0 %v4281_v32, %s5486_s1  ;;  %981 = vrot.lane.b32.xlu1 %v4287_v34, %s5438_s26  ;;  %s5494_s26 = smov 127  }
 0x1ab   : > { %1009 = vrot.lane.b32.xlu0 %v4281_v32, %s5487_s22  ;;  %1001 = vrot.lane.b32.xlu1 %v4287_v34, %s5442_s28  ;;  %s5495_s28 = sld [smem:[#allocation6_spill]] }
 0x1af   : > { %1070 = vperm.xlu0 %3863, %v644_v35   ;;  %991 = vrot.lane.b32.xlu1 %v4287_v34, %s5486_s1 }
 0x1b1   : > { %s620_s29 = scalar_lea.vmem %s5495_s28, %s4075_s20 }
 0x1b3   : > { %1182 = vperm.xlu0 %3863, %v646_v40   ;;  %1011 = vrot.lane.b32.xlu1 %v4287_v34, %s5487_s22 }
 0x1b7   : > { %1256 = vperm.xlu0 %3863, %v4326_v41   ;;  %1173 = vperm.xlu1 %3864, %v645_v42  }
 0x1bb   : > { %3865 = vset.pattern.permute.xlu1 %v5461_v43 }
 0x1bc   : > { %1242 = vperm.xlu1 %3865, %v4326_v41  }
 0x1c0   : > { %3866 = vset.pattern.permute.xlu1 %v5460_v44 }
 0x1c1   : > { %1272 = vperm.xlu1 %3866, %v4326_v41  }
 0x1c5   : > { %3873 = vset.pattern.permute.xlu1 %v5462_v2 }
 0x1c6   : > { %1377 = vperm.xlu1 %3873, %v4339_v45  }
 0x205   : > { %v938_v47 = vpop.permute.xlu0 %937  ;;  %v948_v48 = vpop.permute.xlu1 %947 }
 0x209   : > { %v968_v49 = vpop.permute.xlu0 %967  ;;  %v950_v12 = vpop.permute.xlu1 %949 }
 0x20a   : > { %v951_v10 = vsel %vm684_vm2, %v948_v48, %v950_v12  ;;  %v952_v50 = vsel %vm684_vm2, %v950_v12, %v948_v48 }
 0x20b   : > { %v953_v51 = vmul.f32 %v952_v50, %v4165_v22  ;;  %v954_v52 = vmul.f32 %v951_v10, %v4168_v23 }
 0x20d   : > { %v955_v53 = vpack.c.bf16 %v953_v51, %v953_v51  ;;  %v958_v55 = vpop.permute.xlu0 %957  ;;  %v940_v56 = vpop.permute.xlu1 %939  ;;  %v956_v57 = vpack.c.bf16 %v954_v52, %v954_v52 }
 0x20e   : > { %v941_v58 = vsel %vm665_vm1, %v938_v47, %v940_v56  ;;  %v942_v59 = vsel %vm665_vm1, %v940_v56, %v938_v47 }
 0x20f   : > { %v943_v60 = vmul.f32 %v942_v59, %v4158_v20  ;;  %v944_v61 = vmul.f32 %v941_v58, %v4162_v21  ;;  %v1022_v3 = vrot.slane %v956_v57, 4  ;;  %v1021_v7 = vrot.slane %v955_v53, 4 }
 0x210   : > { %v978_v58 = vpack.c.bf16 %v4287_v34, %v4287_v34  ;;  %v977_v59 = vpack.c.bf16 %v4281_v32, %v4281_v32 }
 0x211   : > { %v970_v62 = vpop.permute.xlu1 %969  ;;  %v946_v63 = vpack.c.bf16 %v944_v61, %v944_v61  ;;  %v945_v4 = vpack.c.bf16 %v943_v60, %v943_v60  ;;  %v980_v11 = vpop.permute.xlu0 %979 }
 0x212   : > { %v971_v8 = vsel %vm722_vm3, %v968_v49, %v970_v62  ;;  %v972_v9 = vsel %vm722_vm3, %v970_v62, %v968_v49 }
 0x213   : > { %v973_v13 = vmul.f32 %v972_v9, %v4175_v26  ;;  %v974_v14 = vmul.f32 %v971_v8, %v4178_v27  ;;  %v1041_v15 = vsel %vm846_vm6, %v946_v63, %v1022_v3  ;;  %v1037_v17 = vsel %vm846_vm6, %v945_v4, %v1021_v7 }
 0x214   : > { %1083 = vmatprep.subr.bf16.mxu1 %v1041_v15 }
 0x215   : > { %v975_v19 = vpack.c.bf16 %v973_v13, %v973_v13  ;;  %v976_v5 = vpack.c.bf16 %v974_v14, %v974_v14  ;;  %1084 = vmatpush1.bf16.msra.mxu1 %v1037_v17  ;;  %v960_v24 = vpop.permute.xlu1 %959  ;;  %v1000_v35 = vpop.permute.xlu0 %999 }
 0x216   : > { %v961_v25 = vsel %vm703_vm0, %v958_v55, %v960_v24  ;;  %v962_v28 = vsel %vm703_vm0, %v960_v24, %v958_v55 }
 0x217   : > { %v963_v29 = vmul.f32 %v962_v28, %v4153_v18  ;;  %v964_v30 = vmul.f32 %v961_v25, %v4149_v16  ;;  %v1025_v31 = vrot.slane %v975_v19, 4  ;;  %v1026_v33 = vrot.slane %v976_v5, 4 }
 0x219   : > { %v965_v40 = vpack.c.bf16 %v963_v29, %v963_v29  ;;  %v966_v42 = vpack.c.bf16 %v964_v30, %v964_v30  ;;  %v982_v47 = vpop.permute.xlu1 %981  ;;  %v990_v60 = vpop.permute.xlu0 %989 }
 0x21a   : > { %v983_v48 = vsel %vm743_vm4, %v980_v11, %v982_v47  ;;  %v984_v49 = vsel %vm743_vm4, %v982_v47, %v980_v11 }
 0x21b   : > { %v985_v12 = vmul.f32 %v983_v48, %v4193_v37  ;;  %v986_v10 = vmul.f32 %v984_v49, %v4196_v38  ;;  %v1049_v50 = vsel %vm846_vm6, %v966_v42, %v1026_v33  ;;  %v1045_v51 = vsel %vm846_vm6, %v965_v40, %v1025_v31  ;;  %v1067_v48 = vld [vmem:[%s5489_s4] sm:$0x3] }
 0x21c   : > { %1085 = vmatprep.subr.bf16.mxu1 %v1049_v50  ;;  %v5459_v49 = vmov 2   ;;  %v5448_v50 = vmov 6  }
 0x21d   : > { %v987_v52 = vpack.c.bf16 %v985_v12, %v985_v12  ;;  %v988_v53 = vpack.c.bf16 %v986_v10, %v986_v10  ;;  %1086 = vmatpush1.bf16.msra.mxu1 %v1045_v51  ;;  %v1002_v55 = vpop.permute.xlu1 %1001  ;;  %v1010_v15 = vpop.permute.xlu0 %1009  ;;  %3867 = vset.pattern.permute.xlu0 %v5459_v49  ;;  %v5458_v12 = vmov 3   ;;  %v5457_v10 = vmov 5  }
 0x21e   : > { %v1003_v56 = vsel %vm781_vm9, %v1000_v35, %v1002_v55  ;;  %v1004_v57 = vsel %vm781_vm9, %v1002_v55, %v1000_v35  ;;  %1288 = vperm.xlu0 %3867, %v4326_v41   ;;  %v5446_v51 = vmov 7  }
 0x21f   : > { %v1029_v61 = vrot.slane %v987_v52, 4  ;;  %v1030_v62 = vrot.slane %v988_v53, 4  ;;  %v1005_v63 = vmul.f32 %v1003_v56, %v4236_v36  ;;  %v1006_v3 = vmul.f32 %v1004_v57, %v4239_v39 }
 0x221   : > { %v1007_v4 = vpack.c.bf16 %v1005_v63, %v1005_v63  ;;  %v1008_v7 = vpack.c.bf16 %v1006_v3, %v1006_v3  ;;  %v992_v8 = vpop.permute.xlu1 %991  ;;  %v1057_v9 = vsel %vm846_vm6, %v978_v58, %v1030_v62  ;;  %v1053_v11 = vsel %vm846_vm6, %v977_v59, %v1029_v61 }
 0x222   : > { %v993_v34 = vsel %vm762_vm7, %v990_v60, %v992_v8  ;;  %v994_v32 = vsel %vm762_vm7, %v992_v8, %v990_v60  ;;  %1087 = vmatprep.subr.bf16.mxu1 %v1057_v9  ;;  %3868 = vset.pattern.permute.xlu0 %v5458_v12 }
 0x223   : > { %v995_v13 = vmul.f32 %v993_v34, %v4204_v46  ;;  %v996_v14 = vmul.f32 %v994_v32, %v4213_v54  ;;  %1088 = vmatpush1.bf16.msra.mxu1 %v1053_v11  ;;  %v1033_v17 = vrot.slane %v1007_v4, 4  ;;  %v1034_v19 = vrot.slane %v1008_v7, 4  ;;  %1304 = vperm.xlu0 %3868, %v4326_v41  }
 0x225   : > { %v997_v5 = vpack.c.bf16 %v995_v13, %v995_v13  ;;  %v998_v24 = vpack.c.bf16 %v996_v14, %v996_v14  ;;  %v1012_v25 = vpop.permute.xlu1 %1011 }
 0x226   : > { %v1013_v28 = vsel %vm800_vm10, %v1010_v15, %v1012_v25  ;;  %v1014_v29 = vsel %vm800_vm10, %v1012_v25, %v1010_v15 }
 0x227   : > { %v1016_v30 = vmul.f32 %v4255_v0, %v1014_v29  ;;  %v1065_v31 = vsel %vm846_vm6, %v998_v24, %v1034_v19  ;;  %v1061_v33 = vsel %vm846_vm6, %v997_v5, %v1033_v17  ;;  %v1015_v35 = vmul.f32 %v4260_v1, %v1013_v28  ;;  %3869 = vset.pattern.permute.xlu0 %v5457_v10 }
 0x228   : > { %1089 = vmatprep.subr.bf16.mxu1 %v1065_v31  ;;  %1320 = vperm.xlu0 %3869, %v4326_v41  }
 0x229   : > { %v1018_v40 = vpack.c.bf16 %v1016_v30, %v1016_v30  ;;  %1090 = vmatpush1.bf16.msra.mxu1 %v1061_v33  ;;  %v1017_v42 = vpack.c.bf16 %v1015_v35, %v1015_v35 }
 0x22b   : > { %3762 = vmatprep.subr.msk.bf16.mxu1 %vm846_vm6, %v1018_v40  ;;  %v1078_v47 = vsel %vm846_vm6, %v1017_v42, 0 }
 0x22c   : > { %3870 = vset.pattern.permute.xlu0 %v5448_v50 }
 0x22d   : > { %1092 = vmatpush1.bf16.msra.mxu1 %v1078_v47  ;;  %1336 = vperm.xlu0 %3870, %v4326_v41  }
 0x22e   : > { %v1071_v52 = vpop.permute.xlu0 %1070 }
 0x230   : > { %3763 = vmatmul.mubr.msk.bf16.vlgmr.msra.gmra.mrb[0].mxu1 %vm1073_vm14, %v1067_v48 }
 0x231   : > { %1537 = vmatprep.mubr.bf16.mxu1 %v5462_v2  ;;  %3871 = vset.pattern.permute.xlu0 %v5446_v51 }
 0x232   : > { %1352 = vperm.xlu0 %3871, %v4326_v41  }
 0x303   : > { %v1117_v53 = vpop.f32.mrb[0].mxu1 }
 0x304   : > { %v4420_v55 = vadd.f32 %v1117_v53, %v1071_v52  ;;  %v1119_v56 = vpop.f32.mrb[1].mxu1 }
 0x305   : > { %v4422_v57 = vadd.f32 %v1119_v56, %v1071_v52  ;;  %v1121_v58 = vpop.f32.mrb[2].mxu1 }
 0x306   : > { %v1124_v59 = vsel %vm846_vm6, %v4420_v55, 0.0  ;;  %v1122_v60 = vpop.f32.mrb[3].mxu1 }
 0x307   : > { %v1125_v61 = vrot.slane %v1124_v59, 4  ;;  %v1131_v62 = vsel %vm846_vm6, %v4422_v57, 0.0 }
 0x308   : > { %v1132_v63 = vrot.slane %v1131_v62, 4 }
 0x309   : > { %v1126_v3 = vadd.f32 %v1125_v61, %v1124_v59 }
 0x30a   : > { %v1133_v4 = vadd.f32 %v1132_v63, %v1131_v62 }
 0x30b   : > { %v1127_v7 = vrot.slane %v1126_v3, 2 }
 0x30c   : > { %v1134_v8 = vrot.slane %v1133_v4, 2 }
 0x30d   : > { %v1128_v9 = vadd.f32 %v1127_v7, %v1126_v3  ;;  %v1167_v7 = vrot.slane %v1071_v52, 4  ;;  %v5444_v52 = vmov 8  }
 0x30e   : > { %v1135_v11 = vadd.f32 %v1134_v8, %v1133_v4  ;;  %3872 = vset.pattern.permute.xlu0 %v5444_v52 }
 0x30f   : > { %v1129_v34 = vrot.slane %v1128_v9, 1 }
 0x310   : > { %v1136_v32 = vrot.slane %v1135_v11, 1 }
 0x311   : > { %v1130_v13 = vadd.f32 %v1129_v34, %v1128_v9  ;;  %v1174_v34 = vpop.permute.xlu1 %1173 }
 0x312   : > { %v1137_v14 = vadd.f32 %v1136_v32, %v1135_v11 }
 0x313   : > { %v1139_v15 = vmul.f32 0.25, %v1130_v13 }
 0x314   : > { %v1140_v17 = vmul.f32 0.25, %v1137_v14 }
 0x315   : > { %v1141_v19 = vsub.f32 %v4420_v55, %v1139_v15 }
 0x316   : > { %v1142_v5 = vsub.f32 %v4422_v57, %v1140_v17 }
 0x317   : > { %v1143_v24 = vmul.f32 %v1141_v19, %v1141_v19 }
 0x318   : > { %v1144_v25 = vmul.f32 %v1142_v5, %v1142_v5 }
 0x319   : > { %v1145_v28 = vsel %vm846_vm6, %v1143_v24, 0.0 }
 0x31a   : > { %v1146_v29 = vrot.slane %v1145_v28, 4  ;;  %v1152_v30 = vsel %vm846_vm6, %v1144_v25, 0.0  ;;  %v652_v25 = vld [vmem:[%s5490_s6] sm:$0xf] }
 0x31b   : > { %v1153_v31 = vrot.slane %v1152_v30, 4 }
 0x31c   : > { %v1147_v33 = vadd.f32 %v1146_v29, %v1145_v28 }
 0x31d   : > { %v1154_v35 = vadd.f32 %v1153_v31, %v1152_v30 }
 0x31e   : > { %v1148_v40 = vrot.slane %v1147_v33, 2 }
 0x31f   : > { %v1155_v42 = vrot.slane %v1154_v35, 2 }
 0x320   : > { %v1149_v47 = vadd.f32 %v1148_v40, %v1147_v33 }
 0x321   : > { %v1156_v48 = vadd.f32 %v1155_v42, %v1154_v35 }
 0x322   : > { %v1150_v53 = vrot.slane %v1149_v47, 1 }
 0x323   : > { %v1157_v56 = vrot.slane %v1156_v48, 1 }
 0x324   : > { %v1151_v58 = vadd.f32 %v1150_v53, %v1149_v47 }
 0x325   : > { %v1158_v59 = vadd.f32 %v1157_v56, %v1156_v48 }
 0x326   : > { %v1159_v60 = vmul.f32 0.25, %v1151_v58 }
 0x327   : > { %v1160_v61 = vmul.f32 0.25, %v1158_v59 }
 0x328   : > { %v1161_v62 = vadd.f32 1e-06, %v1159_v60 }
 0x329   : > { %v1162_v63 = vadd.f32 1e-06, %v1160_v61 }
 0x32a   : > { %3899 = vrsqrt.f32 %v1161_v62 }
 0x32b   : > { %3901 = vrsqrt.f32 %v1162_v63 }
 0x334   : > { %v3900_v3 = vpop.eup %3899 }
 0x335   : > { %v3902_v4 = vpop.eup %3901  ;;  %v1165_v8 = vmul.f32 %v3900_v3, %v1141_v19  ;;  %v4439_v19 = vpop.permute.xlu0 %1182 }
 0x336   : > { %v1166_v9 = vmul.f32 %v3902_v4, %v1142_v5  ;;  %v1184_v5 = vrot.slane %v1174_v34, 4  ;;  %v1185_v28 = vrot.slane %v4439_v19, 4  ;;  %v653_v19 = vld [vmem:[%s5490_s6 + $0x4] sm:$0xf] }
 0x337   : > { %v1169_v11 = vmul.f32 %v1167_v7, %v1165_v8 }
 0x338   : > { %v1170_v32 = vmul.f32 %v1167_v7, %v1166_v9  ;;  %v1186_v29 = vsel %vm846_vm6, %v1184_v5, %v1185_v28 }
 0x339   : > { %v1176_v13 = vadd.f32 %v1174_v34, %v1169_v11  ;;  %v1257_v48 = vpop.permute.xlu0 %1256 }
 0x33a   : > { %v1177_v14 = vadd.f32 %v1174_v34, %v1170_v32 }
 0x33b   : > { %v1178_v15 = vpack.c.bf16 %v1176_v13, %v1176_v13 }
 0x33c   : > { %v1179_v17 = vpack.c.bf16 %v1177_v14, %v1177_v14 }
 0x33d   : > { %v1193_v24 = vsel %vm839_vm5, %v1178_v15, 0  ;;  %v1289_v56 = vpop.permute.xlu0 %1288 }
 0x33e   : > { %3764 = vmatprep.subr.msk.bf16.mxu0 %vm839_vm5, %v1179_v17 }
 0x33f   : > { %1199 = vmatpush1.bf16.msra.mxu0 %v1193_v24 }
 0x341   : > { %v1305_v59 = vpop.permute.xlu0 %1304 }
 0x342   : > { %3765 = vmatmul.mubr.msk.bf16.vlgmr.msra.gmra.mrb[4].mxu0 %vm1188_vm15, %v652_v25 }
 0x345   : > { %v1321_v62 = vpop.permute.xlu0 %1320 }
 0x349   : > { %v4465_v3 = vpop.permute.xlu0 %1336 }
 0x34d   : > { %v4467_v8 = vpop.permute.xlu0 %1352 }
 0x415   : > { %v1232_v30 = vpop.f32.mrb[4].mxu0 }
 0x416   : > { %v1233_v31 = vadd.f32 %v1232_v30, %v1186_v29  ;;  %v1234_v33 = vpop.f32.mrb[5].mxu0 }
 0x417   : > { %v1236_v35 = vpop.f32.mrb[6].mxu0  ;;  %v1235_v42 = vadd.f32 %v1234_v33, %v1186_v29 }
 0x418   : > { %v1237_v40 = vpop.f32.mrb[7].mxu0  ;;  %1263 = vrot.lane.b32.xlu1 %v1233_v31, %s5452_s24  ;;  %1247 = vrot.lane.b32.xlu0 %v1233_v31, %s5450_s25 }
 0x41c   : > { %1279 = vrot.lane.b32.xlu1 %v1233_v31, %s5491_s30  ;;  %1368 = vperm.xlu0 %3872, %v4326_v41   ;;  %v1243_v41 = vpop.permute.xlu1 %1242 }
 0x420   : > { %1295 = vrot.lane.b32.xlu1 %v1233_v31, %s5492_s23  ;;  %1345 = vrot.lane.b32.xlu0 %v1235_v42, %s5493_s3  ;;  %v1273_v47 = vpop.permute.xlu1 %1272 }
 0x421   : > { %3874 = vset.pattern.permute.xlu0 %v5462_v2 }
 0x424   : > { %1311 = vrot.lane.b32.xlu1 %v1233_v31, %s5494_s26  ;;  %1361 = vrot.lane.b32.xlu0 %v1235_v42, %s5487_s22  ;;  %v4463_v53 = vpop.permute.xlu1 %1377 }
 0x428   : > { %1327 = vrot.lane.b32.xlu1 %v1233_v31, %s5486_s1 }
 0x42c   : > { %1343 = vrot.lane.b32.xlu1 %v1233_v31, %s5493_s3 }
 0x430   : > { %1249 = vrot.lane.b32.xlu1 %v1235_v42, %s5450_s25  ;;  %s5497_s25 = smov 17  }
 0x434   : > { %1265 = vrot.lane.b32.xlu1 %v1235_v42, %s5452_s24  ;;  %s5496_s24 = smov 16  }
 0x438   : > { %1281 = vrot.lane.b32.xlu1 %v1235_v42, %s5491_s30 }
 0x43c   : > { %1297 = vrot.lane.b32.xlu1 %v1235_v42, %s5492_s23 }
 0x440   : > { %1313 = vrot.lane.b32.xlu1 %v1235_v42, %s5494_s26 }
 0x444   : > { %1329 = vrot.lane.b32.xlu1 %v1235_v42, %s5486_s1 }
 0x448   : > { %1359 = vrot.lane.b32.xlu1 %v1233_v31, %s5487_s22 }
 0x48a   : > { %v1264_v58 = vpop.permute.xlu1 %1263  ;;  %v1248_v11 = vpop.permute.xlu0 %1247 }
 0x48e   : > { %v1280_v60 = vpop.permute.xlu1 %1279 }
 0x492   : > { %v1296_v61 = vpop.permute.xlu1 %1295 }
 0x496   : > { %v1312_v63 = vpop.permute.xlu1 %1311 }
 0x49a   : > { %v1328_v4 = vpop.permute.xlu1 %1327 }
 0x49b   : > { %v4477_v17 = vpop.permute.xlu0 %1368 }
 0x49e   : > { %v1344_v7 = vpop.permute.xlu1 %1343 }
 0x49f   : > { %v1346_v52 = vpop.permute.xlu0 %1345 }
 0x4a2   : > { %v1250_v9 = vpop.permute.xlu1 %1249 }
 0x4a3   : > { %v1251_v34 = vsel %vm665_vm1, %v1248_v11, %v1250_v9  ;;  %v1252_v32 = vsel %vm665_vm1, %v1250_v9, %v1248_v11  ;;  %v1245_v11 = vmul.f32 %v1243_v41, %v1233_v31 }
 0x4a4   : > { %v1253_v24 = vmul.f32 %v1252_v32, %v4158_v20  ;;  %v1254_v25 = vmul.f32 %v1251_v34, %v4162_v21 }
 0x4a6   : > { %v1266_v13 = vpop.permute.xlu1 %1265  ;;  %v1259_v40 = vmul.f32 %v1257_v48, %v1253_v24  ;;  %v1260_v9 = vmul.f32 %v1257_v48, %v1254_v25  ;;  %v1348_v24 = vsel %vm781_vm9, %v1346_v52, %v1344_v7 }
 0x4a7   : > { %v1267_v14 = vsel %vm684_vm2, %v1264_v58, %v1266_v13  ;;  %v1268_v15 = vsel %vm684_vm2, %v1266_v13, %v1264_v58  ;;  %v1246_v58 = vmul.f32 %v1243_v41, %v1235_v42  ;;  %v1347_v41 = vsel %vm781_vm9, %v1344_v7, %v1346_v52 }
 0x4a8   : > { %v1269_v29 = vmul.f32 %v1268_v15, %v4165_v22  ;;  %v1270_v30 = vmul.f32 %v1267_v14, %v4168_v23  ;;  %v1261_v42 = vadd.f32 %v1259_v40, %v1245_v11 }
 0x4a9   : > { %v1262_v31 = vadd.f32 %v1260_v9, %v1246_v58 }
 0x4aa   : > { %v1282_v5 = vpop.permute.xlu1 %1281  ;;  %v1275_v51 = vmul.f32 %v1273_v47, %v1269_v29  ;;  %v1276_v15 = vmul.f32 %v1273_v47, %v1270_v30 }
 0x4ab   : > { %v1283_v33 = vsel %vm703_vm0, %v1280_v60, %v1282_v5  ;;  %v1284_v35 = vsel %vm703_vm0, %v1282_v5, %v1280_v60 }
 0x4ac   : > { %v1285_v13 = vmul.f32 %v1284_v35, %v4153_v18  ;;  %v1286_v32 = vmul.f32 %v1283_v33, %v4149_v16  ;;  %v1277_v29 = vadd.f32 %v1275_v51, %v1261_v42  ;;  %v1278_v30 = vadd.f32 %v1276_v15, %v1262_v31 }
 0x4ad   : > { %v1349_v51 = vmul.f32 %v1347_v41, %v4236_v36 }
 0x4ae   : > { %v1298_v34 = vpop.permute.xlu1 %1297  ;;  %v1291_v25 = vmul.f32 %v1289_v56, %v1285_v13  ;;  %v1292_v47 = vmul.f32 %v1289_v56, %v1286_v32  ;;  %v1350_v13 = vmul.f32 %v1348_v24, %v4239_v39 }
 0x4af   : > { %v1299_v14 = vsel %vm722_vm3, %v1296_v61, %v1298_v34  ;;  %v1300_v50 = vsel %vm722_vm3, %v1298_v34, %v1296_v61  ;;  %v1355_v24 = vmul.f32 %v4467_v8, %v1349_v51 }
 0x4b0   : > { %v1301_v60 = vmul.f32 %v1300_v50, %v4175_v26  ;;  %v1302_v48 = vmul.f32 %v1299_v14, %v4178_v27  ;;  %v1293_v58 = vadd.f32 %v1291_v25, %v1277_v29  ;;  %v1294_v11 = vadd.f32 %v1292_v47, %v1278_v30 }
 0x4b1   : > { %v1356_v25 = vmul.f32 %v4467_v8, %v1350_v13 }
 0x4b2   : > { %v1314_v5 = vpop.permute.xlu1 %1313  ;;  %v1307_v33 = vmul.f32 %v1305_v59, %v1301_v60  ;;  %v1308_v35 = vmul.f32 %v1305_v59, %v1302_v48  ;;  %v1362_v60 = vpop.permute.xlu0 %1361 }
 0x4b3   : > { %v1315_v61 = vsel %vm743_vm4, %v1312_v63, %v1314_v5  ;;  %v1316_v50 = vsel %vm743_vm4, %v1314_v5, %v1312_v63 }
 0x4b4   : > { %v1317_v40 = vmul.f32 %v1315_v61, %v4193_v37  ;;  %v1318_v9 = vmul.f32 %v1316_v50, %v4196_v38  ;;  %v1309_v59 = vadd.f32 %v1307_v33, %v1293_v58  ;;  %v1310_v34 = vadd.f32 %v1308_v35, %v1294_v11 }
 0x4b5   : > { %v1379_v50 = vrot.slane %v4463_v53, 4 }
 0x4b6   : > { %v1323_v52 = vmul.f32 %v1321_v62, %v1317_v40  ;;  %v1324_v7 = vmul.f32 %v1321_v62, %v1318_v9  ;;  %v1330_v56 = vpop.permute.xlu1 %1329 }
 0x4b7   : > { %v1331_v32 = vsel %vm762_vm7, %v1328_v4, %v1330_v56  ;;  %v1332_v63 = vsel %vm762_vm7, %v1330_v56, %v1328_v4  ;;  %v1380_v58 = vsel %vm846_vm6, %v1185_v28, %v1379_v50 }
 0x4b8   : > { %v1333_v15 = vmul.f32 %v1331_v32, %v4204_v46  ;;  %v1334_v14 = vmul.f32 %v1332_v63, %v4213_v54  ;;  %v1325_v48 = vadd.f32 %v1323_v52, %v1309_v59  ;;  %v1326_v62 = vadd.f32 %v1324_v7, %v1310_v34 }
 0x4b9   : > { %v1399_v32 = vunpack.c.l.bf16 %v653_v19  ;;  %v1400_v59 = vrot.slane %v4339_v45, 4  ;;  %v650_v45 = vld [vmem:[%s5481_s7 + $0x38] sm:$0xff] }
 0x4ba   : > { %v1339_v42 = vmul.f32 %v4465_v3, %v1333_v15  ;;  %v1340_v31 = vmul.f32 %v4465_v3, %v1334_v14  ;;  %v1360_v41 = vpop.permute.xlu1 %1359 }
 0x4bb   : > { %v1363_v4 = vsel %vm800_vm10, %v1360_v41, %v1362_v60  ;;  %v1364_v47 = vsel %vm800_vm10, %v1362_v60, %v1360_v41  ;;  %v648_v60 = vld [vmem:[%s5481_s7 + $0x28] sm:$0xff] }
 0x4bc   : > { %v1341_v5 = vadd.f32 %v1339_v42, %v1325_v48  ;;  %v1342_v29 = vadd.f32 %v1340_v31, %v1326_v62  ;;  %v1365_v30 = vmul.f32 %v4260_v1, %v1363_v4  ;;  %v1366_v61 = vmul.f32 %v4255_v0, %v1364_v47  ;;  %v651_v48 = vld [vmem:[%s5481_s7 + $0x40] sm:$0xff]  ;;  %v649_v62 = vld [vmem:[%s5481_s7 + $0x30] sm:$0xff] }
 0x4be   : > { %v1371_v3 = vmul.f32 %v4477_v17, %v1365_v30  ;;  %v1372_v33 = vmul.f32 %v4477_v17, %v1366_v61  ;;  %v1357_v35 = vadd.f32 %v1355_v24, %v1341_v5  ;;  %v1358_v8 = vadd.f32 %v1356_v25, %v1342_v29 }
 0x4bf   : > { %v5455_v17 = vmov 0.0   ;;  %v3768_v24 = vcombine.low %v653_v19, %v653_v19 }
 0x4c0   : > { %v1373_v40 = vadd.f32 %v1371_v3, %v1357_v35  ;;  %v1374_v9 = vadd.f32 %v1372_v33, %v1358_v8  ;;  %3821 = vmatprep.subr.mxu0 %v5455_v17  ;;  %3823 = vmatprep.mubr.msk.f32.mxu0 %vm3966_vm12, %v5455_v17 }
 0x4c1   : > { %v1495_v5 = vrot.slane %v3768_v24, 2 }
 0x4c2   : > { %v1382_v11 = vadd.f32 %v1380_v58, %v1373_v40  ;;  %v1383_v52 = vadd.f32 %v1380_v58, %v1374_v9 }
 0x4c4   : > { %v1386_v7 = vrot.slane %v1382_v11, 4  ;;  %v1387_v1 = vrot.slane %v1383_v52, 4 }
 0x4c6   : > { %v1390_v56 = vmul.f32 %v1386_v7, %v1382_v11  ;;  %v1391_v0 = vmul.f32 %v1387_v1, %v1383_v52 }
 0x4c8   : > { %v1392_v53 = vsel %vm846_vm6, %v1390_v56, 0.0  ;;  %v1393_v51 = vsel %vm846_vm6, %v1391_v0, 0.0 }
 0x4c9   : > { %v1394_v13 = vadd.f32 %v1393_v51, %v1392_v53 }
 0x4cb   : > { %1395 = vadd.xlane.f32.xlu1 %v1394_v13 }
 0x558   : > { %v1396_v28 = vpop.xlane.xlu1 %1395 }
 0x559   : > { %v1398_v63 = vmul.f32 0.00390625, %v1396_v28 }
 0x55b   : > { %3822 = vmatpush3.msk.msra.mxu0 %vm846_vm6, %v1398_v63 }
 0x55c   : > { %3824 = vmatmul.mubr.msk.f32.vlgmr.msra.gmra.mrb[8].mxu0 %vm1188_vm15, %v1399_v32 }
 0x55d   : > { %1659 = vmatprep.mubr.bf16.mxu0 %v5462_v2 }
 0x62f   : > { %v1474_v34 = vpop.f32.mrb[8].mxu0 }
 0x630   : > { %v1475_v15 = vadd.f32 %v1474_v34, %v1400_v59  ;;  %v3825_v14 = vpop.f32.mrb[9].mxu0 }
 0x632   : > { %1480 = vperm.xlu0 %3874, %v1475_v15  }
 0x636   : > { %1489 = vperm.xlu0 %3874, %v648_v60  }
 0x63a   : > { %1548 = vperm.xlu0 %3874, %v651_v48  }
 0x63e   : > { %1603 = vperm.xlu0 %3874, %v649_v62  }
 0x642   : > { %1612 = vperm.xlu0 %3874, %v650_v45  }
 0x6b1   : > { %v1481_v42 = vpop.permute.xlu0 %1480 }
 0x6b2   : > { %v1483_v31 = vmul.f32 %v1481_v42, %v1390_v56  ;;  %v1484_v41 = vmul.f32 %v1481_v42, %v1391_v0 }
 0x6b4   : > { %v1485_v25 = vpack.c.bf16 %v1483_v31, %v1483_v31  ;;  %v1486_v4 = vpack.c.bf16 %v1484_v41, %v1484_v41 }
 0x6b5   : > { %v1490_v29 = vpop.permute.xlu0 %1489 }
 0x6b6   : > { %3769 = vmatprep.subr.msk.bf16.mxu1 %vm839_vm5, %v1486_v4  ;;  %v1500_v47 = vsel %vm839_vm5, %v1485_v25, 0 }
 0x6b7   : > { %1506 = vmatpush1.bf16.msra.mxu1 %v1500_v47 }
 0x6b9   : > { %v4557_v3 = vpop.permute.xlu0 %1548 }
 0x6ba   : > { %3770 = vmatmul.mubr.msk.bf16.vlgmr.msra.gmra.mrb[4].mxu1 %vm1188_vm15, %v1495_v5 }
 0x6bb   : > { %1720 = vmatprep.mubr.bf16.mxu1 %v5462_v2 }
 0x78d   : > { %v1539_v30 = vpop.f32.mrb[4].mxu1 }
 0x78e   : > { %v1540_v61 = vadd.f32 %v1539_v30, %v1490_v29  ;;  %v1541_v50 = vpop.f32.mrb[5].mxu1 }
 0x78f   : > { %v1542_v33 = vadd.f32 %v1541_v50, %v1490_v29  ;;  %v1543_v35 = vpop.f32.mrb[6].mxu1 }
 0x790   : > { %v1551_v8 = vmul.f32 %v4557_v3, %v1540_v61  ;;  %v1544_v40 = vpop.f32.mrb[7].mxu1 }
 0x791   : > { %v1552_v9 = vmul.f32 %v4557_v3, %v1542_v33 }
 0x792   : > { %v4562_v58 = vadd.f32 %v1551_v8, %v4420_v55 }
 0x793   : > { %v4565_v11 = vadd.f32 %v1552_v9, %v4422_v57 }
 0x794   : > { %v1555_v52 = vsel %vm846_vm6, %v4562_v58, 0.0 }
 0x795   : > { %v1556_v7 = vrot.slane %v1555_v52, 4  ;;  %v1562_v1 = vsel %vm846_vm6, %v4565_v11, 0.0 }
 0x796   : > { %v1563_v56 = vrot.slane %v1562_v1, 4 }
 0x797   : > { %v1557_v0 = vadd.f32 %v1556_v7, %v1555_v52 }
 0x798   : > { %v1564_v53 = vadd.f32 %v1563_v56, %v1562_v1  ;;  %v1597_v1 = vrot.slane %v1490_v29, 4 }
 0x799   : > { %v1558_v51 = vrot.slane %v1557_v0, 2 }
 0x79a   : > { %v1565_v13 = vrot.slane %v1564_v53, 2 }
 0x79b   : > { %v1559_v19 = vadd.f32 %v1558_v51, %v1557_v0  ;;  %v1604_v51 = vpop.permute.xlu0 %1603 }
 0x79c   : > { %v1566_v28 = vadd.f32 %v1565_v13, %v1564_v53 }
 0x79d   : > { %v1560_v32 = vrot.slane %v1559_v19, 1 }
 0x79e   : > { %v1567_v55 = vrot.slane %v1566_v28, 1 }
 0x79f   : > { %v1561_v63 = vadd.f32 %v1560_v32, %v1559_v19  ;;  %v1613_v29 = vpop.permute.xlu0 %1612 }
 0x7a0   : > { %v1568_v59 = vadd.f32 %v1567_v55, %v1566_v28 }
 0x7a1   : > { %v1569_v57 = vmul.f32 0.25, %v1561_v63 }
 0x7a2   : > { %v1570_v34 = vmul.f32 0.25, %v1568_v59  ;;  %v654_v59 = vld [vmem:[%s5490_s6 + $0x8] sm:$0xf] }
 0x7a3   : > { %v1571_v15 = vsub.f32 %v4562_v58, %v1569_v57  ;;  %v1615_v57 = vrot.slane %v1613_v29, 4 }
 0x7a4   : > { %v1572_v14 = vsub.f32 %v4565_v11, %v1570_v34  ;;  %v1614_v34 = vrot.slane %v1604_v51, 4 }
 0x7a5   : > { %v1573_v60 = vmul.f32 %v1571_v15, %v1571_v15 }
 0x7a6   : > { %v1574_v48 = vmul.f32 %v1572_v14, %v1572_v14 }
 0x7a7   : > { %v1575_v62 = vsel %vm846_vm6, %v1573_v60, 0.0 }
 0x7a8   : > { %v1576_v45 = vrot.slane %v1575_v62, 4  ;;  %v1582_v42 = vsel %vm846_vm6, %v1574_v48, 0.0 }
 0x7a9   : > { %v1583_v31 = vrot.slane %v1582_v42, 4 }
 0x7aa   : > { %v1577_v41 = vadd.f32 %v1576_v45, %v1575_v62 }
 0x7ab   : > { %v1584_v24 = vadd.f32 %v1583_v31, %v1582_v42 }
 0x7ac   : > { %v1578_v25 = vrot.slane %v1577_v41, 2 }
 0x7ad   : > { %v1585_v4 = vrot.slane %v1584_v24, 2 }
 0x7ae   : > { %v1579_v47 = vadd.f32 %v1578_v25, %v1577_v41 }
 0x7af   : > { %v1586_v5 = vadd.f32 %v1585_v4, %v1584_v24 }
 0x7b0   : > { %v1580_v30 = vrot.slane %v1579_v47, 1 }
 0x7b1   : > { %v1587_v61 = vrot.slane %v1586_v5, 1 }
 0x7b2   : > { %v1581_v50 = vadd.f32 %v1580_v30, %v1579_v47  ;;  %v655_v30 = vld [vmem:[%s5490_s6 + $0xc] sm:$0x3] }
 0x7b3   : > { %v1588_v33 = vadd.f32 %v1587_v61, %v1586_v5 }
 0x7b4   : > { %v1589_v35 = vmul.f32 0.25, %v1581_v50 }
 0x7b5   : > { %v1590_v8 = vmul.f32 0.25, %v1588_v33  ;;  %v1729_v33 = vrot.slane %v4557_v3, 4 }
 0x7b6   : > { %v1591_v40 = vadd.f32 1e-06, %v1589_v35 }
 0x7b7   : > { %v1592_v9 = vadd.f32 1e-06, %v1590_v8 }
 0x7b8   : > { %3903 = vrsqrt.f32 %v1591_v40 }
 0x7b9   : > { %3905 = vrsqrt.f32 %v1592_v9 }
 0x7c2   : > { %v3904_v52 = vpop.eup %3903 }
 0x7c3   : > { %v3906_v7 = vpop.eup %3905  ;;  %v1595_v56 = vmul.f32 %v3904_v52, %v1571_v15  ;;  %v1616_v15 = vsel %vm846_vm6, %v1614_v34, %v1615_v57 }
 0x7c4   : > { %v1596_v0 = vmul.f32 %v3906_v7, %v1572_v14 }
 0x7c5   : > { %v1599_v53 = vmul.f32 %v1597_v1, %v1595_v56 }
 0x7c6   : > { %v1600_v13 = vmul.f32 %v1597_v1, %v1596_v0  ;;  %v641_v0 = vld [vmem:[%s620_s29] sm:$0xff]  ;;  %s635_s29 = scalar_lea.vmem %s5430_s19, %s4075_s20 }
 0x7c7   : > { %v1606_v19 = vadd.f32 %v1604_v51, %v1599_v53 }
 0x7c8   : > { %v1607_v28 = vadd.f32 %v1604_v51, %v1600_v13 }
 0x7c9   : > { %v1608_v32 = vpack.c.bf16 %v1606_v19, %v1606_v19 }
 0x7ca   : > { %v1609_v55 = vpack.c.bf16 %v1607_v28, %v1607_v28 }
 0x7cb   : > { %v1622_v63 = vsel %vm839_vm5, %v1608_v32, 0 }
 0x7cc   : > { %3771 = vmatprep.subr.msk.bf16.mxu0 %vm839_vm5, %v1609_v55 }
 0x7cd   : > { %1628 = vmatpush1.bf16.msra.mxu0 %v1622_v63 }
 0x7d0   : > { %3772 = vmatmul.mubr.msk.bf16.vlgmr.msra.gmra.mrb[12].mxu0 %vm1188_vm15, %v654_v59 }
 0x7d1   : > { %1941 = vmatprep.mubr.bf16.mxu0 %v5462_v2 }
 0x8a3   : > { %v1661_v14 = vpop.f32.mrb[12].mxu0 }
 0x8a4   : > { %v1662_v60 = vadd.f32 %v1661_v14, %v1616_v15  ;;  %v1663_v48 = vpop.f32.mrb[13].mxu0 }
 0x8a5   : > { %v1664_v62 = vadd.f32 %v1663_v48, %v1616_v15  ;;  %v1665_v45 = vpop.f32.mrb[14].mxu0 }
 0x8a6   : > { %v1670_v42 = vrot.slane %v1662_v60, 4  ;;  %v1666_v31 = vpop.f32.mrb[15].mxu0 }
 0x8a7   : > { %v1671_v41 = vrot.slane %v1664_v62, 4 }
 0x8a8   : > { %v1674_v24 = vmul.f32 %v1670_v42, %v1662_v60 }
 0x8a9   : > { %v1675_v25 = vmul.f32 %v1671_v41, %v1664_v62 }
 0x8aa   : > { %v1676_v4 = vpack.c.bf16 %v1674_v24, %v1674_v24 }
 0x8ab   : > { %v1677_v47 = vpack.c.bf16 %v1675_v25, %v1675_v25 }
 0x8ac   : > { %v1683_v5 = vsel %vm839_vm5, %v1676_v4, 0 }
 0x8ad   : > { %3773 = vmatprep.subr.msk.bf16.mxu1 %vm839_vm5, %v1677_v47 }
 0x8ae   : > { %1689 = vmatpush1.bf16.msra.mxu1 %v1683_v5 }
 0x8b1   : > { %3774 = vmatmul.mubr.msk.bf16.vlgmr.msra.gmra.mrb[8].mxu1 %vm1188_vm15, %v655_v30 }
 0x8b2   : > { %2133 = vmatprep.mubr.bf16.mxu1 %v5462_v2 }
 0x984   : > { %v1722_v61 = vpop.f32.mrb[8].mxu1 }
 0x985   : > { %v1723_v50 = vadd.f32 %v1722_v61, %v1615_v57  ;;  %v1724_v35 = vpop.f32.mrb[9].mxu1 }
 0x986   : > { %v1725_v8 = vadd.f32 %v1724_v35, %v1615_v57  ;;  %v1726_v40 = vpop.f32.mrb[10].mxu1 }
 0x987   : > { %v1731_v9 = vmul.f32 %v1729_v33, %v1723_v50  ;;  %v1727_v52 = vpop.f32.mrb[11].mxu1 }
 0x988   : > { %v1732_v7 = vmul.f32 %v1729_v33, %v1725_v8 }
 0x989   : > { %v1733_v1 = vadd.f32 %v1731_v9, %v4562_v58 }
 0x98a   : > { %v1734_v56 = vadd.f32 %v1732_v7, %v4565_v11  ;;  %v1740_v11 = vld [vmem:[%s5423_s12] sm:$0xff] }
 0x98c   : > { %v1737_v53 = vcombine.low %v1733_v1, %v1734_v56 }
 0x98e   : > { %v4601_v3 = vadd.f32 %v1737_v53, %v641_v0 }
 0x990   : > { %3643 = vst [vmem:[%s630_s0] sm:$0xff] %v4601_v3  ;;  %1798 = vrot.lane.b32.xlu1 %v4601_v3, %s5494_s26  ;;  %1766 = vrot.lane.b32.xlu0 %v4601_v3, %s5496_s24  ;;  %v4610_v58 = vcombine.high %v4601_v3, %v4601_v3 }
 0x994   : > { %1776 = vrot.lane.b32.xlu0 %v4601_v3, %s5491_s30  ;;  %1778 = vrot.lane.b32.xlu1 %v4610_v58, %s5491_s30 }
 0x998   : > { %1756 = vrot.lane.b32.xlu0 %v4601_v3, %s5497_s25  ;;  %1808 = vrot.lane.b32.xlu1 %v4601_v3, %s5486_s1 }
 0x99c   : > { %1786 = vrot.lane.b32.xlu0 %v4601_v3, %s5492_s23  ;;  %1818 = vrot.lane.b32.xlu1 %v4601_v3, %s5493_s3 }
 0x9a0   : > { %1828 = vrot.lane.b32.xlu1 %v4601_v3, %s5487_s22  ;;  %1768 = vrot.lane.b32.xlu0 %v4610_v58, %s5496_s24 }
 0x9a4   : > { %1897 = vperm.xlu1 %3873, %v1740_v11   ;;  %1758 = vrot.lane.b32.xlu0 %v4610_v58, %s5497_s25 }
 0x9a8   : > { %1788 = vrot.lane.b32.xlu0 %v4610_v58, %s5492_s23 }
 0x9ac   : > { %1800 = vrot.lane.b32.xlu0 %v4610_v58, %s5494_s26 }
 0x9b0   : > { %1810 = vrot.lane.b32.xlu0 %v4610_v58, %s5486_s1 }
 0x9b4   : > { %1820 = vrot.lane.b32.xlu0 %v4610_v58, %s5493_s3 }
 0x9b8   : > { %1830 = vrot.lane.b32.xlu0 %v4610_v58, %s5487_s22 }
 0xa02   : > { %v1767_v51 = vpop.permute.xlu0 %1766  ;;  %v1799_v28 = vpop.permute.xlu1 %1798 }
 0xa06   : > { %v1777_v13 = vpop.permute.xlu0 %1776  ;;  %v1779_v55 = vpop.permute.xlu1 %1778 }
 0xa07   : > { %v1780_v57 = vsel %vm703_vm0, %v1777_v13, %v1779_v55  ;;  %v1781_v34 = vsel %vm703_vm0, %v1779_v55, %v1777_v13 }
 0xa08   : > { %v1782_v48 = vmul.f32 %v1781_v34, %v4153_v18  ;;  %v1783_v62 = vmul.f32 %v1780_v57, %v4149_v16 }
 0xa0a   : > { %v1757_v19 = vpop.permute.xlu0 %1756  ;;  %v1784_v30 = vpack.c.bf16 %v1782_v48, %v1782_v48  ;;  %v1785_v61 = vpack.c.bf16 %v1783_v62, %v1783_v62  ;;  %v1809_v52 = vpop.permute.xlu1 %1808 }
 0xa0c   : > { %v1844_v11 = vrot.slane %v1784_v30, 4 }
 0xa0e   : > { %v1787_v32 = vpop.permute.xlu0 %1786 }
 0xa12   : > { %v1769_v63 = vpop.permute.xlu0 %1768 }
 0xa13   : > { %v1770_v59 = vsel %vm684_vm2, %v1767_v51, %v1769_v63  ;;  %v1771_v29 = vsel %vm684_vm2, %v1769_v63, %v1767_v51  ;;  %v1845_v51 = vrot.slane %v1785_v61, 4 }
 0xa14   : > { %v1772_v15 = vmul.f32 %v1771_v29, %v4165_v22  ;;  %v1773_v14 = vmul.f32 %v1770_v59, %v4168_v23 }
 0xa16   : > { %v1759_v60 = vpop.permute.xlu0 %1758  ;;  %v1774_v31 = vpack.c.bf16 %v1772_v15, %v1772_v15  ;;  %v1775_v41 = vpack.c.bf16 %v1773_v14, %v1773_v14 }
 0xa17   : > { %v1760_v45 = vsel %vm665_vm1, %v1757_v19, %v1759_v60  ;;  %v1761_v42 = vsel %vm665_vm1, %v1759_v60, %v1757_v19 }
 0xa18   : > { %v1762_v24 = vmul.f32 %v1761_v42, %v4158_v20  ;;  %v1763_v25 = vmul.f32 %v1760_v45, %v4162_v21  ;;  %v1840_v35 = vrot.slane %v1774_v31, 6  ;;  %v1841_v8 = vrot.slane %v1775_v41, 6  ;;  %v1819_v45 = vpop.permute.xlu1 %1818 }
 0xa1a   : > { %v1764_v4 = vpack.c.bf16 %v1762_v24, %v1762_v24  ;;  %v1765_v47 = vpack.c.bf16 %v1763_v25, %v1763_v25  ;;  %v1789_v5 = vpop.permute.xlu0 %1788 }
 0xa1b   : > { %v1790_v50 = vsel %vm722_vm3, %v1787_v32, %v1789_v5  ;;  %v1791_v33 = vsel %vm722_vm3, %v1789_v5, %v1787_v32 }
 0xa1c   : > { %v1792_v40 = vmul.f32 %v1791_v33, %v4175_v26  ;;  %v1793_v9 = vmul.f32 %v1790_v50, %v4178_v27  ;;  %v1867_v0 = vsel %vm839_vm5, %v1765_v47, %v1841_v8  ;;  %v1864_v53 = vsel %vm839_vm5, %v1764_v4, %v1840_v35 }
 0xa1d   : > { %v1871_v29 = vsel %vm846_vm6, %v1867_v0, %v1845_v51  ;;  %v1869_v57 = vsel %vm846_vm6, %v1864_v53, %v1844_v11  ;;  %v1797_v8 = vpack.c.bf16 %v4610_v58, %v4610_v58 }
 0xa1e   : > { %v1794_v7 = vpack.c.bf16 %v1792_v40, %v1792_v40  ;;  %v1795_v1 = vpack.c.bf16 %v1793_v9, %v1793_v9  ;;  %v1801_v56 = vpop.permute.xlu0 %1800  ;;  %v1796_v40 = vpack.c.bf16 %v4601_v3, %v4601_v3  ;;  %v1829_v9 = vpop.permute.xlu1 %1828  ;;  %v4710_v3 = vld [vmem:[%s5482_s27 + $0x10] ss:$0 sm:$0xff] }
 0xa1f   : > { %v1802_v13 = vsel %vm743_vm4, %v1799_v28, %v1801_v56  ;;  %v1803_v19 = vsel %vm743_vm4, %v1801_v56, %v1799_v28 }
 0xa20   : > { %v1848_v32 = vrot.slane %v1794_v7, 2  ;;  %v1849_v55 = vrot.slane %v1795_v1, 2  ;;  %v1804_v63 = vmul.f32 %v1802_v13, %v4193_v37  ;;  %v1805_v59 = vmul.f32 %v1803_v19, %v4196_v38  ;;  %v4716_v19 = vld [vmem:[%s5482_s27 + $0x18] ss:$0 sm:$0xff] }
 0xa22   : > { %v1811_v34 = vpop.permute.xlu0 %1810  ;;  %v4678_v15 = vsel %vm851_vm8, %v1871_v29, %v1849_v55  ;;  %v4681_v14 = vsel %vm851_vm8, %v1869_v57, %v1848_v32  ;;  %v1806_v60 = vpack.c.bf16 %v1804_v63, %v1804_v63  ;;  %v1807_v48 = vpack.c.bf16 %v1805_v59, %v1805_v59 }
 0xa23   : > { %v1812_v28 = vsel %vm762_vm7, %v1809_v52, %v1811_v34  ;;  %v1813_v62 = vsel %vm762_vm7, %v1811_v34, %v1809_v52  ;;  %1909 = vmatprep.subr.bf16.mxu0 %v4678_v15 }
 0xa24   : > { %v1814_v42 = vmul.f32 %v1812_v28, %v4204_v46  ;;  %v1815_v31 = vmul.f32 %v1813_v62, %v4213_v54  ;;  %1910 = vmatpush1.bf16.msra.mxu0 %v4681_v14  ;;  %v1852_v4 = vrot.slane %v1806_v60, 6  ;;  %v1853_v47 = vrot.slane %v1807_v48, 6  ;;  %v1894_v48 = vld [vmem:[%s5498_s8] sm:$0xf]  ;;  %v1898_v28 = vpop.permute.xlu1 %1897 }
 0xa26   : > { %v1816_v41 = vpack.c.bf16 %v1814_v42, %v1814_v42  ;;  %v1817_v24 = vpack.c.bf16 %v1815_v31, %v1815_v31  ;;  %v1821_v25 = vpop.permute.xlu0 %1820  ;;  %v1883_v53 = vsel %vm839_vm5, %v1797_v8, %v1853_v47  ;;  %v1880_v11 = vsel %vm839_vm5, %v1796_v40, %v1852_v4 }
 0xa27   : > { %v1822_v5 = vsel %vm781_vm9, %v1819_v45, %v1821_v25  ;;  %v1823_v30 = vsel %vm781_vm9, %v1821_v25, %v1819_v45  ;;  %v5499_v8 = vmov 6   ;;  %v5500_v40 = vmov 7  }
 0xa28   : > { %v1824_v61 = vmul.f32 %v1822_v5, %v4236_v36  ;;  %v1825_v50 = vmul.f32 %v1823_v30, %v4239_v39  ;;  %v1856_v33 = vrot.slane %v1816_v41, 4  ;;  %v1857_v35 = vrot.slane %v1817_v24, 4  ;;  %v1741_v30 = vld [vmem:[%s5423_s12 + $0x8] sm:$0xff] }
 0xa2a   : > { %v1826_v52 = vpack.c.bf16 %v1824_v61, %v1824_v61  ;;  %v1827_v7 = vpack.c.bf16 %v1825_v50, %v1825_v50  ;;  %v1831_v1 = vpop.permute.xlu0 %1830  ;;  %v1887_v55 = vsel %vm846_vm6, %v1883_v53, %v1857_v35  ;;  %v1885_v63 = vsel %vm846_vm6, %v1880_v11, %v1856_v33  ;;  %v1742_v61 = vld [vmem:[%s5423_s12 + $0x10] sm:$0xff]  ;;  %v1743_v50 = vld [vmem:[%s5423_s12 + $0x18] sm:$0xff]  ;;  %v4790_v33 = vld [vmem:[%s5421_s10] sm:$0xff] }
 0xa2b   : > { %v1832_v56 = vsel %vm800_vm10, %v1829_v9, %v1831_v1  ;;  %v1833_v0 = vsel %vm800_vm10, %v1831_v1, %v1829_v9  ;;  %v4801_v35 = vld [vmem:[%s5423_s12 + $0x20] sm:$0xff]  ;;  %v5501_v9 = vmov 8  }
 0xa2c   : > { %v1860_v51 = vrot.slane %v1826_v52, 2  ;;  %v1861_v13 = vrot.slane %v1827_v7, 2  ;;  %v1834_v58 = vmul.f32 %v4710_v3, %v1832_v56  ;;  %v1835_v32 = vmul.f32 %v4716_v19, %v1833_v0 }
 0xa2e   : > { %v4721_v59 = vpack.c.bf16 %v1835_v32, %v1835_v32  ;;  %v4724_v29 = vsel %vm851_vm8, %v1887_v55, %v1861_v13  ;;  %v4727_v57 = vsel %vm851_vm8, %v1885_v63, %v1860_v51  ;;  %v1836_v34 = vpack.c.bf16 %v1834_v58, %v1834_v58 }
 0xa2f   : > { %1911 = vmatprep.subr.bf16.mxu0 %v4724_v29 }
 0xa30   : > { %1912 = vmatpush1.bf16.msra.mxu0 %v4727_v57  ;;  %v4734_v60 = vsel %vm839_vm5, %v1836_v34, 0 }
 0xa31   : > { %3775 = vmatprep.subr.msk.bf16.mxu0 %vm839_vm5, %v4721_v59 }
 0xa34   : > { %1914 = vmatpush1.bf16.msra.mxu0 %v4734_v60 }
 0xa37   : > { %3776 = vmatmul.mubr.msk.bf16.vlgmr.msra.gmra.mrb[16].mxu0 %vm880_vm11, %v1894_v48 }
 0xa38   : > { %2246 = vmatprep.mubr.bf16.mxu0 %v5462_v2 }
 0xb0a   : > { %v1943_v62 = vpop.f32.mrb[16].mxu0 }
 0xb0b   : > { %v1944_v45 = vadd.f32 %v1943_v62, %v1898_v28  ;;  %v1945_v42 = vpop.f32.mrb[17].mxu0 }
 0xb0c   : > { %v1946_v31 = vadd.f32 %v1945_v42, %v1898_v28  ;;  %v1947_v41 = vpop.f32.mrb[18].mxu0 }
 0xb0d   : > { %vm1950_vm8 = vcmp.ge.f32.partialorder %v1944_v45, 0.0  ;;  %v1952_v24 = vmul.f32 0.2, %v1944_v45  ;;  %v1948_v25 = vpop.f32.mrb[19].mxu0 }
 0xb0e   : > { %vm1951_vm13 = vcmp.ge.f32.partialorder %v1946_v31, 0.0  ;;  %v1953_v4 = vmul.f32 0.2, %v1946_v31 }
 0xb0f   : > { %v4742_v47 = vsel %vm1950_vm8, %v1944_v45, %v1952_v24 }
 0xb10   : > { %v4744_v5 = vsel %vm1951_vm13, %v1946_v31, %v1953_v4  ;;  %1966 = vrot.lane.b32.xlu0 %v4742_v47, %s5496_s24 }
 0xb11   : > { %1968 = vrot.lane.b32.xlu1 %v4744_v5, %s5496_s24 }
 0xb14   : > { %1956 = vrot.lane.b32.xlu0 %v4742_v47, %s5497_s25 }
 0xb15   : > { %1958 = vrot.lane.b32.xlu1 %v4744_v5, %s5497_s25 }
 0xb18   : > { %1986 = vrot.lane.b32.xlu0 %v4742_v47, %s5492_s23 }
 0xb19   : > { %1988 = vrot.lane.b32.xlu1 %v4744_v5, %s5492_s23 }
 0xb1c   : > { %1976 = vrot.lane.b32.xlu0 %v4742_v47, %s5491_s30 }
 0xb1d   : > { %1978 = vrot.lane.b32.xlu1 %v4744_v5, %s5491_s30 }
 0xb20   : > { %1998 = vrot.lane.b32.xlu0 %v4742_v47, %s5494_s26 }
 0xb21   : > { %2000 = vrot.lane.b32.xlu1 %v4744_v5, %s5494_s26 }
 0xb24   : > { %2018 = vrot.lane.b32.xlu0 %v4742_v47, %s5493_s3 }
 0xb25   : > { %2020 = vrot.lane.b32.xlu1 %v4744_v5, %s5493_s3 }
 0xb28   : > { %2008 = vrot.lane.b32.xlu0 %v4742_v47, %s5486_s1 }
 0xb29   : > { %2010 = vrot.lane.b32.xlu1 %v4744_v5, %s5486_s1 }
 0xb2c   : > { %2028 = vrot.lane.b32.xlu0 %v4742_v47, %s5487_s22 }
 0xb2d   : > { %2030 = vrot.lane.b32.xlu1 %v4744_v5, %s5487_s22 }
 0xb30   : > { %2089 = vperm.xlu0 %3874, %v1741_v30  }
 0xb31   : > { %2190 = vperm.xlu1 %3873, %v1742_v61  }
 0xb34   : > { %2199 = vperm.xlu0 %3874, %v1743_v50  }
 0xb35   : > { %3875 = vset.pattern.permute.xlu1 %v5461_v43 }
 0xb36   : > { %2258 = vperm.xlu1 %3875, %v4790_v33  }
 0xb38   : > { %2272 = vperm.xlu0 %3874, %v4790_v33  }
 0xb3a   : > { %3876 = vset.pattern.permute.xlu1 %v5460_v44 }
 0xb3b   : > { %2288 = vperm.xlu1 %3876, %v4790_v33  }
 0xb3c   : > { %3877 = vset.pattern.permute.xlu0 %v5459_v49 }
 0xb3d   : > { %2304 = vperm.xlu0 %3877, %v4790_v33  }
 0xb3f   : > { %3883 = vset.pattern.permute.xlu1 %v5462_v2 }
 0xb40   : > { %2393 = vperm.xlu1 %3883, %v4801_v35  }
 0xb41   : > { %3878 = vset.pattern.permute.xlu0 %v5458_v12 }
 0xb42   : > { %2320 = vperm.xlu0 %3878, %v4790_v33  }
 0xb46   : > { %3879 = vset.pattern.permute.xlu0 %v5457_v10 }
 0xb47   : > { %2336 = vperm.xlu0 %3879, %v4790_v33  }
 0xb4b   : > { %3880 = vset.pattern.permute.xlu0 %v5499_v8 }
 0xb4c   : > { %2352 = vperm.xlu0 %3880, %v4790_v33  }
 0xb50   : > { %3881 = vset.pattern.permute.xlu0 %v5500_v40 }
 0xb51   : > { %2368 = vperm.xlu0 %3881, %v4790_v33  }
 0xb55   : > { %3882 = vset.pattern.permute.xlu0 %v5501_v9 }
 0xb82   : > { %v1967_v52 = vpop.permute.xlu0 %1966 }
 0xb83   : > { %v1969_v7 = vpop.permute.xlu1 %1968 }
 0xb84   : > { %v1970_v1 = vsel %vm684_vm2, %v1967_v52, %v1969_v7  ;;  %v1971_v56 = vsel %vm684_vm2, %v1969_v7, %v1967_v52 }
 0xb85   : > { %v1972_v0 = vmul.f32 %v1971_v56, %v4165_v22  ;;  %v1973_v53 = vmul.f32 %v1970_v1, %v4168_v23 }
 0xb86   : > { %v1957_v11 = vpop.permute.xlu0 %1956 }
 0xb87   : > { %v1974_v51 = vpack.c.bf16 %v1972_v0, %v1972_v0  ;;  %v1975_v13 = vpack.c.bf16 %v1973_v53, %v1973_v53  ;;  %v1959_v58 = vpop.permute.xlu1 %1958 }
 0xb88   : > { %v1960_v32 = vsel %vm665_vm1, %v1957_v11, %v1959_v58  ;;  %v1961_v55 = vsel %vm665_vm1, %v1959_v58, %v1957_v11 }
 0xb89   : > { %v1962_v63 = vmul.f32 %v1961_v55, %v4158_v20  ;;  %v1963_v34 = vmul.f32 %v1960_v32, %v4162_v21  ;;  %v2040_v28 = vrot.slane %v1974_v51, 4  ;;  %v2041_v62 = vrot.slane %v1975_v13, 4 }
 0xb8a   : > { %v1987_v48 = vpop.permute.xlu0 %1986 }
 0xb8b   : > { %v1964_v45 = vpack.c.bf16 %v1962_v63, %v1962_v63  ;;  %v1965_v42 = vpack.c.bf16 %v1963_v34, %v1963_v34  ;;  %v1989_v31 = vpop.permute.xlu1 %1988 }
 0xb8c   : > { %v1990_v41 = vsel %vm722_vm3, %v1987_v48, %v1989_v31  ;;  %v1991_v24 = vsel %vm722_vm3, %v1989_v31, %v1987_v48 }
 0xb8d   : > { %v1992_v25 = vmul.f32 %v1991_v24, %v4175_v26  ;;  %v1993_v4 = vmul.f32 %v1990_v41, %v4178_v27  ;;  %v2060_v30 = vsel %vm846_vm6, %v1965_v42, %v2041_v62  ;;  %v2056_v61 = vsel %vm846_vm6, %v1964_v45, %v2040_v28 }
 0xb8e   : > { %2101 = vmatprep.subr.bf16.mxu1 %v2060_v30  ;;  %v1977_v50 = vpop.permute.xlu0 %1976 }
 0xb8f   : > { %v1994_v52 = vpack.c.bf16 %v1992_v25, %v1992_v25  ;;  %v1995_v7 = vpack.c.bf16 %v1993_v4, %v1993_v4  ;;  %v1979_v1 = vpop.permute.xlu1 %1978  ;;  %2102 = vmatpush1.bf16.msra.mxu1 %v2056_v61  ;;  %v1997_v61 = vpack.c.bf16 %v4744_v5, %v4744_v5 }
 0xb90   : > { %v1980_v56 = vsel %vm703_vm0, %v1977_v50, %v1979_v1  ;;  %v1981_v0 = vsel %vm703_vm0, %v1979_v1, %v1977_v50  ;;  %v1996_v50 = vpack.c.bf16 %v4742_v47, %v4742_v47 }
 0xb91   : > { %v1982_v53 = vmul.f32 %v1981_v0, %v4153_v18  ;;  %v1983_v11 = vmul.f32 %v1980_v56, %v4149_v16  ;;  %v2044_v13 = vrot.slane %v1994_v52, 4  ;;  %v2045_v58 = vrot.slane %v1995_v7, 4 }
 0xb92   : > { %v1999_v51 = vpop.permute.xlu0 %1998 }
 0xb93   : > { %v1984_v32 = vpack.c.bf16 %v1982_v53, %v1982_v53  ;;  %v1985_v55 = vpack.c.bf16 %v1983_v11, %v1983_v11  ;;  %v2001_v63 = vpop.permute.xlu1 %2000 }
 0xb94   : > { %v2002_v34 = vsel %vm743_vm4, %v1999_v51, %v2001_v63  ;;  %v2003_v48 = vsel %vm743_vm4, %v2001_v63, %v1999_v51 }
 0xb95   : > { %v2004_v28 = vmul.f32 %v2002_v34, %v4193_v37  ;;  %v2005_v62 = vmul.f32 %v2003_v48, %v4196_v38  ;;  %v2068_v45 = vsel %vm846_vm6, %v1985_v55, %v2045_v58  ;;  %v2064_v42 = vsel %vm846_vm6, %v1984_v32, %v2044_v13 }
 0xb96   : > { %2103 = vmatprep.subr.bf16.mxu1 %v2068_v45  ;;  %v2019_v31 = vpop.permute.xlu0 %2018 }
 0xb97   : > { %v2006_v41 = vpack.c.bf16 %v2004_v28, %v2004_v28  ;;  %v2007_v24 = vpack.c.bf16 %v2005_v62, %v2005_v62  ;;  %v2021_v25 = vpop.permute.xlu1 %2020  ;;  %2104 = vmatpush1.bf16.msra.mxu1 %v2064_v42 }
 0xb98   : > { %v2022_v4 = vsel %vm781_vm9, %v2019_v31, %v2021_v25  ;;  %v2023_v30 = vsel %vm781_vm9, %v2021_v25, %v2019_v31 }
 0xb99   : > { %v2048_v52 = vrot.slane %v2006_v41, 4  ;;  %v2049_v7 = vrot.slane %v2007_v24, 4  ;;  %v2024_v1 = vmul.f32 %v2022_v4, %v4236_v36  ;;  %v2025_v56 = vmul.f32 %v2023_v30, %v4239_v39 }
 0xb9a   : > { %v2009_v0 = vpop.permute.xlu0 %2008 }
 0xb9b   : > { %v2026_v53 = vpack.c.bf16 %v2024_v1, %v2024_v1  ;;  %v2027_v11 = vpack.c.bf16 %v2025_v56, %v2025_v56  ;;  %v2011_v51 = vpop.permute.xlu1 %2010  ;;  %v2076_v13 = vsel %vm846_vm6, %v1997_v61, %v2049_v7  ;;  %v2072_v58 = vsel %vm846_vm6, %v1996_v50, %v2048_v52  ;;  %v2086_v52 = vld [vmem:[%s5502_s9] sm:$0x3] }
 0xb9c   : > { %v2012_v5 = vsel %vm762_vm7, %v2009_v0, %v2011_v51  ;;  %v2013_v47 = vsel %vm762_vm7, %v2011_v51, %v2009_v0  ;;  %2105 = vmatprep.subr.bf16.mxu1 %v2076_v13 }
 0xb9d   : > { %v2014_v32 = vmul.f32 %v2012_v5, %v4204_v46  ;;  %v2015_v55 = vmul.f32 %v2013_v47, %v4213_v54  ;;  %2106 = vmatpush1.bf16.msra.mxu1 %v2072_v58  ;;  %v2052_v34 = vrot.slane %v2026_v53, 4  ;;  %v2053_v48 = vrot.slane %v2027_v11, 4 }
 0xb9e   : > { %v2029_v63 = vpop.permute.xlu0 %2028 }
 0xb9f   : > { %v2016_v28 = vpack.c.bf16 %v2014_v32, %v2014_v32  ;;  %v2017_v62 = vpack.c.bf16 %v2015_v55, %v2015_v55  ;;  %v2031_v45 = vpop.permute.xlu1 %2030 }
 0xba0   : > { %v2032_v42 = vsel %vm800_vm10, %v2029_v63, %v2031_v45  ;;  %v2033_v31 = vsel %vm800_vm10, %v2031_v45, %v2029_v63 }
 0xba1   : > { %v2034_v41 = vmul.f32 %v4710_v3, %v2032_v42  ;;  %v2035_v24 = vmul.f32 %v4716_v19, %v2033_v31  ;;  %v2084_v25 = vsel %vm846_vm6, %v2017_v62, %v2053_v48  ;;  %v2080_v4 = vsel %vm846_vm6, %v2016_v28, %v2052_v34 }
 0xba2   : > { %2107 = vmatprep.subr.bf16.mxu1 %v2084_v25 }
 0xba3   : > { %v2036_v30 = vpack.c.bf16 %v2034_v41, %v2034_v41  ;;  %v2037_v61 = vpack.c.bf16 %v2035_v24, %v2035_v24  ;;  %2108 = vmatpush1.bf16.msra.mxu1 %v2080_v4 }
 0xba5   : > { %3777 = vmatprep.subr.msk.bf16.mxu1 %vm846_vm6, %v2037_v61  ;;  %v2096_v50 = vsel %vm846_vm6, %v2036_v30, 0 }
 0xba7   : > { %2110 = vmatpush1.bf16.msra.mxu1 %v2096_v50 }
 0xbaa   : > { %3778 = vmatmul.mubr.msk.bf16.vlgmr.msra.gmra.mrb[12].mxu1 %vm1073_vm14, %v2086_v52 }
 0xbab   : > { %2674 = vmatprep.mubr.bf16.mxu1 %v5462_v2 }
 0xbaf   : > { %v2090_v7 = vpop.permute.xlu0 %2089 }
 0xc7d   : > { %v2135_v1 = vpop.f32.mrb[12].mxu1 }
 0xc7e   : > { %v4882_v56 = vadd.f32 %v2135_v1, %v2090_v7  ;;  %v2137_v0 = vpop.f32.mrb[13].mxu1 }
 0xc7f   : > { %v4884_v53 = vadd.f32 %v2137_v0, %v2090_v7  ;;  %v2139_v11 = vpop.f32.mrb[14].mxu1 }
 0xc80   : > { %v2142_v51 = vsel %vm846_vm6, %v4882_v56, 0.0  ;;  %v2140_v13 = vpop.f32.mrb[15].mxu1 }
 0xc81   : > { %v2143_v58 = vrot.slane %v2142_v51, 4  ;;  %v2149_v5 = vsel %vm846_vm6, %v4884_v53, 0.0 }
 0xc82   : > { %v2150_v47 = vrot.slane %v2149_v5, 4 }
 0xc83   : > { %v2144_v32 = vadd.f32 %v2143_v58, %v2142_v51 }
 0xc84   : > { %v2151_v55 = vadd.f32 %v2150_v47, %v2149_v5 }
 0xc85   : > { %v2145_v63 = vrot.slane %v2144_v32, 2 }
 0xc86   : > { %v2152_v34 = vrot.slane %v2151_v55, 2 }
 0xc87   : > { %v2146_v48 = vadd.f32 %v2145_v63, %v2144_v32 }
 0xc88   : > { %v2153_v28 = vadd.f32 %v2152_v34, %v2151_v55 }
 0xc89   : > { %v2147_v62 = vrot.slane %v2146_v48, 1 }
 0xc8a   : > { %v2154_v45 = vrot.slane %v2153_v28, 1 }
 0xc8b   : > { %v2148_v42 = vadd.f32 %v2147_v62, %v2146_v48 }
 0xc8c   : > { %v2155_v31 = vadd.f32 %v2154_v45, %v2153_v28 }
 0xc8d   : > { %v2156_v41 = vmul.f32 0.25, %v2148_v42 }
 0xc8e   : > { %v2157_v24 = vmul.f32 0.25, %v2155_v31 }
 0xc8f   : > { %v2158_v25 = vsub.f32 %v4882_v56, %v2156_v41  ;;  %v2184_v41 = vrot.slane %v2090_v7, 4  ;;  %v4903_v7 = vpop.permute.xlu0 %2199 }
 0xc90   : > { %v2159_v4 = vsub.f32 %v4884_v53, %v2157_v24 }
 0xc91   : > { %v2160_v30 = vmul.f32 %v2158_v25, %v2158_v25 }
 0xc92   : > { %v2161_v61 = vmul.f32 %v2159_v4, %v2159_v4 }
 0xc93   : > { %v2162_v50 = vsel %vm846_vm6, %v2160_v30, 0.0 }
 0xc94   : > { %v2163_v52 = vrot.slane %v2162_v50, 4  ;;  %v2169_v1 = vsel %vm846_vm6, %v2161_v61, 0.0 }
 0xc95   : > { %v2170_v0 = vrot.slane %v2169_v1, 4 }
 0xc96   : > { %v2164_v11 = vadd.f32 %v2163_v52, %v2162_v50  ;;  %v2191_v50 = vpop.permute.xlu1 %2190 }
 0xc97   : > { %v2171_v51 = vadd.f32 %v2170_v0, %v2169_v1 }
 0xc98   : > { %v2165_v13 = vrot.slane %v2164_v11, 2 }
 0xc99   : > { %v2172_v58 = vrot.slane %v2171_v51, 2 }
 0xc9a   : > { %v2166_v5 = vadd.f32 %v2165_v13, %v2164_v11 }
 0xc9b   : > { %v2173_v47 = vadd.f32 %v2172_v58, %v2171_v51  ;;  %v1749_v58 = vld [vmem:[%s5422_s11] sm:$0xf] }
 0xc9c   : > { %v2167_v32 = vrot.slane %v2166_v5, 1 }
 0xc9d   : > { %v2174_v55 = vrot.slane %v2173_v47, 1 }
 0xc9e   : > { %v2168_v63 = vadd.f32 %v2167_v32, %v2166_v5 }
 0xc9f   : > { %v2175_v34 = vadd.f32 %v2174_v55, %v2173_v47 }
 0xca0   : > { %v2176_v48 = vmul.f32 0.25, %v2168_v63 }
 0xca1   : > { %v2177_v28 = vmul.f32 0.25, %v2175_v34 }
 0xca2   : > { %v2178_v62 = vadd.f32 1e-06, %v2176_v48 }
 0xca3   : > { %v2179_v45 = vadd.f32 1e-06, %v2177_v28 }
 0xca4   : > { %3907 = vrsqrt.f32 %v2178_v62  ;;  %v2273_v62 = vpop.permute.xlu0 %2272 }
 0xca5   : > { %3909 = vrsqrt.f32 %v2179_v45 }
 0xcae   : > { %v3908_v42 = vpop.eup %3907 }
 0xcaf   : > { %v3910_v31 = vpop.eup %3909  ;;  %v2182_v24 = vmul.f32 %v3908_v42, %v2158_v25  ;;  %v5464_v25 = vrot.slane %v4903_v7, 4  ;;  %v2305_v42 = vpop.permute.xlu0 %2304 }
 0xcb0   : > { %v2183_v30 = vmul.f32 %v3910_v31, %v2159_v4  ;;  %v2201_v4 = vrot.slane %v2191_v50, 4 }
 0xcb1   : > { %v2186_v61 = vmul.f32 %v2184_v41, %v2182_v24 }
 0xcb2   : > { %v2187_v52 = vmul.f32 %v2184_v41, %v2183_v30  ;;  %v2203_v5 = vsel %vm846_vm6, %v2201_v4, %v5464_v25 }
 0xcb3   : > { %v2193_v1 = vadd.f32 %v2191_v50, %v2186_v61  ;;  %v2321_v41 = vpop.permute.xlu0 %2320 }
 0xcb4   : > { %v2194_v0 = vadd.f32 %v2191_v50, %v2187_v52 }
 0xcb5   : > { %v2195_v11 = vpack.c.bf16 %v2193_v1, %v2193_v1 }
 0xcb6   : > { %v2196_v51 = vpack.c.bf16 %v2194_v0, %v2194_v0 }
 0xcb7   : > { %v2209_v13 = vsel %vm839_vm5, %v2195_v11, 0  ;;  %v2337_v61 = vpop.permute.xlu0 %2336 }
 0xcb8   : > { %3779 = vmatprep.subr.msk.bf16.mxu0 %vm839_vm5, %v2196_v51 }
 0xcb9   : > { %2215 = vmatpush1.bf16.msra.mxu0 %v2209_v13 }
 0xcba   : > { %3826 = vmatprep.subr.mxu0 %v5455_v17 }
 0xcbb   : > { %v4929_v52 = vpop.permute.xlu0 %2352 }
 0xcbc   : > { %3780 = vmatmul.mubr.msk.bf16.vlgmr.msra.gmra.mrb[20].mxu0 %vm1188_vm15, %v1749_v58 }
 0xcbd   : > { %3828 = vmatprep.mubr.msk.f32.mxu0 %vm3966_vm12, %v5455_v17 }
 0xcbf   : > { %v4931_v11 = vpop.permute.xlu0 %2368 }
 0xd8f   : > { %v2248_v47 = vpop.f32.mrb[20].mxu0 }
 0xd90   : > { %v2249_v32 = vadd.f32 %v2248_v47, %v2203_v5  ;;  %v2250_v55 = vpop.f32.mrb[21].mxu0 }
 0xd91   : > { %v2252_v63 = vpop.f32.mrb[22].mxu0  ;;  %v2251_v48 = vadd.f32 %v2250_v55, %v2203_v5 }
 0xd92   : > { %v2253_v34 = vpop.f32.mrb[23].mxu0  ;;  %2279 = vrot.lane.b32.xlu1 %v2249_v32, %s5496_s24  ;;  %2263 = vrot.lane.b32.xlu0 %v2249_v32, %s5497_s25 }
 0xd96   : > { %2295 = vrot.lane.b32.xlu1 %v2249_v32, %s5491_s30  ;;  %2384 = vperm.xlu0 %3882, %v4790_v33   ;;  %v2259_v33 = vpop.permute.xlu1 %2258 }
 0xd9a   : > { %2311 = vrot.lane.b32.xlu1 %v2249_v32, %s5492_s23  ;;  %2361 = vrot.lane.b32.xlu0 %v2251_v48, %s5493_s3  ;;  %v2289_v28 = vpop.permute.xlu1 %2288 }
 0xd9b   : > { %3884 = vset.pattern.permute.xlu0 %v5462_v2 }
 0xd9e   : > { %2327 = vrot.lane.b32.xlu1 %v2249_v32, %s5494_s26  ;;  %2377 = vrot.lane.b32.xlu0 %v2251_v48, %s5487_s22  ;;  %v4927_v45 = vpop.permute.xlu1 %2393 }
 0xda2   : > { %2343 = vrot.lane.b32.xlu1 %v2249_v32, %s5486_s1 }
 0xda6   : > { %2359 = vrot.lane.b32.xlu1 %v2249_v32, %s5493_s3 }
 0xdaa   : > { %2265 = vrot.lane.b32.xlu1 %v2251_v48, %s5497_s25 }
 0xdae   : > { %2281 = vrot.lane.b32.xlu1 %v2251_v48, %s5496_s24 }
 0xdb2   : > { %2297 = vrot.lane.b32.xlu1 %v2251_v48, %s5491_s30 }
 0xdb6   : > { %2313 = vrot.lane.b32.xlu1 %v2251_v48, %s5492_s23 }
 0xdba   : > { %2329 = vrot.lane.b32.xlu1 %v2251_v48, %s5494_s26 }
 0xdbe   : > { %2345 = vrot.lane.b32.xlu1 %v2251_v48, %s5486_s1 }
 0xdc2   : > { %2375 = vrot.lane.b32.xlu1 %v2249_v32, %s5487_s22 }
 0xe04   : > { %v2280_v31 = vpop.permute.xlu1 %2279  ;;  %v2264_v13 = vpop.permute.xlu0 %2263 }
 0xe08   : > { %v2296_v24 = vpop.permute.xlu1 %2295 }
 0xe0c   : > { %v2312_v30 = vpop.permute.xlu1 %2311 }
 0xe10   : > { %v2328_v50 = vpop.permute.xlu1 %2327 }
 0xe14   : > { %v2344_v1 = vpop.permute.xlu1 %2343 }
 0xe15   : > { %v4941_v63 = vpop.permute.xlu0 %2384 }
 0xe18   : > { %v2360_v0 = vpop.permute.xlu1 %2359 }
 0xe19   : > { %v2362_v25 = vpop.permute.xlu0 %2361 }
 0xe1c   : > { %v2266_v51 = vpop.permute.xlu1 %2265 }
 0xe1d   : > { %v2267_v58 = vsel %vm665_vm1, %v2264_v13, %v2266_v51  ;;  %v2268_v4 = vsel %vm665_vm1, %v2266_v51, %v2264_v13 }
 0xe1e   : > { %v2269_v34 = vmul.f32 %v2268_v4, %v4158_v20  ;;  %v2270_v17 = vmul.f32 %v2267_v58, %v4162_v21 }
 0xe20   : > { %v2282_v5 = vpop.permute.xlu1 %2281  ;;  %v2275_v44 = vmul.f32 %v2273_v62, %v2269_v34  ;;  %v2276_v43 = vmul.f32 %v2273_v62, %v2270_v17  ;;  %v2364_v62 = vsel %vm781_vm9, %v2362_v25, %v2360_v0 }
 0xe21   : > { %v2283_v47 = vsel %vm684_vm2, %v2280_v31, %v2282_v5  ;;  %v2284_v55 = vsel %vm684_vm2, %v2282_v5, %v2280_v31  ;;  %v2262_v31 = vmul.f32 %v2259_v33, %v2251_v48  ;;  %v2261_v5 = vmul.f32 %v2259_v33, %v2249_v32 }
 0xe22   : > { %v2285_v12 = vmul.f32 %v2284_v55, %v4165_v22  ;;  %v2286_v49 = vmul.f32 %v2283_v47, %v4168_v23  ;;  %v2363_v33 = vsel %vm781_vm9, %v2360_v0, %v2362_v25  ;;  %v2366_v0 = vmul.f32 %v2364_v62, %v4239_v39 }
 0xe23   : > { %v2277_v48 = vadd.f32 %v2275_v44, %v2261_v5  ;;  %v2278_v32 = vadd.f32 %v2276_v43, %v2262_v31 }
 0xe24   : > { %v2298_v10 = vpop.permute.xlu1 %2297  ;;  %v2291_v21 = vmul.f32 %v2289_v28, %v2285_v12  ;;  %v2292_v55 = vmul.f32 %v2289_v28, %v2286_v49 }
 0xe25   : > { %v2299_v51 = vsel %vm703_vm0, %v2296_v24, %v2298_v10  ;;  %v2300_v13 = vsel %vm703_vm0, %v2298_v10, %v2296_v24 }
 0xe26   : > { %v2301_v2 = vmul.f32 %v2300_v13, %v4153_v18  ;;  %v2302_v4 = vmul.f32 %v2299_v51, %v4149_v16  ;;  %v2293_v24 = vadd.f32 %v2291_v21, %v2277_v48  ;;  %v2294_v34 = vadd.f32 %v2292_v55, %v2278_v32 }
 0xe27   : > { %v2365_v21 = vmul.f32 %v2363_v33, %v4236_v36 }
 0xe28   : > { %v2314_v58 = vpop.permute.xlu1 %2313  ;;  %v2307_v12 = vmul.f32 %v2305_v42, %v2301_v2  ;;  %v2308_v49 = vmul.f32 %v2305_v42, %v2302_v4 }
 0xe29   : > { %v2315_v47 = vsel %vm722_vm3, %v2312_v30, %v2314_v58  ;;  %v2316_v20 = vsel %vm722_vm3, %v2314_v58, %v2312_v30  ;;  %v2371_v62 = vmul.f32 %v4931_v11, %v2365_v21 }
 0xe2a   : > { %v2317_v10 = vmul.f32 %v2316_v20, %v4175_v26  ;;  %v2318_v17 = vmul.f32 %v2315_v47, %v4178_v27  ;;  %v2309_v31 = vadd.f32 %v2307_v12, %v2293_v24  ;;  %v2310_v5 = vadd.f32 %v2308_v49, %v2294_v34 }
 0xe2b   : > { %v2372_v12 = vmul.f32 %v4931_v11, %v2366_v0 }
 0xe2c   : > { %v2330_v28 = vpop.permute.xlu1 %2329  ;;  %v2323_v51 = vmul.f32 %v2321_v41, %v2317_v10  ;;  %v2324_v44 = vmul.f32 %v2321_v41, %v2318_v17  ;;  %v2378_v10 = vpop.permute.xlu0 %2377 }
 0xe2d   : > { %v2331_v30 = vsel %vm743_vm4, %v2328_v50, %v2330_v28  ;;  %v2332_v20 = vsel %vm743_vm4, %v2330_v28, %v2328_v50 }
 0xe2e   : > { %v2333_v43 = vmul.f32 %v2331_v30, %v4193_v37  ;;  %v2334_v13 = vmul.f32 %v2332_v20, %v4196_v38  ;;  %v2325_v41 = vadd.f32 %v2323_v51, %v2309_v31  ;;  %v2326_v58 = vadd.f32 %v2324_v44, %v2310_v5 }
 0xe2f   : > { %v2395_v20 = vrot.slane %v4927_v45, 4  ;;  %v5503_v31 = vrot.slane %v4903_v7, 4 }
 0xe30   : > { %v2339_v25 = vmul.f32 %v2337_v61, %v2333_v43  ;;  %v2340_v2 = vmul.f32 %v2337_v61, %v2334_v13  ;;  %v2346_v42 = vpop.permute.xlu1 %2345 }
 0xe31   : > { %v2347_v4 = vsel %vm762_vm7, %v2344_v1, %v2346_v42  ;;  %v2348_v50 = vsel %vm762_vm7, %v2346_v42, %v2344_v1  ;;  %v2396_v5 = vsel %vm846_vm6, %v5503_v31, %v2395_v20 }
 0xe32   : > { %v2349_v55 = vmul.f32 %v2347_v4, %v4204_v46  ;;  %v2350_v47 = vmul.f32 %v2348_v50, %v4213_v54  ;;  %v2341_v17 = vadd.f32 %v2339_v25, %v2325_v41  ;;  %v2342_v61 = vadd.f32 %v2340_v2, %v2326_v58 }
 0xe33   : > { %v5504_v58 = vmov 0  }
 0xe34   : > { %v2355_v48 = vmul.f32 %v4929_v52, %v2349_v55  ;;  %v2356_v32 = vmul.f32 %v4929_v52, %v2350_v47  ;;  %v2376_v33 = vpop.permute.xlu1 %2375  ;;  %v2415_v55 = vrot.slane %v4801_v35, 4  ;;  %v2750_v35 = vld [vmem:[%s5428_s17] sm:$0xff] }
 0xe35   : > { %v2379_v1 = vsel %vm800_vm10, %v2376_v33, %v2378_v10  ;;  %v2380_v49 = vsel %vm800_vm10, %v2378_v10, %v2376_v33  ;;  %v1747_v33 = vld [vmem:[%s5423_s12 + $0x38] sm:$0xff] }
 0xe36   : > { %v2357_v28 = vadd.f32 %v2355_v48, %v2341_v17  ;;  %v2358_v24 = vadd.f32 %v2356_v32, %v2342_v61  ;;  %v2381_v34 = vmul.f32 %v4710_v3, %v2379_v1  ;;  %v2382_v30 = vmul.f32 %v4716_v19, %v2380_v49  ;;  %v1745_v61 = vld [vmem:[%s5423_s12 + $0x28] sm:$0xff]  ;;  %v1748_v48 = vld [vmem:[%s5423_s12 + $0x40] sm:$0xff]  ;;  %v1746_v32 = vld [vmem:[%s5423_s12 + $0x30] sm:$0xff] }
 0xe38   : > { %v2373_v52 = vadd.f32 %v2371_v62, %v2357_v28  ;;  %v2374_v51 = vadd.f32 %v2372_v12, %v2358_v24  ;;  %v2387_v44 = vmul.f32 %v4941_v63, %v2381_v34  ;;  %v2388_v11 = vmul.f32 %v4941_v63, %v2382_v30  ;;  %v1750_v63 = vld [vmem:[%s5422_s11 + $0x4] sm:$0xf] }
 0xe39   : > { %v2414_v7 = vunpack.c.l.bf16 %v1750_v63  ;;  %v3783_v49 = vcombine.low %v1750_v63, %v1750_v63 }
 0xe3a   : > { %v2389_v43 = vadd.f32 %v2387_v44, %v2373_v52  ;;  %v2390_v13 = vadd.f32 %v2388_v11, %v2374_v51 }
 0xe3b   : > { %v2510_v30 = vrot.slane %v3783_v49, 2 }
 0xe3c   : > { %v2398_v25 = vadd.f32 %v2396_v5, %v2389_v43  ;;  %v2399_v2 = vadd.f32 %v2396_v5, %v2390_v13 }
 0xe3e   : > { %v2402_v42 = vrot.slane %v2398_v25, 4  ;;  %v2403_v3 = vrot.slane %v2399_v2, 4 }
 0xe40   : > { %v2406_v21 = vmul.f32 %v2402_v42, %v2398_v25  ;;  %v2407_v19 = vmul.f32 %v2403_v3, %v2399_v2 }
 0xe42   : > { %v2408_v45 = vsel %vm846_vm6, %v2406_v21, 0.0  ;;  %v2409_v0 = vsel %vm846_vm6, %v2407_v19, 0.0 }
 0xe43   : > { %v2410_v4 = vadd.f32 %v2409_v0, %v2408_v45 }
 0xe45   : > { %2411 = vadd.xlane.f32.xlu1 %v2410_v4 }
 0xed2   : > { %v2412_v50 = vpop.xlane.xlu1 %2411 }
 0xed3   : > { %v2413_v41 = vmul.f32 0.00390625, %v2412_v50 }
 0xed5   : > { %3827 = vmatpush3.msk.msra.mxu0 %vm846_vm6, %v2413_v41 }
 0xed6   : > { %3829 = vmatmul.mubr.msk.f32.vlgmr.msra.gmra.mrb[10].mxu0 %vm1188_vm15, %v2414_v7 }
 0xed7   : > { %2552 = vmatprep.mubr.bf16.mxu0 %v5504_v58 }
 0xfa9   : > { %v2489_v47 = vpop.f32.mrb[10].mxu0 }
 0xfaa   : > { %v2490_v10 = vadd.f32 %v2489_v47, %v2415_v55  ;;  %v3830_v17 = vpop.f32.mrb[11].mxu0 }
 0xfac   : > { %2495 = vperm.xlu0 %3884, %v2490_v10  }
 0xfb0   : > { %2504 = vperm.xlu0 %3884, %v1745_v61  }
 0xfb4   : > { %2563 = vperm.xlu0 %3884, %v1748_v48  }
 0xfb8   : > { %2618 = vperm.xlu0 %3884, %v1746_v32  }
 0xfbc   : > { %2766 = vperm.xlu0 %3884, %v2750_v35  }
 0xfc0   : > { %2627 = vperm.xlu0 %3884, %v1747_v33  }
0x102b   : > { %v2496_v62 = vpop.permute.xlu0 %2495 }
0x102c   : > { %v2498_v12 = vmul.f32 %v2496_v62, %v2406_v21  ;;  %v2499_v1 = vmul.f32 %v2496_v62, %v2407_v19 }
0x102e   : > { %v2500_v28 = vpack.c.bf16 %v2498_v12, %v2498_v12  ;;  %v2501_v24 = vpack.c.bf16 %v2499_v1, %v2499_v1 }
0x102f   : > { %v2505_v20 = vpop.permute.xlu0 %2504 }
0x1030   : > { %3784 = vmatprep.subr.msk.bf16.mxu0 %vm839_vm5, %v2501_v24  ;;  %v2515_v34 = vsel %vm839_vm5, %v2500_v28, 0 }
0x1031   : > { %2521 = vmatpush1.bf16.msra.mxu0 %v2515_v34 }
0x1033   : > { %v5021_v11 = vpop.permute.xlu0 %2563 }
0x1034   : > { %3785 = vmatmul.mubr.msk.bf16.vlgmr.msra.gmra.mrb[24].mxu0 %vm1188_vm15, %v2510_v30 }
0x1035   : > { %2735 = vmatprep.mubr.bf16.mxu0 %v5504_v58 }
0x1107   : > { %v2554_v52 = vpop.f32.mrb[24].mxu0 }
0x1108   : > { %v2555_v51 = vadd.f32 %v2554_v52, %v2505_v20  ;;  %v2556_v44 = vpop.f32.mrb[25].mxu0 }
0x1109   : > { %v2557_v43 = vadd.f32 %v2556_v44, %v2505_v20  ;;  %v2558_v13 = vpop.f32.mrb[26].mxu0 }
0x110a   : > { %v2566_v31 = vmul.f32 %v5021_v11, %v2555_v51  ;;  %v2559_v5 = vpop.f32.mrb[27].mxu0 }
0x110b   : > { %v2567_v25 = vmul.f32 %v5021_v11, %v2557_v43 }
0x110c   : > { %v5026_v2 = vadd.f32 %v2566_v31, %v4882_v56 }
0x110d   : > { %v5029_v42 = vadd.f32 %v2567_v25, %v4884_v53 }
0x110e   : > { %v2570_v3 = vsel %vm846_vm6, %v5026_v2, 0.0 }
0x110f   : > { %v2571_v21 = vrot.slane %v2570_v3, 4  ;;  %v2577_v19 = vsel %vm846_vm6, %v5029_v42, 0.0 }
0x1110   : > { %v2578_v45 = vrot.slane %v2577_v19, 4 }
0x1111   : > { %v2572_v0 = vadd.f32 %v2571_v21, %v2570_v3 }
0x1112   : > { %v2579_v4 = vadd.f32 %v2578_v45, %v2577_v19  ;;  %v2612_v45 = vrot.slane %v2505_v20, 4  ;;  %v2763_v20 = vld [vmem:[%s5424_s13] sm:$0xf] }
0x1113   : > { %v2573_v63 = vrot.slane %v2572_v0, 2 }
0x1114   : > { %v2580_v50 = vrot.slane %v2579_v4, 2 }
0x1115   : > { %v2574_v7 = vadd.f32 %v2573_v63, %v2572_v0 }
0x1116   : > { %v2581_v41 = vadd.f32 %v2580_v50, %v2579_v4  ;;  %v2619_v50 = vpop.permute.xlu0 %2618 }
0x1117   : > { %v2575_v55 = vrot.slane %v2574_v7, 1 }
0x1118   : > { %v2582_v56 = vrot.slane %v2581_v41, 1 }
0x1119   : > { %v2576_v47 = vadd.f32 %v2575_v55, %v2574_v7 }
0x111a   : > { %v2583_v10 = vadd.f32 %v2582_v56, %v2581_v41 }
0x111b   : > { %v2584_v53 = vmul.f32 0.25, %v2576_v47 }
0x111c   : > { %v2585_v17 = vmul.f32 0.25, %v2583_v10 }
0x111d   : > { %v2586_v61 = vsub.f32 %v5026_v2, %v2584_v53  ;;  %v1751_v53 = vld [vmem:[%s5422_s11 + $0x8] sm:$0xf] }
0x111e   : > { %v2587_v48 = vsub.f32 %v5029_v42, %v2585_v17 }
0x111f   : > { %v2588_v32 = vmul.f32 %v2586_v61, %v2586_v61 }
0x1120   : > { %v2589_v35 = vmul.f32 %v2587_v48, %v2587_v48 }
0x1121   : > { %v2590_v33 = vsel %vm846_vm6, %v2588_v32, 0.0 }
0x1122   : > { %v2591_v62 = vrot.slane %v2590_v33, 4  ;;  %v2597_v12 = vsel %vm846_vm6, %v2589_v35, 0.0 }
0x1123   : > { %v2598_v1 = vrot.slane %v2597_v12, 4 }
0x1124   : > { %v2592_v49 = vadd.f32 %v2591_v62, %v2590_v33 }
0x1125   : > { %v2599_v28 = vadd.f32 %v2598_v1, %v2597_v12 }
0x1126   : > { %v2593_v24 = vrot.slane %v2592_v49, 2 }
0x1127   : > { %v2600_v34 = vrot.slane %v2599_v28, 2 }
0x1128   : > { %v2594_v30 = vadd.f32 %v2593_v24, %v2592_v49 }
0x1129   : > { %v2601_v52 = vadd.f32 %v2600_v34, %v2599_v28  ;;  %v1752_v34 = vld [vmem:[%s5422_s11 + $0xc] sm:$0x3] }
0x112a   : > { %v2595_v51 = vrot.slane %v2594_v30, 1 }
0x112b   : > { %v2602_v44 = vrot.slane %v2601_v52, 1 }
0x112c   : > { %v2596_v43 = vadd.f32 %v2595_v51, %v2594_v30 }
0x112d   : > { %v2603_v13 = vadd.f32 %v2602_v44, %v2601_v52 }
0x112e   : > { %v2604_v31 = vmul.f32 0.25, %v2596_v43 }
0x112f   : > { %v2605_v5 = vmul.f32 0.25, %v2603_v13 }
0x1130   : > { %v2606_v25 = vadd.f32 1e-06, %v2604_v31 }
0x1131   : > { %v2607_v3 = vadd.f32 1e-06, %v2605_v5 }
0x1132   : > { %3911 = vrsqrt.f32 %v2606_v25 }
0x1133   : > { %3913 = vrsqrt.f32 %v2607_v3 }
0x113c   : > { %v3912_v21 = vpop.eup %3911 }
0x113d   : > { %v3914_v19 = vpop.eup %3913  ;;  %v2610_v0 = vmul.f32 %v3912_v21, %v2586_v61  ;;  %v2752_v21 = vld [vmem:[%s5428_s17 + $0x10] sm:$0xff] }
0x113e   : > { %v2611_v4 = vmul.f32 %v3914_v19, %v2587_v48  ;;  %v5105_v19 = vld [vmem:[%s5426_s15] sm:$0xff] }
0x113f   : > { %v2614_v63 = vmul.f32 %v2612_v45, %v2610_v0  ;;  %v5506_v0 = vmov 1  }
0x1140   : > { %v2615_v7 = vmul.f32 %v2612_v45, %v2611_v4  ;;  %v5505_v45 = vmov 4   ;;  %v5120_v4 = vld [vmem:[%s5428_s17 + $0x20] sm:$0xff] }
0x1141   : > { %v2621_v41 = vadd.f32 %v2619_v50, %v2614_v63  ;;  %v2751_v63 = vld [vmem:[%s5428_s17 + $0x8] sm:$0xff] }
0x1142   : > { %v2622_v55 = vadd.f32 %v2619_v50, %v2615_v7  ;;  %v5507_v7 = vmov 2  }
0x1143   : > { %v2623_v56 = vpack.c.bf16 %v2621_v41, %v2621_v41  ;;  %v5508_v41 = vmov 3  }
0x1144   : > { %v2624_v47 = vpack.c.bf16 %v2622_v55, %v2622_v55  ;;  %v5509_v55 = vmov 5  }
0x1145   : > { %v2637_v10 = vsel %vm839_vm5, %v2623_v56, 0 }
0x1146   : > { %3786 = vmatprep.subr.msk.bf16.mxu1 %vm839_vm5, %v2624_v47 }
0x1147   : > { %2643 = vmatpush1.bf16.msra.mxu1 %v2637_v10 }
0x1148   : > { %2772 = vmatprep.subr.bf16.mxu1 %v4678_v15  ;;  %v2767_v15 = vpop.permute.xlu0 %2766 }
0x114a   : > { %3787 = vmatmul.mubr.msk.bf16.vlgmr.msra.gmra.mrb[16].mxu1 %vm1188_vm15, %v1751_v53 }
0x114b   : > { %2773 = vmatpush1.bf16.msra.mxu1 %v4681_v14  ;;  %2804 = vmatprep.mubr.bf16.mxu1 %v5504_v58 }
0x114c   : > { %2774 = vmatprep.subr.bf16.mxu1 %v4724_v29  ;;  %v2628_v14 = vpop.permute.xlu0 %2627  ;;  %v2629_v29 = vrot.slane %v2619_v50, 4  ;;  %v2753_v50 = vld [vmem:[%s5428_s17 + $0x18] sm:$0xff] }
0x114d   : > { %v5058_v17 = vrot.slane %v2628_v14, 4 }
0x114f   : > { %2775 = vmatpush1.bf16.msra.mxu1 %v4727_v57  ;;  %v2631_v57 = vsel %vm846_vm6, %v2629_v29, %v5058_v17 }
0x1150   : > { %3790 = vmatprep.subr.msk.bf16.mxu1 %vm839_vm5, %v4721_v59 }
0x1153   : > { %2777 = vmatpush1.bf16.msra.mxu1 %v4734_v60 }
0x1156   : > { %3791 = vmatmul.mubr.msk.bf16.vlgmr.msra.gmra.mrb[20].mxu1 %vm880_vm11, %v2763_v20 }
0x1157   : > { %3109 = vmatprep.mubr.bf16.mxu1 %v5504_v58 }
0x121d   : > { %v2676_v61 = vpop.f32.mrb[16].mxu1 }
0x121e   : > { %v2677_v59 = vadd.f32 %v2676_v61, %v2631_v57  ;;  %v2678_v48 = vpop.f32.mrb[17].mxu1 }
0x121f   : > { %v2679_v60 = vadd.f32 %v2678_v48, %v2631_v57  ;;  %v2680_v32 = vpop.f32.mrb[18].mxu1 }
0x1220   : > { %v2685_v35 = vrot.slane %v2677_v59, 4  ;;  %v2681_v33 = vpop.f32.mrb[19].mxu1 }
0x1221   : > { %v2686_v62 = vrot.slane %v2679_v60, 4  ;;  %v5510_v33 = vld [vmem:[#allocation3_spill] sm:$0xff] }
0x1222   : > { %v2689_v12 = vmul.f32 %v2685_v35, %v2677_v59 }
0x1223   : > { %v2690_v1 = vmul.f32 %v2686_v62, %v2679_v60 }
0x1224   : > { %v2691_v49 = vpack.c.bf16 %v2689_v12, %v2689_v12  ;;  %v5511_v12 = vld [vmem:[#allocation4_spill] sm:$0xff] }
0x1225   : > { %v2692_v28 = vpack.c.bf16 %v2690_v1, %v2690_v1 }
0x1226   : > { %v2698_v24 = vsel %vm839_vm5, %v2691_v49, 0 }
0x1227   : > { %3788 = vmatprep.subr.msk.bf16.mxu0 %vm839_vm5, %v2692_v28 }
0x1228   : > { %2704 = vmatpush1.bf16.msra.mxu0 %v2698_v24 }
0x1229   : > { %v2806_v30 = vpop.f32.mrb[20].mxu1 }
0x122a   : > { %v2807_v52 = vadd.f32 %v2806_v30, %v2767_v15  ;;  %v2808_v51 = vpop.f32.mrb[21].mxu1 }
0x122b   : > { %v2809_v44 = vadd.f32 %v2808_v51, %v2767_v15  ;;  %3789 = vmatmul.mubr.msk.bf16.vlgmr.msra.gmra.mrb[28].mxu0 %vm1188_vm15, %v1752_v34  ;;  %v2810_v43 = vpop.f32.mrb[22].mxu1 }
0x122c   : > { %vm2813_vm11 = vcmp.ge.f32.partialorder %v2807_v52, 0.0  ;;  %v2815_v13 = vmul.f32 0.2, %v2807_v52  ;;  %v2811_v31 = vpop.f32.mrb[23].mxu1  ;;  %2996 = vmatprep.mubr.bf16.mxu0 %v5504_v58 }
0x122d   : > { %v2816_v25 = vmul.f32 0.2, %v2809_v44  ;;  %vm2814_vm8 = vcmp.ge.f32.partialorder %v2809_v44, 0.0 }
0x122e   : > { %v5069_v5 = vsel %vm2813_vm11, %v2807_v52, %v2815_v13 }
0x122f   : > { %2819 = vrot.lane.b32.xlu1 %v5069_v5, %s5497_s25  ;;  %2829 = vrot.lane.b32.xlu0 %v5069_v5, %s5496_s24  ;;  %v5075_v3 = vsel %vm2814_vm8, %v2809_v44, %v2816_v25 }
0x1233   : > { %2841 = vrot.lane.b32.xlu1 %v5075_v3, %s5491_s30  ;;  %2849 = vrot.lane.b32.xlu0 %v5069_v5, %s5492_s23 }
0x1237   : > { %2863 = vrot.lane.b32.xlu1 %v5075_v3, %s5494_s26  ;;  %2839 = vrot.lane.b32.xlu0 %v5069_v5, %s5491_s30 }
0x123b   : > { %2883 = vrot.lane.b32.xlu1 %v5075_v3, %s5493_s3  ;;  %2831 = vrot.lane.b32.xlu0 %v5075_v3, %s5496_s24 }
0x123f   : > { %2873 = vrot.lane.b32.xlu1 %v5075_v3, %s5486_s1  ;;  %2821 = vrot.lane.b32.xlu0 %v5075_v3, %s5497_s25 }
0x1243   : > { %2893 = vrot.lane.b32.xlu1 %v5075_v3, %s5487_s22  ;;  %2851 = vrot.lane.b32.xlu0 %v5075_v3, %s5492_s23 }
0x1247   : > { %3053 = vperm.xlu1 %3883, %v2752_v21   ;;  %2861 = vrot.lane.b32.xlu0 %v5069_v5, %s5494_s26 }
0x124b   : > { %2881 = vrot.lane.b32.xlu0 %v5069_v5, %s5493_s3  ;;  %3885 = vset.pattern.permute.xlu1 %v5505_v45 }
0x124c   : > { %3121 = vperm.xlu1 %3885, %v5105_v19  }
0x124f   : > { %2871 = vrot.lane.b32.xlu0 %v5069_v5, %s5486_s1 }
0x1250   : > { %3886 = vset.pattern.permute.xlu1 %v5506_v0 }
0x1251   : > { %3151 = vperm.xlu1 %3886, %v5105_v19  }
0x1253   : > { %2891 = vrot.lane.b32.xlu0 %v5069_v5, %s5487_s22 }
0x1255   : > { %3893 = vset.pattern.permute.xlu1 %v5504_v58 }
0x1256   : > { %3256 = vperm.xlu1 %3893, %v5120_v4  }
0x1257   : > { %2952 = vperm.xlu0 %3884, %v2751_v63  }
0x125b   : > { %3062 = vperm.xlu0 %3884, %v2753_v50  }
0x125f   : > { %3135 = vperm.xlu0 %3884, %v5105_v19  }
0x1263   : > { %3887 = vset.pattern.permute.xlu0 %v5507_v7 }
0x1264   : > { %3167 = vperm.xlu0 %3887, %v5105_v19  }
0x1268   : > { %3888 = vset.pattern.permute.xlu0 %v5508_v41 }
0x1269   : > { %3183 = vperm.xlu0 %3888, %v5105_v19  }
0x126d   : > { %3889 = vset.pattern.permute.xlu0 %v5509_v55 }
0x126e   : > { %3199 = vperm.xlu0 %3889, %v5105_v19  }
0x1272   : > { %3890 = vset.pattern.permute.xlu0 %v5499_v8 }
0x1273   : > { %3215 = vperm.xlu0 %3890, %v5105_v19  }
0x1277   : > { %3891 = vset.pattern.permute.xlu0 %v5500_v40 }
0x1278   : > { %3231 = vperm.xlu0 %3891, %v5105_v19  }
0x127c   : > { %3892 = vset.pattern.permute.xlu0 %v5501_v9 }
0x12a1   : > { %v2830_v56 = vpop.permute.xlu0 %2829  ;;  %v2820_v10 = vpop.permute.xlu1 %2819 }
0x12a5   : > { %v2850_v47 = vpop.permute.xlu0 %2849  ;;  %v2842_v20 = vpop.permute.xlu1 %2841 }
0x12a9   : > { %v2840_v53 = vpop.permute.xlu0 %2839  ;;  %v2864_v60 = vpop.permute.xlu1 %2863 }
0x12aa   : > { %v2843_v32 = vsel %vm703_vm0, %v2840_v53, %v2842_v20  ;;  %v2844_v35 = vsel %vm703_vm0, %v2842_v20, %v2840_v53 }
0x12ab   : > { %v2845_v52 = vmul.f32 %v2844_v35, %v4153_v18  ;;  %v2846_v51 = vmul.f32 %v2843_v32, %v4149_v16 }
0x12ad   : > { %v2832_v15 = vpop.permute.xlu0 %2831  ;;  %v2884_v45 = vpop.permute.xlu1 %2883  ;;  %v2847_v7 = vpack.c.bf16 %v2845_v52, %v2845_v52  ;;  %v2848_v41 = vpack.c.bf16 %v2846_v51, %v2846_v51 }
0x12ae   : > { %v2833_v14 = vsel %vm684_vm2, %v2830_v56, %v2832_v15  ;;  %v2834_v8 = vsel %vm684_vm2, %v2832_v15, %v2830_v56 }
0x12af   : > { %v2835_v29 = vmul.f32 %v2834_v8, %v4165_v22  ;;  %v2836_v40 = vmul.f32 %v2833_v14, %v4168_v23 }
0x12b1   : > { %v2837_v57 = vpack.c.bf16 %v2835_v29, %v2835_v29  ;;  %v2838_v61 = vpack.c.bf16 %v2836_v40, %v2836_v40  ;;  %v2822_v59 = vpop.permute.xlu0 %2821 }
0x12b2   : > { %v2823_v9 = vsel %vm665_vm1, %v2820_v10, %v2822_v59  ;;  %v2824_v48 = vsel %vm665_vm1, %v2822_v59, %v2820_v10  ;;  %v2860_v59 = vpack.c.bf16 %v5075_v3, %v5075_v3 }
0x12b3   : > { %v2825_v62 = vmul.f32 %v2824_v48, %v5510_v33  ;;  %v2826_v1 = vmul.f32 %v2823_v9, %v5511_v12  ;;  %v2903_v49 = vrot.slane %v2837_v57, 4  ;;  %v2904_v28 = vrot.slane %v2838_v61, 4  ;;  %v2874_v48 = vpop.permute.xlu1 %2873 }
0x12b4   : > { %v2859_v9 = vpack.c.bf16 %v5069_v5, %v5069_v5 }
0x12b5   : > { %v2827_v24 = vpack.c.bf16 %v2825_v62, %v2825_v62  ;;  %v2828_v34 = vpack.c.bf16 %v2826_v1, %v2826_v1  ;;  %v2852_v30 = vpop.permute.xlu0 %2851 }
0x12b6   : > { %v2853_v44 = vsel %vm722_vm3, %v2850_v47, %v2852_v30  ;;  %v2854_v43 = vsel %vm722_vm3, %v2852_v30, %v2850_v47 }
0x12b7   : > { %v2855_v13 = vmul.f32 %v2854_v43, %v4175_v26  ;;  %v2856_v31 = vmul.f32 %v2853_v44, %v4178_v27  ;;  %v2923_v25 = vsel %vm846_vm6, %v2828_v34, %v2904_v28  ;;  %v2919_v21 = vsel %vm846_vm6, %v2827_v24, %v2903_v49  ;;  %v2894_v51 = vpop.permute.xlu1 %2893 }
0x12b8   : > { %2964 = vmatprep.subr.bf16.mxu0 %v2923_v25 }
0x12b9   : > { %v2857_v0 = vpack.c.bf16 %v2855_v13, %v2855_v13  ;;  %v2858_v63 = vpack.c.bf16 %v2856_v31, %v2856_v31  ;;  %v2862_v50 = vpop.permute.xlu0 %2861  ;;  %2965 = vmatpush1.bf16.msra.mxu0 %v2919_v21 }
0x12ba   : > { %v2865_v55 = vsel %vm743_vm4, %v2862_v50, %v2864_v60  ;;  %v2866_v56 = vsel %vm743_vm4, %v2864_v60, %v2862_v50  ;;  %v5207_v50 = vld [vmem:[%s5482_s27 + $0x18] ss:$0 sm:$0xff] }
0x12bb   : > { %v2907_v47 = vrot.slane %v2857_v0, 4  ;;  %v2908_v10 = vrot.slane %v2858_v63, 4  ;;  %v2867_v53 = vmul.f32 %v2865_v55, %v4193_v37  ;;  %v2868_v20 = vmul.f32 %v2866_v56, %v4196_v38  ;;  %v5201_v0 = vld [vmem:[%s5482_s27 + $0x10] ss:$0 sm:$0xff] }
0x12bd   : > { %v2869_v15 = vpack.c.bf16 %v2867_v53, %v2867_v53  ;;  %v2870_v14 = vpack.c.bf16 %v2868_v20, %v2868_v20  ;;  %v2882_v8 = vpop.permute.xlu0 %2881  ;;  %v2931_v29 = vsel %vm846_vm6, %v2848_v41, %v2908_v10  ;;  %v2927_v40 = vsel %vm846_vm6, %v2847_v7, %v2907_v47  ;;  %v2949_v53 = vld [vmem:[%s5425_s14] sm:$0x3] }
0x12be   : > { %v2885_v57 = vsel %vm781_vm9, %v2882_v8, %v2884_v45  ;;  %v2886_v61 = vsel %vm781_vm9, %v2884_v45, %v2882_v8  ;;  %2966 = vmatprep.subr.bf16.mxu0 %v2931_v29 }
0x12bf   : > { %v2911_v60 = vrot.slane %v2869_v15, 4  ;;  %v2912_v32 = vrot.slane %v2870_v14, 4  ;;  %v2887_v35 = vmul.f32 %v2885_v57, %v4236_v36  ;;  %v2888_v62 = vmul.f32 %v2886_v61, %v4239_v39  ;;  %2967 = vmatpush1.bf16.msra.mxu0 %v2927_v40 }
0x12c0   : > { %v2744_v15 = vrot.slane %v5021_v11, 4 }
0x12c1   : > { %v2890_v1 = vpack.c.bf16 %v2888_v62, %v2888_v62  ;;  %v2872_v49 = vpop.permute.xlu0 %2871  ;;  %v2939_v28 = vsel %vm846_vm6, %v2860_v59, %v2912_v32  ;;  %v2935_v24 = vsel %vm846_vm6, %v2859_v9, %v2911_v60  ;;  %v2889_v34 = vpack.c.bf16 %v2887_v35, %v2887_v35 }
0x12c2   : > { %v2875_v3 = vsel %vm762_vm7, %v2872_v49, %v2874_v48  ;;  %v2876_v5 = vsel %vm762_vm7, %v2874_v48, %v2872_v49  ;;  %2968 = vmatprep.subr.bf16.mxu0 %v2939_v28 }
0x12c3   : > { %v2877_v30 = vmul.f32 %v2875_v3, %v4204_v46  ;;  %v2878_v52 = vmul.f32 %v2876_v5, %v4213_v54  ;;  %2969 = vmatpush1.bf16.msra.mxu0 %v2935_v24  ;;  %v2916_v44 = vrot.slane %v2890_v1, 4  ;;  %v2915_v25 = vrot.slane %v2889_v34, 4 }
0x12c5   : > { %v2879_v43 = vpack.c.bf16 %v2877_v30, %v2877_v30  ;;  %v2880_v13 = vpack.c.bf16 %v2878_v52, %v2878_v52  ;;  %v2892_v31 = vpop.permute.xlu0 %2891 }
0x12c6   : > { %v2895_v21 = vsel %vm800_vm10, %v2892_v31, %v2894_v51  ;;  %v2896_v45 = vsel %vm800_vm10, %v2894_v51, %v2892_v31 }
0x12c7   : > { %v2897_v63 = vmul.f32 %v5201_v0, %v2895_v21  ;;  %v2898_v7 = vmul.f32 %v5207_v50, %v2896_v45  ;;  %v2947_v41 = vsel %vm846_vm6, %v2880_v13, %v2916_v44  ;;  %v2943_v55 = vsel %vm846_vm6, %v2879_v43, %v2915_v25 }
0x12c8   : > { %2970 = vmatprep.subr.bf16.mxu0 %v2947_v41 }
0x12c9   : > { %v2899_v56 = vpack.c.bf16 %v2897_v63, %v2897_v63  ;;  %v2900_v47 = vpack.c.bf16 %v2898_v7, %v2898_v7  ;;  %2971 = vmatpush1.bf16.msra.mxu0 %v2943_v55 }
0x12cb   : > { %3792 = vmatprep.subr.msk.bf16.mxu0 %vm846_vm6, %v2900_v47  ;;  %v2959_v10 = vsel %vm846_vm6, %v2899_v56, 0 }
0x12cd   : > { %2973 = vmatpush1.bf16.msra.mxu0 %v2959_v10 }
0x12d0   : > { %3793 = vmatmul.mubr.msk.bf16.vlgmr.msra.gmra.mrb[32].mxu0 %vm1073_vm14, %v2949_v53 }
0x12d1   : > { %3537 = vmatprep.mubr.bf16.mxu0 %v5504_v58 }
0x12d6   : > { %v2953_v51 = vpop.permute.xlu0 %2952 }
0x12fe   : > { %v2737_v20 = vpop.f32.mrb[28].mxu0 }
0x12ff   : > { %v2738_v14 = vadd.f32 %v2737_v20, %v5058_v17  ;;  %v2739_v8 = vpop.f32.mrb[29].mxu0 }
0x1300   : > { %v2740_v29 = vadd.f32 %v2739_v8, %v5058_v17  ;;  %v2741_v40 = vpop.f32.mrb[30].mxu0 }
0x1301   : > { %v2746_v57 = vmul.f32 %v2744_v15, %v2738_v14  ;;  %v2742_v61 = vpop.f32.mrb[31].mxu0 }
0x1302   : > { %v2747_v59 = vmul.f32 %v2744_v15, %v2740_v29 }
0x1303   : > { %v2748_v9 = vadd.f32 %v2746_v57, %v5026_v2 }
0x1304   : > { %v2749_v48 = vadd.f32 %v2747_v59, %v5029_v42 }
0x1305   : > { %v3805_v60 = vmul.f32 -1.442695, %v2748_v9 }
0x1306   : > { %v3806_v32 = vmul.f32 -1.442695, %v2749_v48 }
0x1307   : > { %3915 = vpow2.f32 %v3805_v60 }
0x1308   : > { %3917 = vpow2.f32 %v3806_v32 }
0x1311   : > { %v3916_v35 = vpop.eup %3915 }
0x1312   : > { %v3918_v62 = vpop.eup %3917  ;;  %v3619_v11 = vadd.f32 1.0, %v3916_v35 }
0x1313   : > { %v3620_v1 = vadd.f32 1.0, %v3918_v62 }
0x1314   : > { %3919 = vrcp.f32 %v3619_v11 }
0x1315   : > { %3921 = vrcp.f32 %v3620_v1 }
0x131e   : > { %v3920_v49 = vpop.eup %3919 }
0x131f   : > { %v3922_v17 = vpop.eup %3921  ;;  %v3625_v28 = vmul.f32 2.0, %v3920_v49 }
0x1320   : > { %v3626_v24 = vmul.f32 2.0, %v3922_v17 }
0x1321   : > { %v3807_v34 = vadd.f32 -1.0, %v3625_v28 }
0x1322   : > { %v3808_v3 = vadd.f32 -1.0, %v3626_v24 }
0x1323   : > { %v3629_v5 = vmul.f32 1.442695, %v3807_v34 }
0x1324   : > { %v3631_v2 = vmul.f32 1.442695, %v3808_v3 }
0x1325   : > { %3923 = vpow2.f32 %v3629_v5 }
0x1326   : > { %3925 = vpow2.f32 %v3631_v2 }
0x132f   : > { %v5224_v42 = vpop.eup %3923 }
0x1330   : > { %v5226_v30 = vpop.eup %3925 }
0x1331   : > { %v3635_v52 = vcombine.low %v5224_v42, %v5226_v30 }
0x13a3   : > { %v2998_v44 = vpop.f32.mrb[32].mxu0 }
0x13a4   : > { %v5230_v43 = vadd.f32 %v2998_v44, %v2953_v51  ;;  %v3000_v13 = vpop.f32.mrb[33].mxu0 }
0x13a5   : > { %v5232_v31 = vadd.f32 %v3000_v13, %v2953_v51  ;;  %v3002_v25 = vpop.f32.mrb[34].mxu0 }
0x13a6   : > { %v3005_v21 = vsel %vm846_vm6, %v5230_v43, 0.0  ;;  %v3003_v45 = vpop.f32.mrb[35].mxu0 }
0x13a7   : > { %v3006_v63 = vrot.slane %v3005_v21, 4  ;;  %v3012_v7 = vsel %vm846_vm6, %v5232_v31, 0.0 }
0x13a8   : > { %v3013_v41 = vrot.slane %v3012_v7, 4 }
0x13a9   : > { %v3007_v55 = vadd.f32 %v3006_v63, %v3005_v21 }
0x13aa   : > { %v3014_v56 = vadd.f32 %v3013_v41, %v3012_v7  ;;  %v3047_v7 = vrot.slane %v2953_v51, 4  ;;  %v5251_v51 = vpop.permute.xlu0 %3062 }
0x13ab   : > { %v3008_v47 = vrot.slane %v3007_v55, 2 }
0x13ac   : > { %v3015_v10 = vrot.slane %v3014_v56, 2 }
0x13ad   : > { %v3009_v53 = vadd.f32 %v3008_v47, %v3007_v55  ;;  %v3054_v47 = vpop.permute.xlu1 %3053 }
0x13ae   : > { %v3016_v20 = vadd.f32 %v3015_v10, %v3014_v56 }
0x13af   : > { %v3010_v15 = vrot.slane %v3009_v53, 1 }
0x13b0   : > { %v3017_v14 = vrot.slane %v3016_v20, 1 }
0x13b1   : > { %v3011_v8 = vadd.f32 %v3010_v15, %v3009_v53 }
0x13b2   : > { %v3018_v29 = vadd.f32 %v3017_v14, %v3016_v20 }
0x13b3   : > { %v3019_v40 = vmul.f32 0.25, %v3011_v8 }
0x13b4   : > { %v3020_v57 = vmul.f32 0.25, %v3018_v29  ;;  %v2759_v29 = vld [vmem:[%s5427_s16] sm:$0xf] }
0x13b5   : > { %v3021_v61 = vsub.f32 %v5230_v43, %v3019_v40  ;;  %v5512_v40 = vmov 0.0  }
0x13b6   : > { %v3022_v59 = vsub.f32 %v5232_v31, %v3020_v57  ;;  %v3065_v57 = vrot.slane %v5251_v51, 4 }
0x13b7   : > { %v3023_v9 = vmul.f32 %v3021_v61, %v3021_v61 }
0x13b8   : > { %v3024_v48 = vmul.f32 %v3022_v59, %v3022_v59 }
0x13b9   : > { %v3025_v60 = vsel %vm846_vm6, %v3023_v9, 0.0 }
0x13ba   : > { %v3026_v32 = vrot.slane %v3025_v60, 4  ;;  %v3032_v35 = vsel %vm846_vm6, %v3024_v48, 0.0 }
0x13bb   : > { %v3033_v62 = vrot.slane %v3032_v35, 4 }
0x13bc   : > { %v3027_v11 = vadd.f32 %v3026_v32, %v3025_v60 }
0x13bd   : > { %v3034_v1 = vadd.f32 %v3033_v62, %v3032_v35 }
0x13be   : > { %v3028_v49 = vrot.slane %v3027_v11, 2 }
0x13bf   : > { %v3035_v17 = vrot.slane %v3034_v1, 2 }
0x13c0   : > { %v3029_v28 = vadd.f32 %v3028_v49, %v3027_v11 }
0x13c1   : > { %v3036_v24 = vadd.f32 %v3035_v17, %v3034_v1  ;;  %v3136_v1 = vpop.permute.xlu0 %3135 }
0x13c2   : > { %v3030_v34 = vrot.slane %v3029_v28, 1 }
0x13c3   : > { %v3037_v3 = vrot.slane %v3036_v24, 1 }
0x13c4   : > { %v3031_v5 = vadd.f32 %v3030_v34, %v3029_v28 }
0x13c5   : > { %v3038_v2 = vadd.f32 %v3037_v3, %v3036_v24  ;;  %v3168_v17 = vpop.permute.xlu0 %3167 }
0x13c6   : > { %v3039_v44 = vmul.f32 0.25, %v3031_v5 }
0x13c7   : > { %v3040_v13 = vmul.f32 0.25, %v3038_v2 }
0x13c8   : > { %v3041_v25 = vadd.f32 1e-06, %v3039_v44 }
0x13c9   : > { %v3042_v21 = vadd.f32 1e-06, %v3040_v13  ;;  %v3184_v24 = vpop.permute.xlu0 %3183 }
0x13ca   : > { %3927 = vrsqrt.f32 %v3041_v25 }
0x13cb   : > { %3929 = vrsqrt.f32 %v3042_v21 }
0x13cd   : > { %v3200_v5 = vpop.permute.xlu0 %3199 }
0x13d1   : > { %v5277_v44 = vpop.permute.xlu0 %3215 }
0x13d4   : > { %v3928_v45 = vpop.eup %3927 }
0x13d5   : > { %v3930_v63 = vpop.eup %3929  ;;  %v3045_v41 = vmul.f32 %v3928_v45, %v3021_v61  ;;  %v3064_v61 = vrot.slane %v3054_v47, 4  ;;  %v5279_v21 = vpop.permute.xlu0 %3231 }
0x13d6   : > { %v3046_v55 = vmul.f32 %v3930_v63, %v3022_v59 }
0x13d7   : > { %v3049_v56 = vmul.f32 %v3047_v7, %v3045_v41  ;;  %v3066_v59 = vsel %vm846_vm6, %v3064_v61, %v3065_v57 }
0x13d8   : > { %v3050_v10 = vmul.f32 %v3047_v7, %v3046_v55 }
0x13d9   : > { %v3056_v53 = vadd.f32 %v3054_v47, %v3049_v56 }
0x13da   : > { %v3057_v20 = vadd.f32 %v3054_v47, %v3050_v10 }
0x13db   : > { %v3058_v15 = vpack.c.bf16 %v3056_v53, %v3056_v53 }
0x13dc   : > { %v3059_v14 = vpack.c.bf16 %v3057_v20, %v3057_v20 }
0x13dd   : > { %v3072_v8 = vsel %vm839_vm5, %v3058_v15, 0 }
0x13de   : > { %3794 = vmatprep.subr.msk.bf16.mxu1 %vm839_vm5, %v3059_v14 }
0x13df   : > { %3078 = vmatpush1.bf16.msra.mxu1 %v3072_v8 }
0x13e0   : > { %3831 = vmatprep.subr.mxu1 %v5512_v40 }
0x13e2   : > { %3795 = vmatmul.mubr.msk.bf16.vlgmr.msra.gmra.mrb[24].mxu1 %vm1188_vm15, %v2759_v29 }
0x13e3   : > { %3833 = vmatprep.mubr.msk.f32.mxu1 %vm3966_vm12, %v5512_v40 }
0x14b5   : > { %v3111_v9 = vpop.f32.mrb[24].mxu1 }
0x14b6   : > { %v3112_v48 = vadd.f32 %v3111_v9, %v3066_v59  ;;  %v3113_v60 = vpop.f32.mrb[25].mxu1 }
0x14b7   : > { %v3115_v32 = vpop.f32.mrb[26].mxu1  ;;  %v3114_v62 = vadd.f32 %v3113_v60, %v3066_v59 }
0x14b8   : > { %v3116_v35 = vpop.f32.mrb[27].mxu1  ;;  %3142 = vrot.lane.b32.xlu1 %v3112_v48, %s5496_s24  ;;  %3126 = vrot.lane.b32.xlu0 %v3112_v48, %s5497_s25 }
0x14bc   : > { %3158 = vrot.lane.b32.xlu1 %v3112_v48, %s5491_s30  ;;  %3247 = vperm.xlu0 %3892, %v5105_v19   ;;  %v3122_v19 = vpop.permute.xlu1 %3121 }
0x14bd   : > { %v3125_v9 = vmul.f32 %v3122_v19, %v3114_v62  ;;  %v3124_v60 = vmul.f32 %v3122_v19, %v3112_v48 }
0x14c0   : > { %3174 = vrot.lane.b32.xlu1 %v3112_v48, %s5492_s23  ;;  %3224 = vrot.lane.b32.xlu0 %v3114_v62, %s5493_s3  ;;  %v3152_v11 = vpop.permute.xlu1 %3151 }
0x14c1   : > { %3894 = vset.pattern.permute.xlu0 %v5504_v58 }
0x14c4   : > { %3190 = vrot.lane.b32.xlu1 %v3112_v48, %s5494_s26  ;;  %3240 = vrot.lane.b32.xlu0 %v3114_v62, %s5487_s22  ;;  %v5275_v49 = vpop.permute.xlu1 %3256 }
0x14c8   : > { %3206 = vrot.lane.b32.xlu1 %v3112_v48, %s5486_s1 }
0x14cc   : > { %3222 = vrot.lane.b32.xlu1 %v3112_v48, %s5493_s3 }
0x14d0   : > { %3128 = vrot.lane.b32.xlu1 %v3114_v62, %s5497_s25 }
0x14d4   : > { %3144 = vrot.lane.b32.xlu1 %v3114_v62, %s5496_s24 }
0x14d8   : > { %3160 = vrot.lane.b32.xlu1 %v3114_v62, %s5491_s30 }
0x14dc   : > { %3176 = vrot.lane.b32.xlu1 %v3114_v62, %s5492_s23 }
0x14e0   : > { %3192 = vrot.lane.b32.xlu1 %v3114_v62, %s5494_s26 }
0x14e4   : > { %3208 = vrot.lane.b32.xlu1 %v3114_v62, %s5486_s1 }
0x14e8   : > { %3238 = vrot.lane.b32.xlu1 %v3112_v48, %s5487_s22 }
0x152a   : > { %v3143_v28 = vpop.permute.xlu1 %3142  ;;  %v3127_v63 = vpop.permute.xlu0 %3126 }
0x152e   : > { %v3159_v34 = vpop.permute.xlu1 %3158 }
0x1532   : > { %v3175_v3 = vpop.permute.xlu1 %3174 }
0x1536   : > { %v3191_v2 = vpop.permute.xlu1 %3190 }
0x153a   : > { %v3207_v13 = vpop.permute.xlu1 %3206 }
0x153b   : > { %v5289_v10 = vpop.permute.xlu0 %3247 }
0x153e   : > { %v3223_v25 = vpop.permute.xlu1 %3222 }
0x153f   : > { %v3225_v35 = vpop.permute.xlu0 %3224 }
0x1542   : > { %v3129_v45 = vpop.permute.xlu1 %3128 }
0x1543   : > { %v3130_v7 = vsel %vm665_vm1, %v3127_v63, %v3129_v45  ;;  %v3131_v41 = vsel %vm665_vm1, %v3129_v45, %v3127_v63 }
0x1544   : > { %v3132_v53 = vmul.f32 %v3131_v41, %v5510_v33  ;;  %v3133_v20 = vmul.f32 %v3130_v7, %v5511_v12 }
0x1546   : > { %v3145_v55 = vpop.permute.xlu1 %3144  ;;  %v3138_v61 = vmul.f32 %v3136_v1, %v3132_v53  ;;  %v3139_v59 = vmul.f32 %v3136_v1, %v3133_v20 }
0x1547   : > { %v3146_v56 = vsel %vm684_vm2, %v3143_v28, %v3145_v55  ;;  %v3147_v47 = vsel %vm684_vm2, %v3145_v55, %v3143_v28 }
0x1548   : > { %v3148_v14 = vmul.f32 %v3147_v47, %v4165_v22  ;;  %v3149_v8 = vmul.f32 %v3146_v56, %v4168_v23  ;;  %v3140_v62 = vadd.f32 %v3138_v61, %v3124_v60  ;;  %v3141_v48 = vadd.f32 %v3139_v59, %v3125_v9  ;;  %v3241_v61 = vpop.permute.xlu0 %3240 }
0x154a   : > { %v3161_v15 = vpop.permute.xlu1 %3160  ;;  %v3154_v28 = vmul.f32 %v3152_v11, %v3148_v14  ;;  %v3155_v22 = vmul.f32 %v3152_v11, %v3149_v8 }
0x154b   : > { %v3162_v29 = vsel %vm703_vm0, %v3159_v34, %v3161_v15  ;;  %v3163_v40 = vsel %vm703_vm0, %v3161_v15, %v3159_v34 }
0x154c   : > { %v3164_v32 = vmul.f32 %v3163_v40, %v4153_v18  ;;  %v3165_v33 = vmul.f32 %v3162_v29, %v4149_v16  ;;  %v3226_v18 = vsel %vm781_vm9, %v3223_v25, %v3225_v35  ;;  %v3227_v16 = vsel %vm781_vm9, %v3225_v35, %v3223_v25 }
0x154d   : > { %v3156_v7 = vadd.f32 %v3154_v28, %v3140_v62  ;;  %v3157_v41 = vadd.f32 %v3155_v22, %v3141_v48  ;;  %v3228_v14 = vmul.f32 %v3226_v18, %v4236_v36  ;;  %v3229_v8 = vmul.f32 %v3227_v16, %v4239_v39 }
0x154e   : > { %v3177_v12 = vpop.permute.xlu1 %3176  ;;  %v3170_v19 = vmul.f32 %v3168_v17, %v3164_v32  ;;  %v3171_v11 = vmul.f32 %v3168_v17, %v3165_v33  ;;  %v3258_v28 = vrot.slane %v5275_v49, 4 }
0x154f   : > { %v3178_v23 = vsel %vm722_vm3, %v3175_v3, %v3177_v12  ;;  %v3179_v45 = vsel %vm722_vm3, %v3177_v12, %v3175_v3  ;;  %v3234_v60 = vmul.f32 %v5279_v21, %v3228_v14  ;;  %v3235_v32 = vmul.f32 %v5279_v21, %v3229_v8 }
0x1550   : > { %v3180_v34 = vmul.f32 %v3179_v45, %v4175_v26  ;;  %v3181_v1 = vmul.f32 %v3178_v23, %v4178_v27  ;;  %v3172_v53 = vadd.f32 %v3170_v19, %v3156_v7  ;;  %v3173_v20 = vadd.f32 %v3171_v11, %v3157_v41 }
0x1551   : > { %v3259_v6 = vsel %vm846_vm6, %v3065_v57, %v3258_v28  ;;  %v3278_v57 = vrot.slane %v5120_v4, 4  ;;  %v2757_v4 = vld [vmem:[%s5428_s17 + $0x38] sm:$0xff] }
0x1552   : > { %v3193_v63 = vpop.permute.xlu1 %3192  ;;  %v3186_v27 = vmul.f32 %v3184_v24, %v3180_v34  ;;  %v3187_v55 = vmul.f32 %v3184_v24, %v3181_v1 }
0x1553   : > { %v3194_v3 = vsel %vm743_vm4, %v3191_v2, %v3193_v63  ;;  %v3195_v26 = vsel %vm743_vm4, %v3193_v63, %v3191_v2 }
0x1554   : > { %v3196_v56 = vmul.f32 %v3194_v3, %v4193_v37  ;;  %v3197_v47 = vmul.f32 %v3195_v26, %v4196_v38  ;;  %v3188_v24 = vadd.f32 %v3186_v27, %v3172_v53  ;;  %v3189_v40 = vadd.f32 %v3187_v55, %v3173_v20  ;;  %v2755_v26 = vld [vmem:[%s5428_s17 + $0x28] sm:$0xff]  ;;  %v2758_v27 = vld [vmem:[%s5428_s17 + $0x40] sm:$0xff]  ;;  %v2756_v55 = vld [vmem:[%s5428_s17 + $0x30] sm:$0xff] }
0x1556   : > { %v3202_v25 = vmul.f32 %v3200_v5, %v3196_v56  ;;  %v3203_v15 = vmul.f32 %v3200_v5, %v3197_v47  ;;  %v3209_v17 = vpop.permute.xlu1 %3208 }
0x1557   : > { %v3210_v29 = vsel %vm762_vm7, %v3207_v13, %v3209_v17  ;;  %v3211_v2 = vsel %vm762_vm7, %v3209_v17, %v3207_v13 }
0x1558   : > { %v3212_v37 = vmul.f32 %v3210_v29, %v4204_v46  ;;  %v3213_v38 = vmul.f32 %v3211_v2, %v4213_v54  ;;  %v3204_v59 = vadd.f32 %v3202_v25, %v3188_v24  ;;  %v3205_v5 = vadd.f32 %v3203_v15, %v3189_v40 }
0x155a   : > { %v3218_v9 = vmul.f32 %v5277_v44, %v3212_v37  ;;  %v3219_v36 = vmul.f32 %v5277_v44, %v3213_v38  ;;  %v3239_v39 = vpop.permute.xlu1 %3238 }
0x155b   : > { %v3242_v13 = vsel %vm800_vm10, %v3239_v39, %v3241_v61  ;;  %v3243_v46 = vsel %vm800_vm10, %v3241_v61, %v3239_v39 }
0x155c   : > { %v3220_v33 = vadd.f32 %v3218_v9, %v3204_v59  ;;  %v3221_v54 = vadd.f32 %v3219_v36, %v3205_v5  ;;  %v3244_v12 = vmul.f32 %v5201_v0, %v3242_v13  ;;  %v3245_v35 = vmul.f32 %v5207_v50, %v3243_v46 }
0x155e   : > { %v3236_v44 = vadd.f32 %v3234_v60, %v3220_v33  ;;  %v3237_v22 = vadd.f32 %v3235_v32, %v3221_v54  ;;  %v3250_v23 = vmul.f32 %v5289_v10, %v3244_v12  ;;  %v3251_v21 = vmul.f32 %v5289_v10, %v3245_v35  ;;  %v2760_v10 = vld [vmem:[%s5427_s16 + $0x4] sm:$0xf] }
0x155f   : > { %v3277_v51 = vunpack.c.l.bf16 %v2760_v10  ;;  %v3798_v20 = vcombine.low %v2760_v10, %v2760_v10 }
0x1560   : > { %v3252_v45 = vadd.f32 %v3250_v23, %v3236_v44  ;;  %v3253_v34 = vadd.f32 %v3251_v21, %v3237_v22 }
0x1561   : > { %v3373_v14 = vrot.slane %v3798_v20, 2 }
0x1562   : > { %v3261_v1 = vadd.f32 %v3259_v6, %v3252_v45  ;;  %v3262_v62 = vadd.f32 %v3259_v6, %v3253_v34 }
0x1564   : > { %v3265_v48 = vrot.slane %v3261_v1, 4  ;;  %v3266_v0 = vrot.slane %v3262_v62, 4 }
0x1566   : > { %v3269_v18 = vmul.f32 %v3265_v48, %v3261_v1  ;;  %v3270_v50 = vmul.f32 %v3266_v0, %v3262_v62 }
0x1568   : > { %v3271_v49 = vsel %vm846_vm6, %v3269_v18, 0.0  ;;  %v3272_v16 = vsel %vm846_vm6, %v3270_v50, 0.0 }
0x1569   : > { %v3273_v19 = vadd.f32 %v3272_v16, %v3271_v49 }
0x156b   : > { %3274 = vadd.xlane.f32.xlu1 %v3273_v19 }
0x15f8   : > { %v3275_v11 = vpop.xlane.xlu1 %3274 }
0x15f9   : > { %v3276_v63 = vmul.f32 0.00390625, %v3275_v11 }
0x15fb   : > { %3832 = vmatpush3.msk.msra.mxu1 %vm846_vm6, %v3276_v63 }
0x15fc   : > { %3834 = vmatmul.mubr.msk.f32.vlgmr.msra.gmra.mrb[28].mxu1 %vm1188_vm15, %v3277_v51 }
0x15fd   : > { %3415 = vmatprep.mubr.bf16.mxu1 %v5504_v58 }
0x16cf   : > { %v3352_v7 = vpop.f32.mrb[28].mxu1 }
0x16d0   : > { %v3353_v41 = vadd.f32 %v3352_v7, %v3278_v57  ;;  %v3835_v3 = vpop.f32.mrb[29].mxu1 }
0x16d2   : > { %3358 = vperm.xlu0 %3894, %v3353_v41  }
0x16d6   : > { %3367 = vperm.xlu0 %3894, %v2755_v26  }
0x16da   : > { %3426 = vperm.xlu0 %3894, %v2758_v27  }
0x16de   : > { %3481 = vperm.xlu0 %3894, %v2756_v55  }
0x16e2   : > { %3490 = vperm.xlu0 %3894, %v2757_v4  }
0x1751   : > { %v3359_v56 = vpop.permute.xlu0 %3358 }
0x1752   : > { %v3361_v47 = vmul.f32 %v3359_v56, %v3269_v18  ;;  %v3362_v53 = vmul.f32 %v3359_v56, %v3270_v50 }
0x1754   : > { %v3363_v25 = vpack.c.bf16 %v3361_v47, %v3361_v47  ;;  %v3364_v15 = vpack.c.bf16 %v3362_v53, %v3362_v53 }
0x1755   : > { %v3368_v8 = vpop.permute.xlu0 %3367 }
0x1756   : > { %3799 = vmatprep.subr.msk.bf16.mxu1 %vm839_vm5, %v3364_v15  ;;  %v3378_v17 = vsel %vm839_vm5, %v3363_v25, 0  ;;  %v3475_v4 = vrot.slane %v3368_v8, 4 }
0x1757   : > { %3384 = vmatpush1.bf16.msra.mxu1 %v3378_v17 }
0x1759   : > { %v5366_v40 = vpop.permute.xlu0 %3426 }
0x175a   : > { %3800 = vmatmul.mubr.msk.bf16.vlgmr.msra.gmra.mrb[32].mxu1 %vm1188_vm15, %v3373_v14 }
0x175b   : > { %3598 = vmatprep.mubr.bf16.mxu1 %v5504_v58 }
0x175d   : > { %v3482_v20 = vpop.permute.xlu0 %3481 }
0x182d   : > { %v3417_v29 = vpop.f32.mrb[32].mxu1 }
0x182e   : > { %v3418_v2 = vadd.f32 %v3417_v29, %v3368_v8  ;;  %v3419_v24 = vpop.f32.mrb[33].mxu1 }
0x182f   : > { %v3420_v37 = vadd.f32 %v3419_v24, %v3368_v8  ;;  %v3421_v38 = vpop.f32.mrb[34].mxu1  ;;  %v2761_v24 = vld [vmem:[%s5427_s16 + $0x8] sm:$0xf]  ;;  %v3491_v8 = vpop.permute.xlu0 %3490 }
0x1830   : > { %v3429_v61 = vmul.f32 %v5366_v40, %v3418_v2  ;;  %v3422_v59 = vpop.f32.mrb[35].mxu1  ;;  %v3492_v38 = vrot.slane %v3482_v20, 4 }
0x1831   : > { %v3430_v5 = vmul.f32 %v5366_v40, %v3420_v37  ;;  %v3493_v37 = vrot.slane %v3491_v8, 4 }
0x1832   : > { %v5371_v9 = vadd.f32 %v3429_v61, %v5230_v43 }
0x1833   : > { %v5374_v36 = vadd.f32 %v3430_v5, %v5232_v31  ;;  %v3494_v61 = vsel %vm846_vm6, %v3492_v38, %v3493_v37 }
0x1834   : > { %v3433_v58 = vsel %vm846_vm6, %v5371_v9, 0.0 }
0x1835   : > { %v3434_v39 = vrot.slane %v3433_v58, 4  ;;  %v3440_v60 = vsel %vm846_vm6, %v5374_v36, 0.0 }
0x1836   : > { %v3441_v32 = vrot.slane %v3440_v60, 4 }
0x1837   : > { %v3435_v13 = vadd.f32 %v3434_v39, %v3433_v58 }
0x1838   : > { %v3442_v46 = vadd.f32 %v3441_v32, %v3440_v60 }
0x1839   : > { %v3436_v33 = vrot.slane %v3435_v13, 2 }
0x183a   : > { %v3443_v54 = vrot.slane %v3442_v46, 2 }
0x183b   : > { %v3437_v12 = vadd.f32 %v3436_v33, %v3435_v13 }
0x183c   : > { %v3444_v35 = vadd.f32 %v3443_v54, %v3442_v46 }
0x183d   : > { %v3438_v28 = vrot.slane %v3437_v12, 1 }
0x183e   : > { %v3445_v43 = vrot.slane %v3444_v35, 1 }
0x183f   : > { %v3439_v44 = vadd.f32 %v3438_v28, %v3437_v12 }
0x1840   : > { %v3446_v22 = vadd.f32 %v3445_v43, %v3444_v35  ;;  %v2762_v43 = vld [vmem:[%s5427_s16 + $0xc] sm:$0x3] }
0x1841   : > { %v3447_v31 = vmul.f32 0.25, %v3439_v44 }
0x1842   : > { %v3448_v23 = vmul.f32 0.25, %v3446_v22  ;;  %v3607_v22 = vrot.slane %v5366_v40, 4 }
0x1843   : > { %v3449_v21 = vsub.f32 %v5371_v9, %v3447_v31 }
0x1844   : > { %v3450_v45 = vsub.f32 %v5374_v36, %v3448_v23 }
0x1845   : > { %v3451_v34 = vmul.f32 %v3449_v21, %v3449_v21 }
0x1846   : > { %v3452_v6 = vmul.f32 %v3450_v45, %v3450_v45 }
0x1847   : > { %v3453_v1 = vsel %vm846_vm6, %v3451_v34, 0.0 }
0x1848   : > { %v3454_v62 = vrot.slane %v3453_v1, 4  ;;  %v3460_v48 = vsel %vm846_vm6, %v3452_v6, 0.0 }
0x1849   : > { %v3461_v0 = vrot.slane %v3460_v48, 4 }
0x184a   : > { %v3455_v18 = vadd.f32 %v3454_v62, %v3453_v1 }
0x184b   : > { %v3462_v50 = vadd.f32 %v3461_v0, %v3460_v48  ;;  %v3939_v0 = vld [vmem:[%s4081_s2] sm:$0xff] }
0x184c   : > { %v3456_v49 = vrot.slane %v3455_v18, 2 }
0x184d   : > { %v3463_v16 = vrot.slane %v3462_v50, 2 }
0x184e   : > { %v3457_v19 = vadd.f32 %v3456_v49, %v3455_v18  ;;  %v3637_v18 = vmul.f32 %v3939_v0, %v3635_v52 }
0x184f   : > { %v3464_v10 = vadd.f32 %v3463_v16, %v3462_v50 }
0x1850   : > { %v3458_v11 = vrot.slane %v3457_v19, 1 }
0x1851   : > { %v3465_v51 = vrot.slane %v3464_v10, 1 }
0x1852   : > { %v3459_v63 = vadd.f32 %v3458_v11, %v3457_v19 }
0x1853   : > { %v3466_v57 = vadd.f32 %v3465_v51, %v3464_v10 }
0x1854   : > { %v3467_v7 = vmul.f32 0.25, %v3459_v63 }
0x1855   : > { %v3468_v41 = vmul.f32 0.25, %v3466_v57 }
0x1856   : > { %v3469_v3 = vadd.f32 1e-06, %v3467_v7 }
0x1857   : > { %v3470_v26 = vadd.f32 1e-06, %v3468_v41 }
0x1858   : > { %3931 = vrsqrt.f32 %v3469_v3 }
0x1859   : > { %3933 = vrsqrt.f32 %v3470_v26 }
0x1862   : > { %v3932_v27 = vpop.eup %3931 }
0x1863   : > { %v3934_v55 = vpop.eup %3933  ;;  %v3473_v56 = vmul.f32 %v3932_v27, %v3449_v21 }
0x1864   : > { %v3474_v47 = vmul.f32 %v3934_v55, %v3450_v45 }
0x1865   : > { %v3477_v53 = vmul.f32 %v3475_v4, %v3473_v56 }
0x1866   : > { %v3478_v25 = vmul.f32 %v3475_v4, %v3474_v47 }
0x1867   : > { %v3484_v15 = vadd.f32 %v3482_v20, %v3477_v53 }
0x1868   : > { %v3485_v17 = vadd.f32 %v3482_v20, %v3478_v25 }
0x1869   : > { %v3486_v14 = vpack.c.bf16 %v3484_v15, %v3484_v15 }
0x186a   : > { %v3487_v29 = vpack.c.bf16 %v3485_v17, %v3485_v17 }
0x186b   : > { %v3500_v2 = vsel %vm839_vm5, %v3486_v14, 0 }
0x186c   : > { %3801 = vmatprep.subr.msk.bf16.mxu0 %vm839_vm5, %v3487_v29 }
0x186d   : > { %3506 = vmatpush1.bf16.msra.mxu0 %v3500_v2 }
0x1870   : > { %3802 = vmatmul.mubr.msk.bf16.vlgmr.msra.gmra.mrb[36].mxu0 %vm1188_vm15, %v2761_v24 }
0x1943   : > { %v3539_v59 = vpop.f32.mrb[36].mxu0 }
0x1944   : > { %v3540_v5 = vadd.f32 %v3539_v59, %v3494_v61  ;;  %v3541_v58 = vpop.f32.mrb[37].mxu0 }
0x1945   : > { %v3542_v39 = vadd.f32 %v3541_v58, %v3494_v61  ;;  %v3543_v60 = vpop.f32.mrb[38].mxu0 }
0x1946   : > { %v3548_v32 = vrot.slane %v3540_v5, 4  ;;  %v3544_v13 = vpop.f32.mrb[39].mxu0 }
0x1947   : > { %v3549_v46 = vrot.slane %v3542_v39, 4 }
0x1948   : > { %v3552_v33 = vmul.f32 %v3548_v32, %v3540_v5 }
0x1949   : > { %v3553_v54 = vmul.f32 %v3549_v46, %v3542_v39 }
0x194a   : > { %v3554_v12 = vpack.c.bf16 %v3552_v33, %v3552_v33 }
0x194b   : > { %v3555_v35 = vpack.c.bf16 %v3553_v54, %v3553_v54 }
0x194c   : > { %v3561_v28 = vsel %vm839_vm5, %v3554_v12, 0 }
0x194d   : > { %3803 = vmatprep.subr.msk.bf16.mxu1 %vm839_vm5, %v3555_v35 }
0x194e   : > { %3567 = vmatpush1.bf16.msra.mxu1 %v3561_v28 }
0x1951   : > { %3804 = vmatmul.mubr.msk.bf16.vlgmr.msra.gmra.mrb[36].mxu1 %vm1188_vm15, %v2762_v43 }
0x1a24   : > { %v3600_v44 = vpop.f32.mrb[36].mxu1 }
0x1a25   : > { %v3601_v31 = vadd.f32 %v3600_v44, %v3493_v37  ;;  %v3602_v23 = vpop.f32.mrb[37].mxu1 }
0x1a26   : > { %v3603_v21 = vadd.f32 %v3602_v23, %v3493_v37  ;;  %v3604_v45 = vpop.f32.mrb[38].mxu1 }
0x1a27   : > { %v3609_v34 = vmul.f32 %v3607_v22, %v3601_v31  ;;  %v3605_v6 = vpop.f32.mrb[39].mxu1 }
0x1a28   : > { %v3610_v1 = vmul.f32 %v3607_v22, %v3603_v21 }
0x1a29   : > { %v3611_v62 = vadd.f32 %v3609_v34, %v5371_v9 }
0x1a2a   : > { %v3612_v48 = vadd.f32 %v3610_v1, %v5374_v36 }
0x1a2c   : > { %v3640_v50 = vcombine.low %v3611_v62, %v3612_v48 }
0x1a2e   : > { %v3642_v40 = vadd.f32 %v3640_v50, %v3637_v18 }
0x1a30   : > { %3644 = vst [vmem:[%s635_s29] sm:$0xff] %v3642_v40 }
0x1a31 PF: > { %s5513_s4 = sld [smem:[#allocation2_spill]] }
0x1a37   : > { %s30_s0 = sadd.s32 1, %s5513_s4  }
0x1a38   : > { %p27_p4 = scmp.ge.s32.totalorder %s30_s0, 4  }
0x1a3a   :  { %29 = sbr.rel (!%p27_p4) target bundleno = 11 (0xb), region = 137 }

</bundles_post_ra>
